<compile_context>
chip_gen: v7x
topology: tpu7x:2x2x1
jax: 0.10.0
libtpu: 0.0.40
codegen_flags: <defaults>
</compile_context>

<pallas_src>
import functools
import math

import numpy as np
import jax
import jax.numpy as jnp
from jax.experimental import pallas as pl
from jax.experimental.pallas import tpu as pltpu

LANE = 128


def _round_up(n, m):
    return ((n + m - 1) // m) * m


# ----------------------------- Pallas kernel --------------------------------
def _face_backbone_kernel(x_ref, wtap_ref, bconv_ref, alpha_ref, wfc_ref, bfc_ref,
                          out_ref, acc_ref, *, rows, width, cin, inv_hw):
    """One (batch-tile, row-tile) grid step of the fused backbone.

    x_ref    : (TB, rows+2, width+2, Cin)  bf16  padded NHWC row band (1-row halo)
    wtap_ref : (9, Cin, Cout_p)            bf16  3x3 conv taps, Cout padded to 128
    bconv_ref: (1, Cout_p)                 f32
    alpha_ref: (1, Cout_p)                 f32   PReLU per-channel slopes
    wfc_ref  : (Cout_p, D_p)               bf16
    bfc_ref  : (1, D_p)                    f32
    out_ref  : (TB, D_p)                   f32   (resident across the row-tile axis)
    acc_ref  : (TB, Cout_p)                f32   running pooled sum (VMEM scratch)
    """
    t = pl.program_id(1)

    @pl.when(t == 0)
    def _():
        acc_ref[...] = jnp.zeros_like(acc_ref)

    tb = x_ref.shape[0]
    cout_p = wtap_ref.shape[-1]
    m = tb * rows * width

    # 3x3 conv as 9 accumulated long-M GEMMs over shifted NHWC slices (MXU),
    # f32 accumulation.  No im2col materialization in HBM.
    y = jnp.zeros((m, cout_p), jnp.float32)
    for dy in range(3):
        for dx in range(3):
            slab = x_ref[:, dy:dy + rows, dx:dx + width, :]   # (TB, rows, width, Cin)
            slab = slab.reshape(m, cin)
            y = y + jnp.dot(slab, wtap_ref[dy * 3 + dx],
                            preferred_element_type=jnp.float32)

    # bias + PReLU on the VPU (kept in f32 — safe on v5e too).
    y = y + bconv_ref[...]
    alpha = alpha_ref[...]
    y = jnp.where(y > 0, y, y * alpha)

    # Running pooled sum; never materialize the full (B, H*W, Cout) activation.
    acc_ref[...] += jnp.sum(y.reshape(tb, rows * width, cout_p), axis=1)

    # Finalize: apply the 1/(H*W) scale once, embedding GEMM, lane-dense store.
    @pl.when(t == pl.num_programs(1) - 1)
    def _():
        pooled = acc_ref[...] * inv_hw                        # (TB, Cout_p) f32
        feat = jnp.dot(pooled.astype(wfc_ref.dtype), wfc_ref[...],
                       preferred_element_type=jnp.float32) + bfc_ref[...]
        out_ref[...] = feat.astype(out_ref.dtype)


# ------------------------------ JAX wrapper ----------------------------------
def _pick_row_tile(h, w, cin, tb, cout_p, budget_bytes=4 * 1024 * 1024):
    """Largest divisor of H whose per-step working set stays comfortably in VMEM
    (headroom so the same tile also fits v7x's smaller 64 MiB VMEM)."""
    del cin
    for tr in range(h, 0, -1):
        if h % tr:
            continue
        act = tb * tr * w * cout_p * 4                                 # f32 conv tile
        xin = 2 * tb * (tr + 2) * _round_up(w + 2, 16) * LANE * 2      # 2 bufs, bf16
        if act + xin <= budget_bytes:
            return tr
    return 1


def face_model_forward(x, params, row_tile=None):
    """FaceModel.forward: feat = backbone(data).  x is NCHW float32 (like PyTorch)."""
    w_conv, b_conv, alpha, w_fc, b_fc = params
    B, Cin, H, W = x.shape
    Cout, Cin_w, kh, kw = w_conv.shape
    assert (Cin_w, kh, kw) == (Cin, 3, 3)
    D = w_fc.shape[0]

    cout_p = _round_up(Cout, LANE)
    d_p = _round_up(D, LANE)

    # Pack parameters into kernel layout (zero-padded to 128 lanes; bf16 GEMM weights).
    w_taps = jnp.transpose(w_conv, (2, 3, 1, 0)).reshape(9, Cin, Cout)
    w_taps = jnp.pad(w_taps, ((0, 0), (0, 0), (0, cout_p - Cout))).astype(jnp.bfloat16)
    b_conv_p = jnp.pad(b_conv, (0, cout_p - Cout)).reshape(1, cout_p).astype(jnp.float32)
    alpha_p = jnp.pad(alpha, (0, cout_p - Cout)).reshape(1, cout_p).astype(jnp.float32)
    w_fc_p = jnp.pad(w_fc.T, ((0, cout_p - Cout), (0, d_p - D))).astype(jnp.bfloat16)
    b_fc_p = jnp.pad(b_fc, (0, d_p - D)).reshape(1, d_p).astype(jnp.float32)

    # Batch / row tiling.
    TB = math.gcd(B, 8)
    if row_tile is None:
        row_tile = _pick_row_tile(H, W, Cin, TB, cout_p)
    assert H % row_tile == 0, "row_tile must divide H"
    NT = H // row_tile

    # NCHW -> NHWC (C on lanes), zero-pad spatially, gather overlapping row bands
    # (1-row halo each side) so the conv needs no cross-tile halo DMA inside the
    # kernel.  ~(row_tile+2)/row_tile expansion instead of the 9x im2col expansion.
    x_nhwc = jnp.transpose(x, (0, 2, 3, 1))
    x_padded = jnp.pad(x_nhwc, ((0, 0), (1, 1), (1, 1), (0, 0)))
    row_idx = jnp.arange(NT)[:, None] * row_tile + jnp.arange(row_tile + 2)[None, :]
    x_tiles = x_padded[:, row_idx].astype(jnp.bfloat16)   # (B, NT, rt+2, W+2, Cin)

    kernel = functools.partial(_face_backbone_kernel, rows=row_tile, width=W,
                               cin=Cin, inv_hw=1.0 / float(H * W))

    out = pl.pallas_call(
        kernel,
        out_shape=jax.ShapeDtypeStruct((B, d_p), jnp.float32),
        grid_spec=pltpu.PrefetchScalarGridSpec(
            num_scalar_prefetch=0,
            grid=(B // TB, NT),                         # reduction (row) axis last
            in_specs=[
                pl.BlockSpec((TB, None, row_tile + 2, W + 2, Cin),
                             lambda b, t: (b, t, 0, 0, 0)),
                pl.BlockSpec((9, Cin, cout_p), lambda b, t: (0, 0, 0)),
                pl.BlockSpec((1, cout_p), lambda b, t: (0, 0)),
                pl.BlockSpec((1, cout_p), lambda b, t: (0, 0)),
                pl.BlockSpec((cout_p, d_p), lambda b, t: (0, 0)),
                pl.BlockSpec((1, d_p), lambda b, t: (0, 0)),
            ],
            out_specs=pl.BlockSpec((TB, d_p), lambda b, t: (b, 0)),
            scratch_shapes=[pltpu.VMEM((TB, cout_p), jnp.float32)],
        ),
        compiler_params=pltpu.CompilerParams(
            dimension_semantics=("parallel", "arbitrary"),
            vmem_limit_bytes=64 * 1024 * 1024,
        ),
    )(x_tiles, w_taps, b_conv_p, alpha_p, w_fc_p, b_fc_p)

    return out[:, :D]


def init_params(key, cin=4, cout=32, feat_dim=64):
    """Deterministic synthetic backbone parameters (PyTorch-equivalent shapes)."""
    k1, k2, k3 = jax.random.split(key, 3)
    w_conv = jax.random.normal(k1, (cout, cin, 3, 3), jnp.float32) * 0.05
    b_conv = jax.random.normal(k2, (cout,), jnp.float32) * 0.01
    alpha = jnp.full((cout,), 0.25, jnp.float32)               # PReLU default
    w_fc = jax.random.normal(k3, (feat_dim, cout), jnp.float32) * 0.05
    b_fc = jnp.zeros((feat_dim,), jnp.float32)
    return (w_conv, b_conv, alpha, w_fc, b_fc)


def _reference_forward(x, params):
    """Pure-JAX reference mirroring the kernel's numerics (bf16 GEMMs, f32 accum)."""
    w_conv, b_conv, alpha, w_fc, b_fc = params
    B, Cin, H, W = x.shape
    Cout = w_conv.shape[0]
    x_nhwc = jnp.transpose(x, (0, 2, 3, 1)).astype(jnp.bfloat16)
    xp = jnp.pad(x_nhwc, ((0, 0), (1, 1), (1, 1), (0, 0)))
    w_t = jnp.transpose(w_conv, (2, 3, 1, 0)).astype(jnp.bfloat16)   # (3,3,Cin,Cout)
    y = jnp.zeros((B, H, W, Cout), jnp.float32)
    for dy in range(3):
        for dx in range(3):
            y = y + jnp.einsum("bhwc,co->bhwo", xp[:, dy:dy + H, dx:dx + W, :],
                               w_t[dy, dx], preferred_element_type=jnp.float32)
    y = y + b_conv
    y = jnp.where(y > 0, y, y * alpha)
    pooled = jnp.mean(y, axis=(1, 2))                                 # (B, Cout)
    feat = jnp.dot(pooled.astype(jnp.bfloat16), w_fc.T.astype(jnp.bfloat16),
                   preferred_element_type=jnp.float32) + b_fc
    return feat


if __name__ == "__main__":
    key = jax.random.PRNGKey(0)
    kx, kp = jax.random.split(key)

    B, Cin, H, W = 2, 4, 16, 16
    x = jax.random.normal(kx, (B, Cin, H, W), jnp.float32)   # NCHW, like PyTorch
    params = init_params(kp, cin=Cin, cout=32, feat_dim=64)

    # row_tile=8 -> 2 row tiles, exercising the init/accumulate/finalize path.
    feat = face_model_forward(x, params, row_tile=8)
    feat = jax.block_until_ready(feat)

    ref = jax.block_until_ready(_reference_forward(x, params))
    assert feat.shape == (B, 64), feat.shape
    np.testing.assert_allclose(np.asarray(feat), np.asarray(ref),
                               rtol=1e-2, atol=1e-2)
    print("KERNEL_OK")
</pallas_src>

<mosaic_0001>
module attributes {stable_mosaic.version = 11 : i64} {
  func.func @_face_backbone_kernel(%arg0: i32, %arg1: i32, %arg2: memref<2x1x10x18x4xbf16, #tpu.memory_space<vmem>>, %arg3: memref<9x4x128xbf16, #tpu.memory_space<vmem>>, %arg4: memref<1x128xf32, #tpu.memory_space<vmem>>, %arg5: memref<1x128xf32, #tpu.memory_space<vmem>>, %arg6: memref<128x128xbf16, #tpu.memory_space<vmem>>, %arg7: memref<1x128xf32, #tpu.memory_space<vmem>>, %arg8: memref<2x128xf32, #tpu.memory_space<vmem>>, %arg9: memref<2x128xf32, #tpu.memory_space<vmem>>) attributes {dimension_semantics = [#tpu.dimension_semantics<parallel>, #tpu.dimension_semantics<arbitrary>], iteration_bounds = array<i64: 1, 2>, scalar_prefetch = 0 : i64, scratch_operands = 1 : i64, tpu.core_type = #tpu.core_type<tc>, window_params = [{transform_indices = @transform_0, window_bounds = array<i64: 2, 1, 10, 18, 4>}, {pipeline_mode = #tpu.pipeline_mode<synchronous>, transform_indices = @transform_1, window_bounds = array<i64: 9, 4, 128>}, {pipeline_mode = #tpu.pipeline_mode<synchronous>, transform_indices = @transform_2, window_bounds = array<i64: 1, 128>}, {pipeline_mode = #tpu.pipeline_mode<synchronous>, transform_indices = @transform_3, window_bounds = array<i64: 1, 128>}, {pipeline_mode = #tpu.pipeline_mode<synchronous>, transform_indices = @transform_4, window_bounds = array<i64: 128, 128>}, {pipeline_mode = #tpu.pipeline_mode<synchronous>, transform_indices = @transform_5, window_bounds = array<i64: 1, 128>}, {transform_indices = @transform_6, window_bounds = array<i64: 2, 128>}]} {
    %c0_i32 = arith.constant 0 : i32
    %0 = arith.cmpi eq, %arg1, %c0_i32 : i32
    %1 = arith.extui %0 : i1 to i32
    %c0_i32_0 = arith.constant 0 : i32
    %2 = arith.cmpi ne, %1, %c0_i32_0 : i32
    scf.if %2 {
      %cst_84 = arith.constant 0.000000e+00 : f32
      %84 = vector.broadcast %cst_84 : f32 to vector<2x128xf32>
      %c0_85 = arith.constant 0 : index
      %c0_86 = arith.constant 0 : index
      %85 = vector.load %arg9[%c0_85, %c0_86] : memref<2x128xf32, #tpu.memory_space<vmem>>, vector<2x128xf32>
      tpu.vector_store %arg9[%c0_85, %c0_86], %84 {strides = array<i32>} : memref<2x128xf32, #tpu.memory_space<vmem>>, vector<2x128xf32>,
    } else {
    }
    %cst = arith.constant 0.000000e+00 : f32
    %3 = vector.broadcast %cst : f32 to vector<256x128xf32>
    %c0 = arith.constant 0 : index
    %c0_1 = arith.constant 0 : index
    %c0_2 = arith.constant 0 : index
    %c0_3 = arith.constant 0 : index
    %c0_4 = arith.constant 0 : index
    %4 = vector.load %arg2[%c0, %c0_1, %c0_2, %c0_3, %c0_4] : memref<2x1x10x18x4xbf16, #tpu.memory_space<vmem>>, vector<2x1x8x16x4xbf16>
    %5 = vector.shape_cast %4 : vector<2x1x8x16x4xbf16> to vector<2x8x16x4xbf16>
    %6 = vector.shape_cast %5 : vector<2x8x16x4xbf16> to vector<256x4xbf16>
    %c0_5 = arith.constant 0 : index
    %c0_6 = arith.constant 0 : index
    %c0_7 = arith.constant 0 : index
    %7 = vector.load %arg3[%c0_5, %c0_6, %c0_7] : memref<9x4x128xbf16, #tpu.memory_space<vmem>>, vector<1x4x128xbf16>
    %8 = vector.shape_cast %7 : vector<1x4x128xbf16> to vector<4x128xbf16>
    %cst_8 = arith.constant dense<0.000000e+00> : vector<256x128xf32>
    %9 = tpu.matmul %6, %8, %cst_8 {dimension_numbers = #tpu.dot_dimension_numbers<[1], [0], [0], [1], [0, 0, 1, 1], [], []>} : vector<256x4xbf16>, vector<4x128xbf16>, vector<256x128xf32> -> vector<256x128xf32>
    %10 = arith.addf %3, %9 : vector<256x128xf32>
    %c0_9 = arith.constant 0 : index
    %c0_10 = arith.constant 0 : index
    %c0_11 = arith.constant 0 : index
    %c1 = arith.constant 1 : index
    %c0_12 = arith.constant 0 : index
    %11 = vector.load %arg2[%c0_9, %c0_10, %c0_11, %c1, %c0_12] : memref<2x1x10x18x4xbf16, #tpu.memory_space<vmem>>, vector<2x1x8x16x4xbf16>
    %12 = vector.shape_cast %11 : vector<2x1x8x16x4xbf16> to vector<2x8x16x4xbf16>
    %13 = vector.shape_cast %12 : vector<2x8x16x4xbf16> to vector<256x4xbf16>
    %c1_13 = arith.constant 1 : index
    %c0_14 = arith.constant 0 : index
    %c0_15 = arith.constant 0 : index
    %14 = vector.load %arg3[%c1_13, %c0_14, %c0_15] : memref<9x4x128xbf16, #tpu.memory_space<vmem>>, vector<1x4x128xbf16>
    %15 = vector.shape_cast %14 : vector<1x4x128xbf16> to vector<4x128xbf16>
    %cst_16 = arith.constant dense<0.000000e+00> : vector<256x128xf32>
    %16 = tpu.matmul %13, %15, %cst_16 {dimension_numbers = #tpu.dot_dimension_numbers<[1], [0], [0], [1], [0, 0, 1, 1], [], []>} : vector<256x4xbf16>, vector<4x128xbf16>, vector<256x128xf32> -> vector<256x128xf32>
    %17 = arith.addf %10, %16 : vector<256x128xf32>
    %c0_17 = arith.constant 0 : index
    %c0_18 = arith.constant 0 : index
    %c0_19 = arith.constant 0 : index
    %c2 = arith.constant 2 : index
    %c0_20 = arith.constant 0 : index
    %18 = vector.load %arg2[%c0_17, %c0_18, %c0_19, %c2, %c0_20] : memref<2x1x10x18x4xbf16, #tpu.memory_space<vmem>>, vector<2x1x8x16x4xbf16>
    %19 = vector.shape_cast %18 : vector<2x1x8x16x4xbf16> to vector<2x8x16x4xbf16>
    %20 = vector.shape_cast %19 : vector<2x8x16x4xbf16> to vector<256x4xbf16>
    %c2_21 = arith.constant 2 : index
    %c0_22 = arith.constant 0 : index
    %c0_23 = arith.constant 0 : index
    %21 = vector.load %arg3[%c2_21, %c0_22, %c0_23] : memref<9x4x128xbf16, #tpu.memory_space<vmem>>, vector<1x4x128xbf16>
    %22 = vector.shape_cast %21 : vector<1x4x128xbf16> to vector<4x128xbf16>
    %cst_24 = arith.constant dense<0.000000e+00> : vector<256x128xf32>
    %23 = tpu.matmul %20, %22, %cst_24 {dimension_numbers = #tpu.dot_dimension_numbers<[1], [0], [0], [1], [0, 0, 1, 1], [], []>} : vector<256x4xbf16>, vector<4x128xbf16>, vector<256x128xf32> -> vector<256x128xf32>
    %24 = arith.addf %17, %23 : vector<256x128xf32>
    %c0_25 = arith.constant 0 : index
    %c0_26 = arith.constant 0 : index
    %c1_27 = arith.constant 1 : index
    %c0_28 = arith.constant 0 : index
    %c0_29 = arith.constant 0 : index
    %25 = vector.load %arg2[%c0_25, %c0_26, %c1_27, %c0_28, %c0_29] : memref<2x1x10x18x4xbf16, #tpu.memory_space<vmem>>, vector<2x1x8x16x4xbf16>
    %26 = vector.shape_cast %25 : vector<2x1x8x16x4xbf16> to vector<2x8x16x4xbf16>
    %27 = vector.shape_cast %26 : vector<2x8x16x4xbf16> to vector<256x4xbf16>
    %c3 = arith.constant 3 : index
    %c0_30 = arith.constant 0 : index
    %c0_31 = arith.constant 0 : index
    %28 = vector.load %arg3[%c3, %c0_30, %c0_31] : memref<9x4x128xbf16, #tpu.memory_space<vmem>>, vector<1x4x128xbf16>
    %29 = vector.shape_cast %28 : vector<1x4x128xbf16> to vector<4x128xbf16>
    %cst_32 = arith.constant dense<0.000000e+00> : vector<256x128xf32>
    %30 = tpu.matmul %27, %29, %cst_32 {dimension_numbers = #tpu.dot_dimension_numbers<[1], [0], [0], [1], [0, 0, 1, 1], [], []>} : vector<256x4xbf16>, vector<4x128xbf16>, vector<256x128xf32> -> vector<256x128xf32>
    %31 = arith.addf %24, %30 : vector<256x128xf32>
    %c0_33 = arith.constant 0 : index
    %c0_34 = arith.constant 0 : index
    %c1_35 = arith.constant 1 : index
    %c1_36 = arith.constant 1 : index
    %c0_37 = arith.constant 0 : index
    %32 = vector.load %arg2[%c0_33, %c0_34, %c1_35, %c1_36, %c0_37] : memref<2x1x10x18x4xbf16, #tpu.memory_space<vmem>>, vector<2x1x8x16x4xbf16>
    %33 = vector.shape_cast %32 : vector<2x1x8x16x4xbf16> to vector<2x8x16x4xbf16>
    %34 = vector.shape_cast %33 : vector<2x8x16x4xbf16> to vector<256x4xbf16>
    %c4 = arith.constant 4 : index
    %c0_38 = arith.constant 0 : index
    %c0_39 = arith.constant 0 : index
    %35 = vector.load %arg3[%c4, %c0_38, %c0_39] : memref<9x4x128xbf16, #tpu.memory_space<vmem>>, vector<1x4x128xbf16>
    %36 = vector.shape_cast %35 : vector<1x4x128xbf16> to vector<4x128xbf16>
    %cst_40 = arith.constant dense<0.000000e+00> : vector<256x128xf32>
    %37 = tpu.matmul %34, %36, %cst_40 {dimension_numbers = #tpu.dot_dimension_numbers<[1], [0], [0], [1], [0, 0, 1, 1], [], []>} : vector<256x4xbf16>, vector<4x128xbf16>, vector<256x128xf32> -> vector<256x128xf32>
    %38 = arith.addf %31, %37 : vector<256x128xf32>
    %c0_41 = arith.constant 0 : index
    %c0_42 = arith.constant 0 : index
    %c1_43 = arith.constant 1 : index
    %c2_44 = arith.constant 2 : index
    %c0_45 = arith.constant 0 : index
    %39 = vector.load %arg2[%c0_41, %c0_42, %c1_43, %c2_44, %c0_45] : memref<2x1x10x18x4xbf16, #tpu.memory_space<vmem>>, vector<2x1x8x16x4xbf16>
    %40 = vector.shape_cast %39 : vector<2x1x8x16x4xbf16> to vector<2x8x16x4xbf16>
    %41 = vector.shape_cast %40 : vector<2x8x16x4xbf16> to vector<256x4xbf16>
    %c5 = arith.constant 5 : index
    %c0_46 = arith.constant 0 : index
    %c0_47 = arith.constant 0 : index
    %42 = vector.load %arg3[%c5, %c0_46, %c0_47] : memref<9x4x128xbf16, #tpu.memory_space<vmem>>, vector<1x4x128xbf16>
    %43 = vector.shape_cast %42 : vector<1x4x128xbf16> to vector<4x128xbf16>
    %cst_48 = arith.constant dense<0.000000e+00> : vector<256x128xf32>
    %44 = tpu.matmul %41, %43, %cst_48 {dimension_numbers = #tpu.dot_dimension_numbers<[1], [0], [0], [1], [0, 0, 1, 1], [], []>} : vector<256x4xbf16>, vector<4x128xbf16>, vector<256x128xf32> -> vector<256x128xf32>
    %45 = arith.addf %38, %44 : vector<256x128xf32>
    %c0_49 = arith.constant 0 : index
    %c0_50 = arith.constant 0 : index
    %c2_51 = arith.constant 2 : index
    %c0_52 = arith.constant 0 : index
    %c0_53 = arith.constant 0 : index
    %46 = vector.load %arg2[%c0_49, %c0_50, %c2_51, %c0_52, %c0_53] : memref<2x1x10x18x4xbf16, #tpu.memory_space<vmem>>, vector<2x1x8x16x4xbf16>
    %47 = vector.shape_cast %46 : vector<2x1x8x16x4xbf16> to vector<2x8x16x4xbf16>
    %48 = vector.shape_cast %47 : vector<2x8x16x4xbf16> to vector<256x4xbf16>
    %c6 = arith.constant 6 : index
    %c0_54 = arith.constant 0 : index
    %c0_55 = arith.constant 0 : index
    %49 = vector.load %arg3[%c6, %c0_54, %c0_55] : memref<9x4x128xbf16, #tpu.memory_space<vmem>>, vector<1x4x128xbf16>
    %50 = vector.shape_cast %49 : vector<1x4x128xbf16> to vector<4x128xbf16>
    %cst_56 = arith.constant dense<0.000000e+00> : vector<256x128xf32>
    %51 = tpu.matmul %48, %50, %cst_56 {dimension_numbers = #tpu.dot_dimension_numbers<[1], [0], [0], [1], [0, 0, 1, 1], [], []>} : vector<256x4xbf16>, vector<4x128xbf16>, vector<256x128xf32> -> vector<256x128xf32>
    %52 = arith.addf %45, %51 : vector<256x128xf32>
    %c0_57 = arith.constant 0 : index
    %c0_58 = arith.constant 0 : index
    %c2_59 = arith.constant 2 : index
    %c1_60 = arith.constant 1 : index
    %c0_61 = arith.constant 0 : index
    %53 = vector.load %arg2[%c0_57, %c0_58, %c2_59, %c1_60, %c0_61] : memref<2x1x10x18x4xbf16, #tpu.memory_space<vmem>>, vector<2x1x8x16x4xbf16>
    %54 = vector.shape_cast %53 : vector<2x1x8x16x4xbf16> to vector<2x8x16x4xbf16>
    %55 = vector.shape_cast %54 : vector<2x8x16x4xbf16> to vector<256x4xbf16>
    %c7 = arith.constant 7 : index
    %c0_62 = arith.constant 0 : index
    %c0_63 = arith.constant 0 : index
    %56 = vector.load %arg3[%c7, %c0_62, %c0_63] : memref<9x4x128xbf16, #tpu.memory_space<vmem>>, vector<1x4x128xbf16>
    %57 = vector.shape_cast %56 : vector<1x4x128xbf16> to vector<4x128xbf16>
    %cst_64 = arith.constant dense<0.000000e+00> : vector<256x128xf32>
    %58 = tpu.matmul %55, %57, %cst_64 {dimension_numbers = #tpu.dot_dimension_numbers<[1], [0], [0], [1], [0, 0, 1, 1], [], []>} : vector<256x4xbf16>, vector<4x128xbf16>, vector<256x128xf32> -> vector<256x128xf32>
    %59 = arith.addf %52, %58 : vector<256x128xf32>
    %c0_65 = arith.constant 0 : index
    %c0_66 = arith.constant 0 : index
    %c2_67 = arith.constant 2 : index
    %c2_68 = arith.constant 2 : index
    %c0_69 = arith.constant 0 : index
    %60 = vector.load %arg2[%c0_65, %c0_66, %c2_67, %c2_68, %c0_69] : memref<2x1x10x18x4xbf16, #tpu.memory_space<vmem>>, vector<2x1x8x16x4xbf16>
    %61 = vector.shape_cast %60 : vector<2x1x8x16x4xbf16> to vector<2x8x16x4xbf16>
    %62 = vector.shape_cast %61 : vector<2x8x16x4xbf16> to vector<256x4xbf16>
    %c8 = arith.constant 8 : index
    %c0_70 = arith.constant 0 : index
    %c0_71 = arith.constant 0 : index
    %63 = vector.load %arg3[%c8, %c0_70, %c0_71] : memref<9x4x128xbf16, #tpu.memory_space<vmem>>, vector<1x4x128xbf16>
    %64 = vector.shape_cast %63 : vector<1x4x128xbf16> to vector<4x128xbf16>
    %cst_72 = arith.constant dense<0.000000e+00> : vector<256x128xf32>
    %65 = tpu.matmul %62, %64, %cst_72 {dimension_numbers = #tpu.dot_dimension_numbers<[1], [0], [0], [1], [0, 0, 1, 1], [], []>} : vector<256x4xbf16>, vector<4x128xbf16>, vector<256x128xf32> -> vector<256x128xf32>
    %66 = arith.addf %59, %65 : vector<256x128xf32>
    %c0_73 = arith.constant 0 : index
    %c0_74 = arith.constant 0 : index
    %67 = vector.load %arg4[%c0_73, %c0_74] : memref<1x128xf32, #tpu.memory_space<vmem>>, vector<1x128xf32>
    %68 = vector.broadcast %67 : vector<1x128xf32> to vector<256x128xf32>
    %69 = arith.addf %66, %68 : vector<256x128xf32>
    %c0_75 = arith.constant 0 : index
    %c0_76 = arith.constant 0 : index
    %70 = vector.load %arg5[%c0_75, %c0_76] : memref<1x128xf32, #tpu.memory_space<vmem>>, vector<1x128xf32>
    %cst_77 = arith.constant 0.000000e+00 : f32
    %71 = vector.broadcast %cst_77 : f32 to vector<256x128xf32>
    %72 = arith.cmpf ogt, %69, %71 : vector<256x128xf32>
    %73 = vector.broadcast %70 : vector<1x128xf32> to vector<256x128xf32>
    %74 = arith.mulf %69, %73 : vector<256x128xf32>
    %75 = arith.select %72, %69, %74 : vector<256x128xi1>, vector<256x128xf32>
    %c0_78 = arith.constant 0 : index
    %c0_79 = arith.constant 0 : index
    %76 = vector.load %arg9[%c0_78, %c0_79] : memref<2x128xf32, #tpu.memory_space<vmem>>, vector<2x128xf32>
    %77 = vector.shape_cast %75 : vector<256x128xf32> to vector<2x128x128xf32>
    %cst_80 = arith.constant dense<0.000000e+00> : vector<2x128xf32>
    %78 = vector.multi_reduction <add>, %77, %cst_80 [1] : vector<2x128x128xf32> to vector<2x128xf32>
    %79 = arith.addf %76, %78 : vector<2x128xf32>
    %c0_81 = arith.constant 0 : index
    %c0_82 = arith.constant 0 : index
    %80 = vector.load %arg9[%c0_81, %c0_82] : memref<2x128xf32, #tpu.memory_space<vmem>>, vector<2x128xf32>
    tpu.vector_store %arg9[%c0_81, %c0_82], %79 {strides = array<i32>} : memref<2x128xf32, #tpu.memory_space<vmem>>, vector<2x128xf32>,
    %c1_i32 = arith.constant 1 : i32
    %81 = arith.cmpi eq, %arg1, %c1_i32 : i32
    %82 = arith.extui %81 : i1 to i32
    %c0_i32_83 = arith.constant 0 : i32
    %83 = arith.cmpi ne, %82, %c0_i32_83 : i32
    scf.if %83 {
      %c0_84 = arith.constant 0 : index
      %c0_85 = arith.constant 0 : index
      %84 = vector.load %arg9[%c0_84, %c0_85] : memref<2x128xf32, #tpu.memory_space<vmem>>, vector<2x128xf32>
      %cst_86 = arith.constant 3.906250e-03 : f32
      %85 = vector.broadcast %cst_86 : f32 to vector<2x128xf32>
      %86 = arith.mulf %84, %85 : vector<2x128xf32>
      %87 = arith.truncf %86 : vector<2x128xf32> to vector<2x128xbf16>
      %c0_87 = arith.constant 0 : index
      %c0_88 = arith.constant 0 : index
      %88 = vector.load %arg6[%c0_87, %c0_88] : memref<128x128xbf16, #tpu.memory_space<vmem>>, vector<128x128xbf16>
      %cst_89 = arith.constant dense<0.000000e+00> : vector<2x128xf32>
      %89 = tpu.matmul %87, %88, %cst_89 {dimension_numbers = #tpu.dot_dimension_numbers<[1], [0], [0], [1], [0, 0, 1, 1], [], []>} : vector<2x128xbf16>, vector<128x128xbf16>, vector<2x128xf32> -> vector<2x128xf32>
      %c0_90 = arith.constant 0 : index
      %c0_91 = arith.constant 0 : index
      %90 = vector.load %arg7[%c0_90, %c0_91] : memref<1x128xf32, #tpu.memory_space<vmem>>, vector<1x128xf32>
      %91 = vector.broadcast %90 : vector<1x128xf32> to vector<2x128xf32>
      %92 = arith.addf %89, %91 : vector<2x128xf32>
      %c0_92 = arith.constant 0 : index
      %c0_93 = arith.constant 0 : index
      %93 = vector.load %arg8[%c0_92, %c0_93] : memref<2x128xf32, #tpu.memory_space<vmem>>, vector<2x128xf32>
      tpu.vector_store %arg8[%c0_92, %c0_93], %92 {strides = array<i32>} : memref<2x128xf32, #tpu.memory_space<vmem>>, vector<2x128xf32>,
    } else {
    }
    return
  }
  func.func @transform_0(%arg0: i32, %arg1: i32) -> (i32, i32, i32, i32, i32) {
    %c0_i32 = arith.constant 0 : i32
    %c0_i32_0 = arith.constant 0 : i32
    %c0_i32_1 = arith.constant 0 : i32
    %c0_i32_2 = arith.constant 0 : i32
    return %arg0, %arg1, %c0_i32, %c0_i32_0, %c0_i32_1 : i32, i32, i32, i32, i32
  }
  func.func @transform_1(%arg0: i32, %arg1: i32) -> (i32, i32, i32) {
    %c0_i32 = arith.constant 0 : i32
    %c0_i32_0 = arith.constant 0 : i32
    %c0_i32_1 = arith.constant 0 : i32
    %c0_i32_2 = arith.constant 0 : i32
    return %c0_i32, %c0_i32_0, %c0_i32_1 : i32, i32, i32
  }
  func.func @transform_2(%arg0: i32, %arg1: i32) -> (i32, i32) {
    %c0_i32 = arith.constant 0 : i32
    %c0_i32_0 = arith.constant 0 : i32
    %c0_i32_1 = arith.constant 0 : i32
    return %c0_i32, %c0_i32_0 : i32, i32
  }
  func.func @transform_3(%arg0: i32, %arg1: i32) -> (i32, i32) {
    %c0_i32 = arith.constant 0 : i32
    %c0_i32_0 = arith.constant 0 : i32
    %c0_i32_1 = arith.constant 0 : i32
    return %c0_i32, %c0_i32_0 : i32, i32
  }
  func.func @transform_4(%arg0: i32, %arg1: i32) -> (i32, i32) {
    %c0_i32 = arith.constant 0 : i32
    %c0_i32_0 = arith.constant 0 : i32
    %c0_i32_1 = arith.constant 0 : i32
    return %c0_i32, %c0_i32_0 : i32, i32
  }
  func.func @transform_5(%arg0: i32, %arg1: i32) -> (i32, i32) {
    %c0_i32 = arith.constant 0 : i32
    %c0_i32_0 = arith.constant 0 : i32
    %c0_i32_1 = arith.constant 0 : i32
    return %c0_i32, %c0_i32_0 : i32, i32
  }
  func.func @transform_6(%arg0: i32, %arg1: i32) -> (i32, i32) {
    %c0_i32 = arith.constant 0 : i32
    %c0_i32_0 = arith.constant 0 : i32
    return %arg0, %c0_i32 : i32, i32
  }
}

</mosaic_0001>

<bundles_post_ra>
// kernel: tpu_custom_call.1
= control target key start
LH: loop header
LB: loop body
LE: loop exit
PB: predicated region body
PF: predicated region fallthrough
CT: control target
= control target key end

     0   :  { %s9242_s0 = inlined_call_operand.hbm [shape: bf16[2,2,10,18,4], index: 0, kind: input, shape index: {}]   ;;  %s9243_s1 = inlined_call_operand.hbm [shape: bf16[9,4,128], index: 1, kind: input, shape index: {}]   ;;  %s9244_s2 = inlined_call_operand.hbm [shape: f32[1,128], index: 2, kind: input, shape index: {}]   ;;  %s9245_s3 = inlined_call_operand.hbm [shape: f32[1,128], index: 3, kind: input, shape index: {}]   ;;  %s9246_s4 = inlined_call_operand.hbm [shape: bf16[128,128], index: 4, kind: input, shape index: {}]   ;;  %s9247_s5 = inlined_call_operand.hbm [shape: f32[1,128], index: 5, kind: input, shape index: {}]   ;;  %s9248_s6 = inlined_call_operand.hbm [shape: f32[2,128], index: 6, kind: output, shape index: {}]  }
   0x1   :  { %9269 = sst [smem:[#allocation39_spill]] %s9243_s1 }
   0x2   :  { %11 = vsyncpa [#allocation4], 0 }
   0x3   :  { %13 = vsyncpa [#allocation4 + $0x1], 0 }
   0x4   :  { %14 = vsyncpa [#allocation7], 0 }
   0x5   :  { %15 = vsyncpa [#allocation10], 0 }
   0x6   :  { %16 = vsyncpa [#allocation13], 0 }
   0x7   :  { %17 = vsyncpa [#allocation5], 0  ;;  %s7219_s21 = smov 0   ;;  %s7221_s22 = smov 0  }
   0x8   :  { %s7223_s23 = smov 0   ;;  %s7225_s24 = smov 0  }
   0x9   :  { %s7227_s25 = smov 0   ;;  %s7229_s26 = smov 0  }
   0xa LB: > { %s9254_s27 = sadd.s32 4294967295, %s7163_s26   ;;  %s32_s28 = sadd.s32 1, %s7159_s25  ;;  %s7163_s26 = sphi %s7229_s26, %s23_s26   ;;  %s7159_s25 = sphi %s7227_s25, %s9341_s25   ;;  %s7155_s24 = sphi %s7225_s24, %s9340_s24   ;;  %s7151_s23 = sphi %s7223_s23, %s9339_s23   ;;  %s7147_s22 = sphi %s7221_s22, %s9338_s22   ;;  %s7143_s21 = sphi %s7219_s21, %s9337_s21  }
   0xb   : > { %p33_p0 = scmp.ge.s32.totalorder %s32_s28, 2  ;;  %s44_s29 = sadd.s32 1, %s7151_s23 }
   0xc   : > { %p51_p1 = scmp.ne.s32.totalorder %s7151_s23, %s7147_s22  ;;  %p52_p2 = scmp.eq.s32.totalorder %s7163_s26, 0 }
   0xd   : > { %s9343_s28 = smov (%p33_p0, %s32_s28), 0  ;;  %p57_p4 = scmp.ne.s32.totalorder %s7147_s22, %s7143_s21 }
   0xe   : > { %9270 = sst [smem:[#allocation23_spill]] %s9343_s28  ;;  %p7255_p3 = por %p52_p2, %p51_p1 }
   0xf   : > { %s40_s7 = ssub.s32 %s7159_s25, %s9343_s28  ;;  %p7264_p5 = scmp.eq.s32.totalorder %s9254_s27, 0 }
  0x10   : > { %s9271_s30 = scalar_select %p7255_p3, 1, 0 }
  0x11   : > { %s9272_s8 = scalar_select %p7264_p5, 1, 0 }
  0x12   : > { %p42_p6 = scmp.eq.s32.totalorder %s40_s7, 0  ;;  %p5371_p7 = scmp.ge.s32.totalorder %s7163_s26, 1 }
  0x13   : > { %p7271_p8 = por %p7264_p5, %p57_p4  ;;  %p199_p9 = scmp.lt.s32.totalorder %s7163_s26, 3 }
  0x14   : > { %s7277_s10 = scalar_select %p42_p6, %s7151_s23, %s44_s29  }
  0x15   : > { %s9273_s9 = scalar_select %p7271_p8, 1, 0 }
  0x16   : > { %9274 = sst [smem:[#allocation24_spill]] %s7277_s10  ;;  %p7279_p10 = pnand %p5371_p7, %p199_p9 }
  0x17   : > { %s7165_s12 = smov [#allocation6]   ;;  %s7166_s15 = smov [#allocation9]  }
  0x18   : > { %s9275_s11 = scalar_select %p7279_p10, 1, 0 }
  0x19   : > { %p6724_p11 = pneg %p7279_p10  ;;  %s211_s13 = sshll.u32 %s7165_s12, 4  ;;  %s212_s13 = int_to_ptr.vmem [resolvable:$true] %s211_s13 }
  0x1a   : > { %s236_s16 = sshll.u32 %s7166_s15, 4  ;;  %s9277_s1 = sld [smem:[#allocation39_spill]]  ;;  %s7291_s16 = int_to_ptr.vmem [resolvable:$true] %s236_s16 }
  0x1b   : > { %p7287_p12 = pnand %p6724_p11, %p7264_p5 }
  0x1d   : > { %p7301_p0 = pneg %p7287_p12 }
  0x20   : > { %s6931_s19 = scalar_lea.hbm %s9277_s1, 288 }
  0x21   : > { %p6932_p13 = scmp.ne.s32.totalorder %s9277_s1, %s6931_s19  ;;  %p6938_p4 = scmp.lt.u32.totalorder %s6931_s19, %s9277_s1 }
  0x23   : > { %p6934_p1 = pnand %p7301_p0, %p6932_p13 }
  0x25   : > { %p6935_p2 = pneg %p6934_p1 }
  0x27   : > { %p6940_p6 = pnand %p6938_p4, %p6935_p2 }
  0x29   : > { %6943 = shalt.err (!%p6940_p6)
}
  0x2a   : > { %s6944_s15 = scalar_lea.vmem %s212_s13, 288  ;;  %p6952_p5 = scmp.lt.s32.totalorder %s212_s13, %s212_s13 }
  0x2b   : > { %p6945_p7 = scmp.ne.s32.totalorder %s212_s13, %s6944_s15  ;;  %p6953_p8 = scmp.lt.s32.totalorder %s6944_s15, %s6944_s15 }
  0x2d   : > { %p6947_p9 = pnand %p6945_p7, %p7301_p0  ;;  %p6954_p10 = por %p6953_p8, %p6952_p5 }
  0x2f   : > { %p6948_p11 = pneg %p6947_p9 }
  0x31   : > { %p6955_p3 = pnand %p6954_p10, %p6948_p11 }
  0x33   : > { %6958 = shalt.err (!%p6955_p3)
}
  0x34   : > { %s7167_s17 = smov 32   ;;  %s7168_s18 = smov 2  }
  0x35   : > { %6727 = dma.hbm_to_vmem [thread:$0]  (!%p7287_p12), %s9277_s1, 288, %s212_s13, [#allocation7], %s7167_s17, %s7167_s17, %s7168_s18  }
  0x36   : > { %s6959_s12 = scalar_lea.hbm %s9245_s3, 16 }
  0x37   : > { %p6960_p13 = scmp.ne.s32.totalorder %s9245_s3, %s6959_s12  ;;  %p6966_p8 = scmp.lt.u32.totalorder %s6959_s12, %s9245_s3 }
  0x39   : > { %p6962_p5 = pnand %p6960_p13, %p7301_p0 }
  0x3b   : > { %p6963_p3 = pneg %p6962_p5 }
  0x3d   : > { %p6968_p10 = pnand %p6966_p8, %p6963_p3 }
  0x3f   : > { %6971 = shalt.err (!%p6968_p10)
}
  0x40   : > { %s6972_s13 = scalar_lea.vmem %s7291_s16, 16  ;;  %s6979_s27 = scalar_lea.vmem %s7291_s16, 32 }
  0x41   : > { %p6973_p1 = scmp.ne.s32.totalorder %s7291_s16, %s6972_s13  ;;  %p6980_p6 = scmp.lt.s32.totalorder %s7291_s16, %s7291_s16 }
  0x42   : > { %p6981_p7 = scmp.lt.s32.totalorder %s6979_s27, %s6972_s13 }
  0x43   : > { %p6975_p2 = pnand %p6973_p1, %p7301_p0 }
  0x44   : > { %p6982_p9 = por %p6981_p7, %p6980_p6 }
  0x45   : > { %p6976_p4 = pneg %p6975_p2 }
  0x47   : > { %p6983_p11 = pnand %p6982_p9, %p6976_p4 }
  0x49   : > { %6986 = shalt.err (!%p6983_p11)
}
  0x4a   : > { %6733 = dma.hbm_to_vmem [thread:$0]  (!%p7287_p12), %s9245_s3, 16, %s7291_s16, [#allocation10]  }
  0x4b   : > { %s7169_s17 = smov [#allocation8]   ;;  %s7170_s20 = smov [#allocation11]  }
  0x4c   : > { %s225_s18 = sshll.u32 %s7169_s17, 4  ;;  %s246_s19 = sshll.u32 %s7170_s20, 4  ;;  %s226_s18 = int_to_ptr.vmem [resolvable:$true] %s225_s18  ;;  %s247_s19 = int_to_ptr.vmem [resolvable:$true] %s246_s19 }
  0x4d   : > { %s6987_s12 = scalar_lea.hbm %s9244_s2, 16 }
  0x4e   : > { %p6988_p13 = scmp.ne.s32.totalorder %s9244_s2, %s6987_s12  ;;  %p6994_p8 = scmp.lt.u32.totalorder %s6987_s12, %s9244_s2 }
  0x50   : > { %p6990_p5 = pnand %p6988_p13, %p7301_p0 }
  0x52   : > { %p6991_p3 = pneg %p6990_p5 }
  0x54   : > { %p6996_p10 = pnand %p6994_p8, %p6991_p3 }
  0x56   : > { %6999 = shalt.err (!%p6996_p10)
}
  0x57   : > { %s7000_s16 = scalar_lea.vmem %s226_s18, 16  ;;  %s7007_s10 = scalar_lea.vmem %s226_s18, 32 }
  0x58   : > { %p7001_p1 = scmp.ne.s32.totalorder %s226_s18, %s7000_s16  ;;  %p7008_p6 = scmp.lt.s32.totalorder %s226_s18, %s226_s18 }
  0x59   : > { %p7009_p7 = scmp.lt.s32.totalorder %s7007_s10, %s7000_s16 }
  0x5a   : > { %p7003_p2 = pnand %p7001_p1, %p7301_p0 }
  0x5b   : > { %p7010_p9 = por %p7009_p7, %p7008_p6 }
  0x5c   : > { %p7004_p4 = pneg %p7003_p2 }
  0x5e   : > { %p7011_p11 = pnand %p7010_p9, %p7004_p4 }
  0x60   : > { %7014 = shalt.err (!%p7011_p11)
}
  0x61   : > { %6730 = dma.hbm_to_vmem [thread:$0]  (!%p7287_p12), %s9244_s2, 16, %s226_s18, [#allocation7]  }
  0x62   : > { %s7015_s12 = scalar_lea.hbm %s9246_s4, 1024 }
  0x63   : > { %p7016_p13 = scmp.ne.s32.totalorder %s9246_s4, %s7015_s12  ;;  %p7022_p8 = scmp.lt.u32.totalorder %s7015_s12, %s9246_s4 }
  0x65   : > { %p7018_p5 = pnand %p7016_p13, %p7301_p0 }
  0x67   : > { %p7019_p3 = pneg %p7018_p5 }
  0x69   : > { %p7024_p10 = pnand %p7022_p8, %p7019_p3 }
  0x6b   : > { %7027 = shalt.err (!%p7024_p10)
}
  0x6c   : > { %s7028_s16 = scalar_lea.vmem %s247_s19, 1024  ;;  %p7036_p6 = scmp.lt.s32.totalorder %s247_s19, %s247_s19 }
  0x6d   : > { %p7029_p1 = scmp.ne.s32.totalorder %s247_s19, %s7028_s16  ;;  %p7037_p7 = scmp.lt.s32.totalorder %s7028_s16, %s7028_s16 }
  0x6f   : > { %p7031_p2 = pnand %p7029_p1, %p7301_p0  ;;  %p7038_p9 = por %p7037_p7, %p7036_p6 }
  0x71   : > { %p7032_p4 = pneg %p7031_p2 }
  0x73   : > { %p7039_p11 = pnand %p7038_p9, %p7032_p4 }
  0x75   : > { %7042 = shalt.err (!%p7039_p11)
}
  0x76   : > { %s7171_s18 = smov 64   ;;  %s7172_s10 = smov 4  }
  0x77   : > { %6736 = dma.hbm_to_vmem [thread:$0]  (!%p7287_p12), %s9246_s4, 1024, %s247_s19, [#allocation10], %s7171_s18, %s7171_s18, %s7172_s10  }
  0x78   : > { %s7173_s21 = smov [#allocation12]   ;;  %s7043_s13 = scalar_lea.hbm %s9247_s5, 16 }
  0x79   : > { %s260_s7 = sshll.u32 %s7173_s21, 4  ;;  %p7044_p13 = scmp.ne.s32.totalorder %s9247_s5, %s7043_s13  ;;  %s261_s7 = int_to_ptr.vmem [resolvable:$true] %s260_s7 }
  0x7a   : > { %p7050_p8 = scmp.lt.u32.totalorder %s7043_s13, %s9247_s5 }
  0x7b   : > { %p7046_p5 = pnand %p7044_p13, %p7301_p0 }
  0x7d   : > { %p7047_p3 = pneg %p7046_p5 }
  0x7f   : > { %p7052_p10 = pnand %p7050_p8, %p7047_p3 }
  0x81   : > { %7055 = shalt.err (!%p7052_p10)
}
  0x82   : > { %s7056_s19 = scalar_lea.vmem %s261_s7, 16  ;;  %s7063_s18 = scalar_lea.vmem %s261_s7, 32 }
  0x83   : > { %p7057_p1 = scmp.ne.s32.totalorder %s261_s7, %s7056_s19  ;;  %p7064_p6 = scmp.lt.s32.totalorder %s261_s7, %s261_s7 }
  0x84   : > { %p7065_p7 = scmp.lt.s32.totalorder %s7063_s18, %s7056_s19 }
  0x85   : > { %p7059_p2 = pnand %p7057_p1, %p7301_p0 }
  0x86   : > { %p7066_p9 = por %p7065_p7, %p7064_p6 }
  0x87   : > { %p7060_p4 = pneg %p7059_p2 }
  0x89   : > { %p7067_p11 = pnand %p7066_p9, %p7060_p4 }
  0x8b   : > { %7070 = shalt.err (!%p7067_p11)
}
  0x8c   : > { %6739 = dma.hbm_to_vmem [thread:$0]  (!%p7287_p12), %s9247_s5, 16, %s261_s7, [#allocation13]  }
  0x8d   : > { %p5377_p13 = scmp.ge.s32.totalorder %s7163_s26, 2 }
  0x8f   : > { %267 = sbr.rel (%p5377_p13) target bundleno = 166 (0xa6), region = 36 }
  0x96   : > { %s271_s1 = sand.u32 1, %s7151_s23   ;;  %s6689_s29 = smul.u32 1920, %s7159_s25 }
  0x97   : > { %s6688_s20 = smul.u32 240, %s271_s1  ;;  %s7174_s21 = smov 3840  }
  0x98   : > { %p9279_p0 = scmp.ne.s32.totalorder %s9271_s30, 0  ;;  %s284_s15 = scalar_lea.hbm %s9242_s0, %s6689_s29 }
  0x99   : > { %s275_s27 = scalar_lea.vmem [#allocation3], %s6688_s20  ;;  %s7175_s16 = smov 1920  }
  0x9a   : > { %6702 = sst [smem:[#allocation16]] (%p9279_p0), %s7174_s21  ;;  %s297_s28 = sshll.u32 %s275_s27, 4  ;;  %s298_s28 = int_to_ptr.vmem [resolvable:$true] %s297_s28 }
  0x9b   : > { %s6701_s14 = scalar_select %p9279_p0, [#allocation0], [#allocation17] }
  0x9c   : > { %6703 = sst [smem:[#allocation16 + $0x1]] (%p9279_p0), %s7175_s16  ;;  %s7176_s19 = smov 30  }
  0x9d   : > { %s289_s13 = sld [smem:[%s6701_s14]]   ;;  %s7177_s18 = smov 64  }
  0x9e   : > { %6704 = sst [smem:[#allocation16 + $0x2]] (%p9279_p0), %s7176_s19  ;;  %s7178_s10 = smov 4  }
  0x9f   : > { %6705 = sst [smem:[#allocation16 + $0x3]] (%p9279_p0), %s7177_s18  ;;  %s272_s20 = scalar_lea.sflag [#allocation4], %s271_s1 }
  0xa0   : > { %6706 = sst [smem:[#allocation16 + $0x4]] (%p9279_p0), %s7177_s18  ;;  %s7179_s21 = smov [#allocation15]  }
  0xa1   : > { %6707 = sst [smem:[#allocation16 + $0x5]] (%p9279_p0), %s7178_s10 }
  0xa3   : > { %s5379_s17 = sshll.u32 %s289_s13, 26 }
  0xa4   : > { %s5380_s29 = sadd.s32 134217728, %s5379_s17 }
  0xa5   : > { %6708 = dma.general (%p9279_p0), %s284_s15, 3840, %s298_s28, %s272_s20, %s7179_s21, [#allocation16], %s5380_s29, 0  }
  0xa6 PF: > { %p9280_p12 = scmp.ne.s32.totalorder %s9275_s11, 0 }
  0xa8   : > { %322 = sbr.rel (%p9280_p12) target bundleno = 1040 (0x410), region = 44 }
  0xaf   : > { %s324_s14 = sand.u32 1, %s7147_s22   ;;  %p9281_p5 = scmp.ne.s32.totalorder %s9273_s9, 0 }
  0xb0   : > { %s6690_s7 = smul.u32 240, %s324_s14  ;;  %s325_s12 = scalar_lea.sflag [#allocation4], %s324_s14 }
  0xb2   : > { %s7420_s27 = scalar_lea.vmem [#allocation3], %s6690_s7 }
  0xb3   : > { %7122 = dma.done.wait (%p9281_p5), %s325_s12, 3840  }
  0xb4   : > { %7124 = vsyncadd (%p9281_p5), %s325_s12, 4294963456  ;;  %p9282_p3 = scmp.ne.s32.totalorder %s9272_s8, 0 }
  0xb6   : > { %7126 = dma.done.wait (%p9282_p3), [#allocation7], 304  }
  0xb7   : > { %7128 = vsyncadd (%p9282_p3), [#allocation7], 4294966992 }
  0xb8   : > { %7130 = dma.done.wait (%p9282_p3), [#allocation10], 1040  }
  0xb9   : > { %7132 = vsyncadd (%p9282_p3), [#allocation10], 4294966256 }
  0xba   : > { %7134 = dma.done.wait (%p9282_p3), [#allocation13], 16  }
  0xbb   : > { %7136 = vsyncadd (%p9282_p3), [#allocation13], 4294967280  ;;  %p5387_p8 = scmp.ne.s32.totalorder %s7155_s24, 0 }
  0xbc   : > { %v7180_v0 = vmov (!%p5387_p8), 0.0  }
  0xbd   : > { %377 = sbr.rel (%p5387_p8) target bundleno = 196 (0xc4), region = 72  ;;  %378 = vst [vmem:[#allocation2] sm:$0x3] (!%p5387_p8), %v7180_v0 }
  0xc4 PF: > { %v816_v1 = vld [vmem:[#allocation6 + $0x2] sm:$0x3]  ;;  %vm914_vm0 = vcmask 1041408   ;;  %v2620_v2 = vld [vmem:[#allocation6 + $0x8] sm:$0x3]  ;;  %vm865_vm4 = vcmask 31744  }
  0xc5   : > { %6678 = vmatprep.subr.msk.bf16.mxu1 %vm914_vm0, %v816_v1  ;;  %6682 = vmatprep.subr.msk.bf16.mxu0 %vm914_vm0, %v2620_v2  ;;  %v916_v3 = vsel %vm914_vm0, %v816_v1, 0  ;;  %v7443_v4 = vsel %vm914_vm0, %v2620_v2, 0  ;;  %v379_v5 = vld [vmem:[%s7420_s27] sm:$0xf]  ;;  %v380_v6 = vld [vmem:[%s7420_s27 + $0x4] sm:$0xf] }
  0xc6   : > { %9283 = vst [vmem:[#allocation25_spill] sm:$0xff] %v7443_v4  ;;  %6095 = vmatpush3.bf16.msra.mxu1 %v916_v3  ;;  %6231 = vmatpush3.bf16.msra.mxu0 %v7443_v4  ;;  %v412_v7 = vld [vmem:[%s7420_s27 + $0x8] sm:$0x1]  ;;  %vm428_vm1 = vsmask.f32 3328  ;;  %v432_v8 = vshrl.u32 %v379_v5, 16 }
  0xc7   : > { %vm429_vm2 = vsmask.f32 7440  ;;  %v435_v9 = vshll.u32 %v379_v5, 16  ;;  %v441_v10 = vshll.u32 %v380_v6, 16  ;;  %v445_v11 = vshrl.u32 %v380_v6, 16  ;;  %p5918_p10 = scmp.ne.s32.totalorder %s7155_s24, 1 }
  0xc8   : > { %v411_v12 = vld [vmem:[#allocation6] sm:$0x3]  ;;  %v451_v13 = vshll.u32 %v412_v7, 16  ;;  %v5564_v14 = vld [vmem:[%s7420_s27 + $0xc] sm:$0xf]  ;;  %v434_v16 = vrot.slane %v432_v8, 4  ;;  %vm7467_vm3 = vmor %vm428_vm1, %vm429_vm2 }
  0xc9   : > { %6679 = vmatprep.subr.msk.bf16.mxu1 %vm914_vm0, %v411_v12  ;;  %v7452_v15 = vld [vmem:[%s7420_s27 + $0x10] sm:$0xf]  ;;  %v437_v17 = vrot.slane %v435_v9, 5  ;;  %v443_v18 = vrot.slane %v441_v10, 5  ;;  %v447_v19 = vrot.slane %v445_v11, 4  ;;  %v2236_v22 = vshrl.u32 %v5564_v14, 16 }
  0xca   : > { %v7455_v20 = vld [vmem:[%s7420_s27 + $0x14] sm:$0x1]  ;;  %v453_v21 = vrot.slane %v451_v13, 5  ;;  %v2239_v23 = vshll.u32 %v5564_v14, 16  ;;  %v2245_v24 = vshll.u32 %v7452_v15, 16  ;;  %v2249_v28 = vshrl.u32 %v7452_v15, 16 }
  0xcb   : > { %v7458_v25 = vld [vmem:[#allocation6 + $0xa] sm:$0x3]  ;;  %v438_v26 = vor.u32 %v437_v17, %v434_v16  ;;  %v448_v27 = vor.u32 %v447_v19, %v443_v18  ;;  %v2255_v29 = vshll.u32 %v7455_v20, 16  ;;  %v381_v30 = vld [vmem:[%s7420_s27 + $0xc] sm:$0xf]  ;;  %v2238_v32 = vrot.slane %v2236_v22, 4 }
  0xcc   : > { %6684 = vmatprep.subr.msk.bf16.mxu0 %vm914_vm0, %v7458_v25  ;;  %v2241_v33 = vrot.slane %v2239_v23, 5  ;;  %v2247_v34 = vrot.slane %v2245_v24, 5  ;;  %v382_v35 = vld [vmem:[%s7420_s27 + $0x10] sm:$0xf]  ;;  %v2251_v38 = vrot.slane %v2249_v28, 4  ;;  %v456_v42 = vshrl.u32 %v381_v30, 16 }
  0xcd   : > { %v439_v36 = vrot.slane %v438_v26, 4  ;;  %v449_v37 = vrot.slane %v448_v27, 4  ;;  %v2257_v40 = vrot.slane %v2255_v29, 5  ;;  %v413_v41 = vld [vmem:[%s7420_s27 + $0x14] sm:$0x1]  ;;  %v459_v43 = vshll.u32 %v381_v30, 16 }
  0xce   : > { %v2242_v39 = vor.u32 %v2241_v33, %v2238_v32  ;;  %v2252_v46 = vor.u32 %v2251_v38, %v2247_v34  ;;  %v465_v47 = vshll.u32 %v382_v35, 16  ;;  %v458_v50 = vrot.slane %v456_v42, 4  ;;  %v5567_v56 = vld [vmem:[%s7420_s27 + $0x18] sm:$0xf]  ;;  %v7484_v61 = vld [vmem:[%s7420_s27 + $0x1c] sm:$0xf] }
  0xcf   : > { %v444_v44 = vsel %vm7467_vm3, %v439_v36, %v443_v18  ;;  %v454_v45 = vsel %vm7467_vm3, %v449_v37, %v453_v21  ;;  %v461_v51 = vrot.slane %v459_v43, 5  ;;  %v469_v54 = vshrl.u32 %v382_v35, 16  ;;  %v7487_v62 = vld [vmem:[%s7420_s27 + $0x20] sm:$0x1]  ;;  %v383_v17 = vld [vmem:[%s7420_s27 + $0x18] sm:$0xf] }
  0xd0   : > { %v5388_v48 = vcombine.low %v444_v44, %v454_v45  ;;  %v2243_v49 = vrot.slane %v2242_v39, 4  ;;  %v2253_v52 = vrot.slane %v2252_v46, 4  ;;  %v467_v53 = vrot.slane %v465_v47, 5  ;;  %v384_v23 = vld [vmem:[%s7420_s27 + $0x1c] sm:$0xf] }
  0xd1   : > { %v475_v55 = vshll.u32 %v413_v41, 16  ;;  %v2979_v58 = vrot.slane %v7452_v15, 5  ;;  %v2982_v59 = vrot.slane %v7455_v20, 5  ;;  %v462_v60 = vor.u32 %v461_v51, %v458_v50  ;;  %v414_v29 = vld [vmem:[%s7420_s27 + $0x20] sm:$0x1] }
  0xd2   : > { %6096 = vmatprep.mubr.msk.bf16.mxu1 %vm865_vm4, %v5388_v48  ;;  %v2248_v57 = vsel %vm7467_vm3, %v2243_v49, %v2247_v34  ;;  %v2258_v63 = vsel %vm7467_vm3, %v2253_v52, %v2257_v40  ;;  %v471_v0 = vrot.slane %v469_v54, 4  ;;  %v1208_v2 = vsel %vm914_vm0, %v411_v12, 0  ;;  %v5570_v35 = vld [vmem:[%s7420_s27 + $0x24] sm:$0xf]  ;;  %v7513_v44 = vld [vmem:[%s7420_s27 + $0x28] sm:$0xf] }
  0xd3   : > { %v477_v1 = vrot.slane %v475_v55, 5  ;;  %v5612_v3 = vcombine.low %v2248_v57, %v2258_v63  ;;  %v463_v5 = vrot.slane %v462_v60, 4  ;;  %v2260_v6 = vshrl.u32 %v5567_v56, 16  ;;  %v7519_v47 = vld [vmem:[%s7420_s27 + $0x2c] sm:$0x1] }
  0xd4   : > { %v2263_v7 = vshll.u32 %v5567_v56, 16  ;;  %v472_v8 = vor.u32 %v471_v0, %v467_v53  ;;  %v2269_v9 = vshll.u32 %v7484_v61, 16  ;;  %v2273_v10 = vshrl.u32 %v7484_v61, 16 }
  0xd5   : > { %v2279_v11 = vshll.u32 %v7487_v62, 16  ;;  %6232 = vmatprep.mubr.msk.bf16.mxu0 %vm865_vm4, %v5612_v3  ;;  %v468_v13 = vsel %vm7467_vm3, %v463_v5, %v467_v53  ;;  %v2262_v14 = vrot.slane %v2260_v6, 4  ;;  %v2986_v16 = vrot.slane %v7484_v61, 5  ;;  %v385_v53 = vld [vmem:[%s7420_s27 + $0x24] sm:$0xf] }
  0xd6   : > { %v2265_v12 = vrot.slane %v2263_v7, 5  ;;  %v473_v18 = vrot.slane %v472_v8, 4  ;;  %v2271_v19 = vrot.slane %v2269_v9, 5  ;;  %v2275_v21 = vrot.slane %v2273_v10, 4 }
  0xd7   : > { %v2281_v22 = vrot.slane %v2279_v11, 5  ;;  %v7503_v26 = vrot.slane %v2986_v16, 4  ;;  %v2989_v27 = vrot.slane %v7487_v62, 5  ;;  %v3188_v28 = vsel %vm914_vm0, %v7458_v25, 0 }
  0xd8   : > { %v2266_v24 = vor.u32 %v2265_v12, %v2262_v14  ;;  %v478_v30 = vsel %vm7467_vm3, %v473_v18, %v477_v1  ;;  %v2276_v32 = vor.u32 %v2275_v21, %v2271_v19  ;;  %v480_v33 = vshrl.u32 %v383_v17, 16  ;;  %v5573_v14 = vld [vmem:[%s7420_s27 + $0x30] sm:$0xf] }
  0xd9   : > { %v483_v34 = vshll.u32 %v383_v17, 16  ;;  %v5389_v36 = vcombine.low %v468_v13, %v478_v30  ;;  %v489_v38 = vshll.u32 %v384_v23, 16  ;;  %v493_v39 = vshrl.u32 %v384_v23, 16  ;;  %v415_v13 = vld [vmem:[%s7420_s27 + $0x2c] sm:$0x1] }
  0xda   : > { %v2267_v37 = vrot.slane %v2266_v24, 4  ;;  %v2277_v40 = vrot.slane %v2276_v32, 4  ;;  %v482_v41 = vrot.slane %v480_v33, 4  ;;  %v499_v43 = vshll.u32 %v414_v29, 16 }
  0xdb   : > { %v485_v42 = vrot.slane %v483_v34, 5  ;;  %6097 = vmatmul.mubr.msk.bf16.vlgmr.msra.gmra.mrb[0].mxu1 %vm865_vm4, %v5389_v36  ;;  %v491_v45 = vrot.slane %v489_v38, 5  ;;  %v495_v46 = vrot.slane %v493_v39, 4  ;;  %v2284_v48 = vshrl.u32 %v5570_v35, 16 }
  0xdc   : > { %v2272_v25 = vsel %vm7467_vm3, %v2267_v37, %v2271_v19  ;;  %6129 = vmatpush3.bf16.msra.mxu1 %v1208_v2  ;;  %v2282_v49 = vsel %vm7467_vm3, %v2277_v40, %v2281_v22  ;;  %v501_v51 = vrot.slane %v499_v43, 5  ;;  %v2287_v52 = vshll.u32 %v5570_v35, 16  ;;  %v386_v2 = vld [vmem:[%s7420_s27 + $0x28] sm:$0xf]  ;;  %v7542_v37 = vld [vmem:[%s7420_s27 + $0x38] sm:$0x1] }
  0xdd   : > { %v486_v50 = vor.u32 %v485_v42, %v482_v41  ;;  %v5613_v54 = vcombine.low %v2272_v25, %v2282_v49  ;;  %v496_v55 = vor.u32 %v495_v46, %v491_v45  ;;  %v2286_v56 = vrot.slane %v2284_v48, 4  ;;  %v387_v43 = vld [vmem:[%s7420_s27 + $0x30] sm:$0xf]  ;;  %v388_v49 = vld [vmem:[%s7420_s27 + $0x34] sm:$0xf] }
  0xde   : > { %v2293_v57 = vshll.u32 %v7513_v44, 16  ;;  %v2289_v63 = vrot.slane %v2287_v52, 5  ;;  %v2297_v0 = vshrl.u32 %v7513_v44, 16  ;;  %v2303_v1 = vshll.u32 %v7519_v47, 16 }
  0xdf   : > { %v487_v60 = vrot.slane %v486_v50, 4  ;;  %6233 = vmatmul.mubr.msk.bf16.vlgmr.msra.gmra.mrb[0].mxu0 %vm865_vm4, %v5613_v54  ;;  %v497_v3 = vrot.slane %v496_v55, 4  ;;  %v504_v6 = vshrl.u32 %v385_v53, 16  ;;  %v507_v7 = vshll.u32 %v385_v53, 16 }
  0xe0   : > { %v2295_v5 = vrot.slane %v2293_v57, 5  ;;  %6265 = vmatpush3.bf16.msra.mxu0 %v3188_v28  ;;  %v2290_v9 = vor.u32 %v2289_v63, %v2286_v56  ;;  %v2299_v10 = vrot.slane %v2297_v0, 4  ;;  %v2305_v11 = vrot.slane %v2303_v1, 5  ;;  %v7536_v28 = vld [vmem:[%s7420_s27 + $0x34] sm:$0xf] }
  0xe1   : > { %v492_v8 = vsel %vm7467_vm3, %v487_v60, %v491_v45  ;;  %v502_v12 = vsel %vm7467_vm3, %v497_v3, %v501_v51  ;;  %v506_v17 = vrot.slane %v504_v6, 4  ;;  %v509_v18 = vrot.slane %v507_v7, 5  ;;  %v416_v57 = vld [vmem:[%s7420_s27 + $0x38] sm:$0x1]  ;;  %v5576_v3 = vld [vmem:[%s7420_s27 + $0x3c] sm:$0xf] }
  0xe2   : > { %v513_v19 = vshll.u32 %v386_v2, 16  ;;  %v5390_v21 = vcombine.low %v492_v8, %v502_v12  ;;  %v2291_v22 = vrot.slane %v2290_v9, 4  ;;  %v2300_v23 = vor.u32 %v2299_v10, %v2295_v5  ;;  %v7559_v9 = vld [vmem:[%s7420_s27 + $0x40] sm:$0xf] }
  0xe3   : > { %v517_v24 = vshrl.u32 %v386_v2, 16  ;;  %v510_v29 = vor.u32 %v509_v18, %v506_v17  ;;  %v523_v32 = vshll.u32 %v415_v13, 16  ;;  %v2308_v33 = vshrl.u32 %v5573_v14, 16 }
  0xe4   : > { %v515_v30 = vrot.slane %v513_v19, 5  ;;  %6100 = vmatprep.mubr.msk.bf16.mxu1 %vm865_vm4, %v5390_v21  ;;  %v2296_v34 = vsel %vm7467_vm3, %v2291_v22, %v2295_v5  ;;  %v2301_v35 = vrot.slane %v2300_v23, 4  ;;  %v2311_v38 = vshll.u32 %v5573_v14, 16  ;;  %v7564_v19 = vld [vmem:[%s7420_s27 + $0x44] sm:$0x1] }
  0xe5   : > { %v519_v36 = vrot.slane %v517_v24, 4  ;;  %v511_v39 = vrot.slane %v510_v29, 4  ;;  %v525_v40 = vrot.slane %v523_v32, 5  ;;  %v2310_v41 = vrot.slane %v2308_v33, 4  ;;  %v7569_v32 = vld [vmem:[#allocation6 + $0xc] sm:$0x3] }
  0xe6   : > { %v2317_v42 = vshll.u32 %v7536_v28, 16  ;;  %v2306_v25 = vsel %vm7467_vm3, %v2301_v35, %v2305_v11  ;;  %v2313_v46 = vrot.slane %v2311_v38, 5  ;;  %v2321_v48 = vshrl.u32 %v7536_v28, 16  ;;  %6685 = vmatprep.subr.msk.bf16.mxu0 %vm914_vm0, %v7569_v32 }
  0xe7   : > { %v520_v45 = vor.u32 %v519_v36, %v515_v30  ;;  %v5614_v50 = vcombine.low %v2296_v34, %v2306_v25  ;;  %v516_v51 = vsel %vm7467_vm3, %v511_v39, %v515_v30  ;;  %v2327_v53 = vshll.u32 %v7542_v37, 16  ;;  %v389_v30 = vld [vmem:[%s7420_s27 + $0x3c] sm:$0xf] }
  0xe8   : > { %v2319_v52 = vrot.slane %v2317_v42, 5  ;;  %v2314_v55 = vor.u32 %v2313_v46, %v2310_v41  ;;  %v2323_v56 = vrot.slane %v2321_v48, 4  ;;  %v528_v60 = vshrl.u32 %v387_v43, 16 }
  0xe9   : > { %v521_v54 = vrot.slane %v520_v45, 4  ;;  %6236 = vmatprep.mubr.msk.bf16.mxu0 %vm865_vm4, %v5614_v50  ;;  %v2329_v63 = vrot.slane %v2327_v53, 5  ;;  %v531_v0 = vshll.u32 %v387_v43, 16  ;;  %v537_v1 = vshll.u32 %v388_v49, 16  ;;  %v390_v45 = vld [vmem:[%s7420_s27 + $0x40] sm:$0xf] }
  0xea   : > { %v541_v2 = vshrl.u32 %v388_v49, 16  ;;  %v2315_v6 = vrot.slane %v2314_v55, 4  ;;  %v2324_v7 = vor.u32 %v2323_v56, %v2319_v52  ;;  %v530_v8 = vrot.slane %v528_v60, 4  ;;  %v5579_v53 = vld [vmem:[%s7420_s27 + $0x48] sm:$0xf] }
  0xeb   : > { %v526_v5 = vsel %vm7467_vm3, %v521_v54, %v525_v40  ;;  %v533_v11 = vrot.slane %v531_v0, 5  ;;  %v539_v13 = vrot.slane %v537_v1, 5  ;;  %v547_v18 = vshll.u32 %v416_v57, 16 }
  0xec   : > { %v5391_v10 = vcombine.low %v516_v51, %v526_v5  ;;  %v543_v14 = vrot.slane %v541_v2, 4  ;;  %v2320_v12 = vsel %vm7467_vm3, %v2315_v6, %v2319_v52  ;;  %v2325_v17 = vrot.slane %v2324_v7, 4  ;;  %v417_v51 = vld [vmem:[%s7420_s27 + $0x44] sm:$0x1]  ;;  %v7587_v5 = vld [vmem:[%s7420_s27 + $0x4c] sm:$0xf] }
  0xed   : > { %v2332_v21 = vshrl.u32 %v5576_v3, 16  ;;  %v534_v22 = vor.u32 %v533_v11, %v530_v8  ;;  %v2335_v24 = vshll.u32 %v5576_v3, 16  ;;  %v2341_v29 = vshll.u32 %v7559_v9, 16 }
  0xee   : > { %6101 = vmatmul.mubr.msk.bf16.gmra.mrb[4].mxu1 %vm865_vm4, %v5391_v10  ;;  %v544_v23 = vor.u32 %v543_v14, %v539_v13  ;;  %v2330_v33 = vsel %vm7467_vm3, %v2325_v17, %v2329_v63  ;;  %v549_v34 = vrot.slane %v547_v18, 5  ;;  %v2345_v36 = vshrl.u32 %v7559_v9, 16  ;;  %v7592_v14 = vld [vmem:[%s7420_s27 + $0x50] sm:$0x1] }
  0xef   : > { %v2334_v35 = vrot.slane %v2332_v21, 4  ;;  %v5615_v38 = vcombine.low %v2320_v12, %v2330_v33  ;;  %v535_v39 = vrot.slane %v534_v22, 4  ;;  %v2337_v41 = vrot.slane %v2335_v24, 5  ;;  %v7595_v12 = vld [vmem:[%s7420_s27 + $0x48] sm:$0xf] }
  0xf0   : > { %v545_v40 = vrot.slane %v544_v23, 4  ;;  %v2343_v42 = vrot.slane %v2341_v29, 5  ;;  %v2347_v43 = vrot.slane %v2345_v36, 4  ;;  %v2351_v25 = vshll.u32 %v7564_v19, 16  ;;  %v7603_v36 = vld [vmem:[%s7420_s27 + $0x4c] sm:$0xf] }
  0xf1   : > { %v552_v46 = vshrl.u32 %v389_v30, 16  ;;  %6237 = vmatmul.mubr.msk.bf16.gmra.mrb[4].mxu0 %vm865_vm4, %v5615_v38  ;;  %v540_v48 = vsel %vm7467_vm3, %v535_v39, %v539_v13  ;;  %v2338_v50 = vor.u32 %v2337_v41, %v2334_v35  ;;  %v555_v52 = vshll.u32 %v389_v30, 16 }
  0xf2   : > { %v550_v49 = vsel %vm7467_vm3, %v545_v40, %v549_v34  ;;  %v2348_v55 = vor.u32 %v2347_v43, %v2343_v42  ;;  %v2353_v56 = vrot.slane %v2351_v25, 5  ;;  %v561_v0 = vshll.u32 %v390_v45, 16 }
  0xf3   : > { %v5392_v54 = vcombine.low %v540_v48, %v550_v49  ;;  %v554_v57 = vrot.slane %v552_v46, 4  ;;  %v2339_v60 = vrot.slane %v2338_v50, 4  ;;  %v557_v63 = vrot.slane %v555_v52, 5  ;;  %v5582_v49 = vld [vmem:[%s7420_s27 + $0x54] sm:$0xf] }
  0xf4   : > { %v565_v1 = vshrl.u32 %v390_v45, 16  ;;  %v2349_v2 = vrot.slane %v2348_v55, 4  ;;  %v571_v3 = vshll.u32 %v417_v51, 16  ;;  %v2356_v6 = vshrl.u32 %v5579_v53, 16 }
  0xf5   : > { %6104 = vmatprep.mubr.msk.bf16.mxu1 %vm865_vm4, %v5392_v54  ;;  %v2359_v7 = vshll.u32 %v5579_v53, 16  ;;  %v2344_v8 = vsel %vm7467_vm3, %v2339_v60, %v2343_v42  ;;  %v558_v10 = vor.u32 %v557_v63, %v554_v57  ;;  %v563_v11 = vrot.slane %v561_v0, 5  ;;  %v418_v42 = vld [vmem:[%s7420_s27 + $0x50] sm:$0x1]  ;;  %v7617_v54 = vld [vmem:[%s7420_s27 + $0x58] sm:$0xf] }
  0xf6   : > { %v567_v13 = vrot.slane %v565_v1, 4  ;;  %v2354_v17 = vsel %vm7467_vm3, %v2349_v2, %v2353_v56  ;;  %v573_v18 = vrot.slane %v571_v3, 5  ;;  %v2358_v21 = vrot.slane %v2356_v6, 4  ;;  %v7622_v2 = vld [vmem:[%s7420_s27 + $0x5c] sm:$0x1] }
  0xf7   : > { %v2361_v22 = vrot.slane %v2359_v7, 5  ;;  %v5616_v23 = vcombine.low %v2344_v8, %v2354_v17  ;;  %v559_v24 = vrot.slane %v558_v10, 4  ;;  %v2365_v30 = vshll.u32 %v7587_v5, 16 }
  0xf8   : > { %v568_v29 = vor.u32 %v567_v13, %v563_v11  ;;  %v2369_v34 = vshrl.u32 %v7587_v5, 16  ;;  %v2375_v35 = vshll.u32 %v7592_v14, 16  ;;  %v576_v38 = vshrl.u32 %v7595_v12, 16 }
  0xf9   : > { %v2362_v33 = vor.u32 %v2361_v22, %v2358_v21  ;;  %6240 = vmatprep.mubr.msk.bf16.mxu0 %vm865_vm4, %v5616_v23  ;;  %v564_v39 = vsel %vm7467_vm3, %v559_v24, %v563_v11  ;;  %v2367_v41 = vrot.slane %v2365_v30, 5  ;;  %v579_v43 = vshll.u32 %v7595_v12, 16  ;;  %v7628_v21 = vld [vmem:[%s7420_s27 + $0x54] sm:$0xf]  ;;  %v7634_v30 = vld [vmem:[%s7420_s27 + $0x58] sm:$0xf] }
  0xfa   : > { %v569_v40 = vrot.slane %v568_v29, 4  ;;  %v2371_v45 = vrot.slane %v2369_v34, 4  ;;  %v2377_v46 = vrot.slane %v2375_v35, 5  ;;  %v578_v48 = vrot.slane %v576_v38, 4 }
  0xfb   : > { %v2363_v25 = vrot.slane %v2362_v33, 4  ;;  %v581_v51 = vrot.slane %v579_v43, 5  ;;  %v585_v52 = vshll.u32 %v7603_v36, 16  ;;  %v589_v53 = vshrl.u32 %v7603_v36, 16 }
  0xfc   : > { %v574_v50 = vsel %vm7467_vm3, %v569_v40, %v573_v18  ;;  %v2372_v57 = vor.u32 %v2371_v45, %v2367_v41  ;;  %v595_v60 = vshll.u32 %v418_v42, 16  ;;  %v2380_v3 = vshrl.u32 %v5582_v49, 16 }
  0xfd   : > { %v5393_v55 = vcombine.low %v564_v39, %v574_v50  ;;  %v2368_v56 = vsel %vm7467_vm3, %v2363_v25, %v2367_v41  ;;  %v582_v63 = vor.u32 %v581_v51, %v578_v48  ;;  %v587_v0 = vrot.slane %v585_v52, 5  ;;  %v419_v41 = vld [vmem:[%s7420_s27 + $0x5c] sm:$0x1]  ;;  %v7647_v50 = vld [vmem:[#allocation6 + $0x4] sm:$0x3] }
  0xfe   : > { %v591_v1 = vrot.slane %v589_v53, 4  ;;  %v2373_v6 = vrot.slane %v2372_v57, 4  ;;  %v597_v7 = vrot.slane %v595_v60, 5  ;;  %v2383_v8 = vshll.u32 %v5582_v49, 16  ;;  %v5585_v49 = vld [vmem:[%s7420_s27 + $0x60] sm:$0xf]  ;;  %6680 = vmatprep.subr.msk.bf16.mxu1 %vm914_vm0, %v7647_v50 }
  0xff   : > { %6105 = vmatmul.mubr.msk.bf16.gmra.mrb[8].mxu1 %vm865_vm4, %v5393_v55  ;;  %v2389_v10 = vshll.u32 %v7617_v54, 16  ;;  %v583_v11 = vrot.slane %v582_v63, 4  ;;  %v2382_v17 = vrot.slane %v2380_v3, 4  ;;  %v2393_v18 = vshrl.u32 %v7617_v54, 16 }
 0x100   : > { %v592_v13 = vor.u32 %v591_v1, %v587_v0  ;;  %v2378_v22 = vsel %vm7467_vm3, %v2373_v6, %v2377_v46  ;;  %v2385_v23 = vrot.slane %v2383_v8, 5  ;;  %v2399_v29 = vshll.u32 %v7622_v2, 16  ;;  %v7658_v6 = vld [vmem:[%s7420_s27 + $0x68] sm:$0x1] }
 0x101   : > { %v2391_v24 = vrot.slane %v2389_v10, 5  ;;  %v5617_v33 = vcombine.low %v2368_v56, %v2378_v22  ;;  %v588_v34 = vsel %vm7467_vm3, %v583_v11, %v587_v0  ;;  %v2395_v38 = vrot.slane %v2393_v18, 4  ;;  %v7650_v56 = vld [vmem:[%s7420_s27 + $0x64] sm:$0xf]  ;;  %v7664_v18 = vld [vmem:[%s7420_s27 + $0x78] sm:$0xf] }
 0x102   : > { %v593_v35 = vrot.slane %v592_v13, 4  ;;  %v2386_v39 = vor.u32 %v2385_v23, %v2382_v17  ;;  %v2401_v40 = vrot.slane %v2399_v29, 5  ;;  %v600_v42 = vshrl.u32 %v7628_v21, 16 }
 0x103   : > { %v603_v43 = vshll.u32 %v7628_v21, 16  ;;  %6241 = vmatmul.mubr.msk.bf16.gmra.mrb[8].mxu0 %vm865_vm4, %v5617_v33  ;;  %v2396_v45 = vor.u32 %v2395_v38, %v2391_v24  ;;  %v609_v46 = vshll.u32 %v7634_v30, 16  ;;  %v613_v48 = vshrl.u32 %v7634_v30, 16 }
 0x104   : > { %v598_v25 = vsel %vm7467_vm3, %v593_v35, %v597_v7  ;;  %v2387_v52 = vrot.slane %v2386_v39, 4  ;;  %v602_v53 = vrot.slane %v600_v42, 4  ;;  %v619_v0 = vshll.u32 %v419_v41, 16  ;;  %v420_v42 = vld [vmem:[%s7420_s27 + $0x80] sm:$0x1] }
 0x105   : > { %v5394_v51 = vcombine.low %v588_v34, %v598_v25  ;;  %v605_v55 = vrot.slane %v603_v43, 5  ;;  %v2397_v57 = vrot.slane %v2396_v45, 4  ;;  %v611_v60 = vrot.slane %v609_v46, 5 }
 0x106   : > { %v615_v63 = vrot.slane %v613_v48, 4  ;;  %v2392_v1 = vsel %vm7467_vm3, %v2387_v52, %v2391_v24  ;;  %v2404_v7 = vshrl.u32 %v5585_v49, 16  ;;  %v2407_v8 = vshll.u32 %v5585_v49, 16  ;;  %v7667_v24 = vld [vmem:[%s7420_s27 + $0x7c] sm:$0xf] }
 0x107   : > { %6108 = vmatprep.mubr.msk.bf16.mxu1 %vm865_vm4, %v5394_v51  ;;  %v606_v3 = vor.u32 %v605_v55, %v602_v53  ;;  %v2402_v10 = vsel %vm7467_vm3, %v2397_v57, %v2401_v40  ;;  %v621_v13 = vrot.slane %v619_v0, 5  ;;  %v2413_v17 = vshll.u32 %v7650_v56, 16  ;;  %v5644_v57 = vld [vmem:[%s7420_s27 + $0xc] sm:$0xe] }
 0x108   : > { %v616_v11 = vor.u32 %v615_v63, %v611_v60  ;;  %v5618_v22 = vcombine.low %v2392_v1, %v2402_v10  ;;  %v2406_v29 = vrot.slane %v2404_v7, 4  ;;  %v2409_v33 = vrot.slane %v2407_v8, 5  ;;  %v7689_v10 = vld [vmem:[%s7420_s27 + $0x88] sm:$0xf] }
 0x109   : > { %v607_v23 = vrot.slane %v606_v3, 4  ;;  %v2415_v35 = vrot.slane %v2413_v17, 5  ;;  %v2417_v38 = vshrl.u32 %v7650_v56, 16  ;;  %v2423_v39 = vshll.u32 %v7658_v6, 16  ;;  %v7683_v3 = vld [vmem:[%s7420_s27 + $0x84] sm:$0xf] }
 0x10a   : > { %v617_v34 = vrot.slane %v616_v11, 4  ;;  %6244 = vmatprep.mubr.msk.bf16.mxu0 %vm865_vm4, %v5618_v22  ;;  %v2410_v41 = vor.u32 %v2409_v33, %v2406_v29  ;;  %v624_v43 = vshrl.u32 %v7664_v18, 16  ;;  %v627_v25 = vshll.u32 %v7664_v18, 16 }
 0x10b   : > { %v612_v40 = vsel %vm7467_vm3, %v607_v23, %v611_v60  ;;  %v2419_v46 = vrot.slane %v2417_v38, 4  ;;  %v2425_v48 = vrot.slane %v2423_v39, 5  ;;  %v633_v49 = vshll.u32 %v7667_v24, 16 }
 0x10c   : > { %v622_v45 = vsel %vm7467_vm3, %v617_v34, %v621_v13  ;;  %v2411_v52 = vrot.slane %v2410_v41, 4  ;;  %v626_v53 = vrot.slane %v624_v43, 4  ;;  %v629_v55 = vrot.slane %v627_v25, 5  ;;  %v421_v41 = vld [vmem:[%s7420_s27 + $0x8c] sm:$0x1] }
 0x10d   : > { %v5395_v51 = vcombine.low %v612_v40, %v622_v45  ;;  %v2420_v60 = vor.u32 %v2419_v46, %v2415_v35  ;;  %v635_v63 = vrot.slane %v633_v49, 5  ;;  %v637_v0 = vshrl.u32 %v7667_v24, 16  ;;  %v5645_v43 = vld [vmem:[%s7420_s27 + $0x18] sm:$0xe]  ;;  %v7715_v49 = vld [vmem:[%s7420_s27 + $0x90] sm:$0xf] }
 0x10e   : > { %v643_v1 = vshll.u32 %v420_v42, 16  ;;  %v2416_v7 = vsel %vm7467_vm3, %v2411_v52, %v2415_v35  ;;  %v630_v8 = vor.u32 %v629_v55, %v626_v53  ;;  %vm1419_vm5 = vcmask 1042432   ;;  %v7718_v53 = vld [vmem:[%s7420_s27 + $0x94] sm:$0xf] }
 0x10f   : > { %6109 = vmatmul.mubr.msk.bf16.gmra.mrb[12].mxu1 %vm865_vm4, %v5395_v51  ;;  %vm1420_vm6 = vcmask 1046532   ;;  %v2421_v11 = vrot.slane %v2420_v60, 4  ;;  %v639_v13 = vrot.slane %v637_v0, 4  ;;  %v5660_v23 = vrot.slane %v5644_v57, 9 }
 0x110   : > { %v645_v17 = vrot.slane %v643_v1, 5  ;;  %vm7691_vm7 = vmor %vm1419_vm5, %vm1420_vm6  ;;  %v631_v29 = vrot.slane %v630_v8, 4  ;;  %v2981_v33 = vrot.slane %v2979_v58, 4  ;;  %v648_v34 = vshrl.u32 %v7683_v3, 16 }
 0x111   : > { %v651_v35 = vshll.u32 %v7683_v3, 16  ;;  %v2426_v38 = vsel %vm7467_vm3, %v2421_v11, %v2425_v48  ;;  %v640_v39 = vor.u32 %v639_v13, %v635_v63  ;;  %v2980_v40 = vsel %vm7691_vm7, %v5660_v23, %v2979_v58 }
 0x112   : > { %v657_v42 = vshll.u32 %v7689_v10, 16  ;;  %v5619_v25 = vcombine.low %v2416_v7, %v2426_v38  ;;  %v636_v45 = vsel %vm7467_vm3, %v631_v29, %v635_v63  ;;  %v2983_v46 = vsel %vm7691_vm7, %v2981_v33, %v2982_v59  ;;  %v422_v59 = vld [vmem:[%s7420_s27 + $0x98] sm:$0x1]  ;;  %v7741_v33 = vld [vmem:[%s7420_s27 + $0x9c] sm:$0xf] }
 0x113   : > { %v650_v48 = vrot.slane %v648_v34, 4  ;;  %v641_v15 = vrot.slane %v640_v39, 4  ;;  %v5676_v51 = vcombine.low %v2980_v40, %v2983_v46  ;;  %v653_v58 = vrot.slane %v651_v35, 5  ;;  %v7747_v38 = vld [vmem:[%s7420_s27 + $0xa0] sm:$0xf] }
 0x114   : > { %v659_v52 = vrot.slane %v657_v42, 5  ;;  %6245 = vmatmul.mubr.msk.bf16.gmra.mrb[12].mxu0 %vm865_vm4, %v5619_v25  ;;  %v661_v55 = vshrl.u32 %v7689_v10, 16  ;;  %v667_v57 = vshll.u32 %v421_v41, 16  ;;  %v5661_v60 = vrot.slane %v5645_v43, 9  ;;  %v7752_v42 = vld [vmem:[#allocation6 + $0xe] sm:$0x3] }
 0x115   : > { %v2990_v20 = vsel %vm7691_vm7, %v7503_v26, %v2989_v27  ;;  %v646_v63 = vsel %vm7467_vm3, %v641_v15, %v645_v17  ;;  %6266 = vmatprep.mubr.msk.bf16.mxu0 %vm865_vm4, %v5676_v51  ;;  %v654_v0 = vor.u32 %v653_v58, %v650_v48  ;;  %v3547_v1 = vsel %vm914_vm0, %v7569_v32, 0  ;;  %v5646_v27 = vld [vmem:[%s7420_s27 + $0x24] sm:$0xe]  ;;  %v423_v48 = vld [vmem:[%s7420_s27 + $0xa4] sm:$0x1] }
 0x116   : > { %v672_v7 = vshrl.u32 %v7715_v49, 16  ;;  %v5396_v8 = vcombine.low %v636_v45, %v646_v63  ;;  %v663_v62 = vrot.slane %v661_v55, 4  ;;  %v669_v11 = vrot.slane %v667_v57, 5 }
 0x117   : > { %v2987_v26 = vsel %vm7691_vm7, %v5661_v60, %v2986_v16  ;;  %v655_v13 = vrot.slane %v654_v0, 4  ;;  %v675_v29 = vshll.u32 %v7715_v49, 16  ;;  %v681_v34 = vshll.u32 %v7718_v53, 16 }
 0x118   : > { %v5677_v17 = vcombine.low %v2987_v26, %v2990_v20  ;;  %v674_v23 = vrot.slane %v672_v7, 4  ;;  %6112 = vmatprep.mubr.msk.bf16.mxu1 %vm865_vm4, %v5396_v8  ;;  %v664_v32 = vor.u32 %v663_v62, %v659_v52  ;;  %v685_v35 = vshrl.u32 %v7718_v53, 16  ;;  %v7768_v7 = vld [vmem:[%s7420_s27 + $0xa8] sm:$0xf] }
 0x119   : > { %v691_v61 = vshll.u32 %v422_v59, 16  ;;  %v660_v16 = vsel %vm7467_vm3, %v655_v13, %v659_v52  ;;  %v677_v39 = vrot.slane %v675_v29, 5  ;;  %v5662_v40 = vrot.slane %v5646_v27, 9  ;;  %v5647_v52 = vld [vmem:[%s7420_s27 + $0x30] sm:$0xe] }
 0x11a   : > { %v2993_v41 = vrot.slane %v7513_v44, 5  ;;  %v665_v43 = vrot.slane %v664_v32, 4  ;;  %v683_v25 = vrot.slane %v681_v34, 5  ;;  %v687_v45 = vrot.slane %v685_v35, 4  ;;  %v7771_v27 = vld [vmem:[%s7420_s27 + $0xac] sm:$0xf] }
 0x11b   : > { %v693_v46 = vrot.slane %v691_v61, 5  ;;  %v678_v15 = vor.u32 %v677_v39, %v674_v23  ;;  %v2996_v55 = vrot.slane %v7519_v47, 5  ;;  %v696_v60 = vshrl.u32 %v7741_v33, 16  ;;  %v424_v61 = vld [vmem:[%s7420_s27 + $0xb0] sm:$0x1] }
 0x11c   : > { %v2994_v51 = vsel %vm7691_vm7, %v5662_v40, %v2993_v41  ;;  %v2995_v58 = vrot.slane %v2993_v41, 4  ;;  %v670_v44 = vsel %vm7467_vm3, %v665_v43, %v669_v11  ;;  %6267 = vmatmul.mubr.msk.bf16.vlgmr.msra.gmra.mrb[0].mxu0 %vm865_vm4, %v5677_v17  ;;  %v688_v57 = vor.u32 %v687_v45, %v683_v25  ;;  %v5648_v43 = vld [vmem:[%s7420_s27 + $0x3c] sm:$0xe] }
 0x11d   : > { %v699_v20 = vshll.u32 %v7741_v33, 16  ;;  %v5397_v59 = vcombine.low %v660_v16, %v670_v44  ;;  %6299 = vmatpush3.bf16.msra.mxu0 %v3547_v1  ;;  %v679_v63 = vrot.slane %v678_v15, 4  ;;  %v705_v47 = vshll.u32 %v7747_v38, 16  ;;  %v7790_v15 = vld [vmem:[%s7420_s27 + $0xb4] sm:$0xf] }
 0x11e   : > { %v2997_v0 = vsel %vm7691_vm7, %v2995_v58, %v2996_v55  ;;  %v689_v8 = vrot.slane %v688_v57, 4  ;;  %v698_v11 = vrot.slane %v696_v60, 4  ;;  %6686 = vmatprep.subr.msk.bf16.mxu0 %vm914_vm0, %v7752_v42  ;;  %v709_v17 = vshrl.u32 %v7747_v38, 16  ;;  %v7801_v60 = vld [vmem:[%s7420_s27 + $0xb8] sm:$0xf] }
 0x11f   : > { %v5678_v62 = vcombine.low %v2994_v51, %v2997_v0  ;;  %v701_v26 = vrot.slane %v699_v20, 5  ;;  %6113 = vmatmul.mubr.msk.bf16.gmra.mrb[16].mxu1 %vm865_vm4, %v5397_v59  ;;  %v684_v1 = vsel %vm7467_vm3, %v679_v63, %v683_v25  ;;  %v707_v13 = vrot.slane %v705_v47, 5 }
 0x120   : > { %v715_v23 = vshll.u32 %v423_v48, 16  ;;  %v694_v29 = vsel %vm7467_vm3, %v689_v8, %v693_v46  ;;  %v5663_v34 = vrot.slane %v5647_v52, 9  ;;  %v3000_v35 = vrot.slane %v7536_v28, 5 }
 0x121   : > { %6270 = vmatprep.mubr.msk.bf16.mxu0 %vm865_vm4, %v5678_v62  ;;  %v702_v32 = vor.u32 %v701_v26, %v698_v11  ;;  %v5398_v16 = vcombine.low %v684_v1, %v694_v29  ;;  %v711_v39 = vrot.slane %v709_v17, 4  ;;  %v3003_v41 = vrot.slane %v7542_v37, 5  ;;  %v425_v26 = vld [vmem:[%s7420_s27 + $0xbc] sm:$0x1] }
 0x122   : > { %v717_v40 = vrot.slane %v715_v23, 5  ;;  %v3001_v45 = vsel %vm7691_vm7, %v5663_v34, %v3000_v35  ;;  %v3002_v48 = vrot.slane %v3000_v35, 4  ;;  %v720_v46 = vshrl.u32 %v7768_v7, 16 }
 0x123   : > { %v703_v25 = vrot.slane %v702_v32, 4  ;;  %6116 = vmatprep.mubr.msk.bf16.mxu1 %vm865_vm4, %v5398_v16  ;;  %v712_v28 = vor.u32 %v711_v39, %v707_v13  ;;  %v723_v51 = vshll.u32 %v7768_v7, 16  ;;  %v729_v58 = vshll.u32 %v7771_v27, 16 }
 0x124   : > { %v733_v37 = vshrl.u32 %v7771_v27, 16  ;;  %v3004_v52 = vsel %vm7691_vm7, %v3002_v48, %v3003_v41  ;;  %v722_v44 = vrot.slane %v720_v46, 4  ;;  %v739_v57 = vshll.u32 %v424_v61, 16  ;;  %v7816_v41 = vld [vmem:[%s7420_s27 + $0xc0] sm:$0xf] }
 0x125   : > { %v708_v55 = vsel %vm7467_vm3, %v703_v25, %v707_v13  ;;  %v713_v20 = vrot.slane %v712_v28, 4  ;;  %v5679_v59 = vcombine.low %v3001_v45, %v3004_v52  ;;  %v725_v63 = vrot.slane %v723_v51, 5  ;;  %v7823_v48 = vld [vmem:[%s7420_s27 + $0xc4] sm:$0xf] }
 0x126   : > { %v731_v0 = vrot.slane %v729_v58, 5  ;;  %v735_v47 = vrot.slane %v733_v37, 4  ;;  %v741_v8 = vrot.slane %v739_v57, 5  ;;  %v5664_v62 = vrot.slane %v5648_v43, 9  ;;  %v426_v57 = vld [vmem:[%s7420_s27 + $0xc8] sm:$0x1] }
 0x127   : > { %v3007_v11 = vrot.slane %v7559_v9, 5  ;;  %v718_v1 = vsel %vm7467_vm3, %v713_v20, %v717_v40  ;;  %6271 = vmatmul.mubr.msk.bf16.gmra.mrb[4].mxu0 %vm865_vm4, %v5679_v59  ;;  %v726_v13 = vor.u32 %v725_v63, %v722_v44  ;;  %v3010_v17 = vrot.slane %v7564_v19, 5  ;;  %v5649_v9 = vld [vmem:[%s7420_s27 + $0x48] sm:$0xe] }
 0x128   : > { %v744_v23 = vshrl.u32 %v7790_v15, 16  ;;  %v5399_v29 = vcombine.low %v708_v55, %v718_v1  ;;  %v736_v32 = vor.u32 %v735_v47, %v731_v0  ;;  %v747_v39 = vshll.u32 %v7790_v15, 16 }
 0x129   : > { %v3008_v34 = vsel %vm7691_vm7, %v5664_v62, %v3007_v11  ;;  %v3009_v35 = vrot.slane %v3007_v11, 4  ;;  %v727_v61 = vrot.slane %v726_v13, 4  ;;  %v753_v40 = vshll.u32 %v7801_v60, 16 }
 0x12a   : > { %v746_v16 = vrot.slane %v744_v23, 4  ;;  %6117 = vmatmul.mubr.msk.bf16.gmra.mrb[20].mxu1 %vm865_vm4, %v5399_v29  ;;  %v737_v19 = vrot.slane %v736_v32, 4  ;;  %v757_v25 = vshrl.u32 %v7801_v60, 16  ;;  %v763_v45 = vshll.u32 %v425_v26, 16  ;;  %v5650_v26 = vld [vmem:[%s7420_s27 + $0x54] sm:$0xe] }
 0x12b   : > { %v3011_v43 = vsel %vm7691_vm7, %v3009_v35, %v3010_v17  ;;  %v732_v46 = vsel %vm7467_vm3, %v727_v61, %v731_v0  ;;  %v749_v51 = vrot.slane %v747_v39, 5  ;;  %v755_v58 = vrot.slane %v753_v40, 5 }
 0x12c   : > { %v5680_v28 = vcombine.low %v3008_v34, %v3011_v43  ;;  %v742_v37 = vsel %vm7467_vm3, %v737_v19, %v741_v8  ;;  %v759_v55 = vrot.slane %v757_v25, 4  ;;  %v765_v52 = vrot.slane %v763_v45, 5  ;;  %v7851_v25 = vld [vmem:[%s7420_s27 + $0xd0] sm:$0xf] }
 0x12d   : > { %v5665_v44 = vrot.slane %v5649_v9, 9  ;;  %v5400_v20 = vcombine.low %v732_v46, %v742_v37  ;;  %v750_v59 = vor.u32 %v749_v51, %v746_v16  ;;  %v3014_v63 = vrot.slane %v7587_v5, 5  ;;  %v7846_v16 = vld [vmem:[%s7420_s27 + $0xcc] sm:$0xf] }
 0x12e   : > { %6274 = vmatprep.mubr.msk.bf16.mxu0 %vm865_vm4, %v5680_v28  ;;  %v3017_v47 = vrot.slane %v7592_v14, 5  ;;  %v760_v0 = vor.u32 %v759_v55, %v755_v58  ;;  %v768_v62 = vshrl.u32 %v7816_v41, 16  ;;  %v771_v11 = vshll.u32 %v7816_v41, 16  ;;  %v7857_v55 = vld [vmem:[%s7420_s27 + $0xd4] sm:$0x1] }
 0x12f   : > { %v777_v8 = vshll.u32 %v7823_v48, 16  ;;  %6120 = vmatprep.mubr.msk.bf16.mxu1 %vm865_vm4, %v5400_v20  ;;  %v751_v1 = vrot.slane %v750_v59, 4  ;;  %v3015_v13 = vsel %vm7691_vm7, %v5665_v44, %v3014_v63  ;;  %v3016_v17 = vrot.slane %v3014_v63, 4 }
 0x130   : > { %v781_v5 = vshrl.u32 %v7823_v48, 16  ;;  %v761_v14 = vrot.slane %v760_v0, 4  ;;  %v770_v23 = vrot.slane %v768_v62, 4  ;;  %v773_v29 = vrot.slane %v771_v11, 5  ;;  %v5651_v62 = vld [vmem:[%s7420_s27 + $0x60] sm:$0xe] }
 0x131   : > { %v779_v32 = vrot.slane %v777_v8, 5  ;;  %v756_v34 = vsel %vm7467_vm3, %v751_v1, %v755_v58  ;;  %v3018_v35 = vsel %vm7691_vm7, %v3016_v17, %v3017_v47  ;;  %v787_v61 = vshll.u32 %v426_v57, 16  ;;  %v5652_v17 = vld [vmem:[%s7420_s27 + $0x84] sm:$0xe] }
 0x132   : > { %v783_v9 = vrot.slane %v781_v5, 4  ;;  %v766_v39 = vsel %vm7467_vm3, %v761_v14, %v765_v52  ;;  %v5681_v40 = vcombine.low %v3015_v13, %v3018_v35  ;;  %v774_v19 = vor.u32 %v773_v29, %v770_v23  ;;  %v5589_v13 = vld [vmem:[%s7420_s27 + $0x88] sm:$0xf] }
 0x133   : > { %v5666_v43 = vrot.slane %v5650_v26, 9  ;;  %v5401_v45 = vcombine.low %v756_v34, %v766_v39  ;;  %v789_v28 = vrot.slane %v787_v61, 5  ;;  %v3021_v51 = vrot.slane %v7617_v54, 5 }
 0x134   : > { %v784_v46 = vor.u32 %v783_v9, %v779_v32  ;;  %6275 = vmatmul.mubr.msk.bf16.gmra.mrb[8].mxu0 %vm865_vm4, %v5681_v40  ;;  %v775_v58 = vrot.slane %v774_v19, 4  ;;  %v3024_v37 = vrot.slane %v7622_v2, 5  ;;  %v792_v52 = vshrl.u32 %v7846_v16, 16 }
 0x135   : > { %v795_v44 = vshll.u32 %v7846_v16, 16  ;;  %6121 = vmatmul.mubr.msk.bf16.gmra.mrb[24].mxu1 %vm865_vm4, %v5401_v45  ;;  %v3022_v54 = vsel %vm7691_vm7, %v5666_v43, %v3021_v51  ;;  %v3023_v20 = vrot.slane %v3021_v51, 4  ;;  %v801_v59 = vshll.u32 %v7851_v25, 16 }
 0x136   : > { %v785_v57 = vrot.slane %v784_v46, 4  ;;  %v780_v2 = vsel %vm7467_vm3, %v775_v58, %v779_v32  ;;  %v794_v63 = vrot.slane %v792_v52, 4  ;;  %v805_v0 = vshrl.u32 %v7851_v25, 16  ;;  %v5590_v32 = vld [vmem:[%s7420_s27 + $0x8c] sm:$0x1] }
 0x137   : > { %v797_v47 = vrot.slane %v795_v44, 5  ;;  %v3025_v8 = vsel %vm7691_vm7, %v3023_v20, %v3024_v37  ;;  %v803_v26 = vrot.slane %v801_v59, 5  ;;  %v811_v1 = vshll.u32 %v7857_v55, 16  ;;  %v7890_v52 = vld [vmem:[%s7420_s27 + $0x94] sm:$0xf] }
 0x138   : > { %v790_v11 = vsel %vm7467_vm3, %v785_v57, %v789_v28  ;;  %v5682_v14 = vcombine.low %v3022_v54, %v3025_v8  ;;  %v807_v29 = vrot.slane %v805_v0, 4  ;;  %v5667_v35 = vrot.slane %v5651_v62, 9  ;;  %v7893_v44 = vld [vmem:[%s7420_s27 + $0x98] sm:$0x1]  ;;  %v5653_v57 = vld [vmem:[%s7420_s27 + $0x90] sm:$0xe] }
 0x139   : > { %v5402_v5 = vcombine.low %v780_v2, %v790_v11  ;;  %v798_v23 = vor.u32 %v797_v47, %v794_v63  ;;  %v813_v34 = vrot.slane %v811_v1, 5  ;;  %v3028_v9 = vrot.slane %v7650_v56, 5  ;;  %v6867_v59 = vld [vmem:[%s7420_s27] sm:$0xf]  ;;  %v7900_v2 = vld [vmem:[%s7420_s27 + $0x4] sm:$0xf] }
 0x13a   : > { %v3031_v61 = vrot.slane %v7658_v6, 5  ;;  %6278 = vmatprep.mubr.msk.bf16.mxu0 %vm865_vm4, %v5682_v14  ;;  %v808_v40 = vor.u32 %v807_v29, %v803_v26  ;;  %v5668_v19 = vrot.slane %v5652_v17, 9  ;;  %v3035_v43 = vrot.slane %v5589_v13, 5  ;;  %v5595_v0 = vld [vmem:[%s7420_s27 + $0xa0] sm:$0xf] }
 0x13b   : > { %6124 = vmatprep.mubr.msk.bf16.mxu1 %vm865_vm4, %v5402_v5  ;;  %v799_v39 = vrot.slane %v798_v23, 4  ;;  %v3029_v45 = vsel %vm7691_vm7, %v5667_v35, %v3028_v9  ;;  %v3030_v46 = vrot.slane %v3028_v9, 4  ;;  %v3038_v56 = vrot.slane %v5590_v32, 5  ;;  %v5654_v62 = vld [vmem:[%s7420_s27 + $0x9c] sm:$0xe] }
 0x13c   : > { %v809_v28 = vrot.slane %v808_v40, 4  ;;  %v3036_v51 = vsel %vm7691_vm7, %v5668_v19, %v3035_v43  ;;  %v3037_v58 = vrot.slane %v3035_v43, 4  ;;  %v5420_v63 = vcombine.low %v6867_v59, %v7900_v2  ;;  %v5598_v23 = vld [vmem:[%s7420_s27 + $0xac] sm:$0xf]  ;;  %v5655_v29 = vld [vmem:[%s7420_s27 + $0xa8] sm:$0xe] }
 0x13d   : > { %v804_v6 = vsel %vm7467_vm3, %v799_v39, %v803_v26  ;;  %v3032_v37 = vsel %vm7691_vm7, %v3030_v46, %v3031_v61  ;;  %v5596_v26 = vld [vmem:[%s7420_s27 + $0xa4] sm:$0x1]  ;;  %v5669_v1 = vrot.slane %v5653_v57, 9  ;;  %v3042_v13 = vrot.slane %v7890_v52, 5  ;;  %v5599_v9 = vld [vmem:[%s7420_s27 + $0xb0] sm:$0x1] }
 0x13e   : > { %v814_v54 = vsel %vm7467_vm3, %v809_v28, %v813_v34  ;;  %v5683_v20 = vcombine.low %v3029_v45, %v3032_v37  ;;  %v3039_v47 = vsel %vm7691_vm7, %v3037_v58, %v3038_v56  ;;  %v3045_v17 = vrot.slane %v7893_v44, 5  ;;  %v5601_v61 = vld [vmem:[%s7420_s27 + $0xb8] sm:$0xf]  ;;  %v6869_v39 = vld [vmem:[%s7420_s27 + $0xc] sm:$0xf] }
 0x13f   : > { %v5403_v11 = vcombine.low %v804_v6, %v814_v54  ;;  %v5684_v8 = vcombine.low %v3036_v51, %v3039_v47  ;;  %v5670_v5 = vrot.slane %v5654_v62, 9  ;;  %v3049_v14 = vrot.slane %v5595_v0, 5  ;;  %v7922_v40 = vld [vmem:[%s7420_s27 + $0x10] sm:$0xf]  ;;  %v5602_v46 = vld [vmem:[%s7420_s27 + $0xbc] sm:$0x1] }
 0x140   : > { %6279 = vmatmul.mubr.msk.bf16.gmra.mrb[12].mxu0 %vm865_vm4, %v5683_v20  ;;  %v3043_v32 = vsel %vm7691_vm7, %v5669_v1, %v3042_v13  ;;  %v3044_v34 = vrot.slane %v3042_v13, 4  ;;  %v3052_v35 = vrot.slane %v5596_v26, 5  ;;  %v5421_v19 = vcombine.low %v6869_v39, %v7922_v40  ;;  %v5656_v56 = vld [vmem:[%s7420_s27 + $0xb4] sm:$0xe]  ;;  %v6871_v28 = vld [vmem:[%s7420_s27 + $0x18] sm:$0xf] }
 0x141   : > { %6125 = vmatmul.mubr.msk.bf16.gmra.mrb[28].mxu1 %vm865_vm4, %v5403_v11  ;;  %6282 = vmatprep.mubr.msk.bf16.mxu0 %vm865_vm4, %v5684_v8  ;;  %v3050_v43 = vsel %vm7691_vm7, %v5670_v5, %v3049_v14  ;;  %v3051_v45 = vrot.slane %v3049_v14, 4  ;;  %v7933_v51 = vld [vmem:[%s7420_s27 + $0x1c] sm:$0xf]  ;;  %v5671_v37 = vrot.slane %v5655_v29, 9  ;;  %v3056_v57 = vrot.slane %v5598_v23, 5 }
 0x142   : > { %6130 = vmatprep.mubr.msk.bf16.mxu1 %vm865_vm4, %v5420_v63  ;;  %v3046_v6 = vsel %vm7691_vm7, %v3044_v34, %v3045_v17  ;;  %v5422_v58 = vcombine.low %v6871_v28, %v7933_v51  ;;  %v3059_v59 = vrot.slane %v5599_v9, 5  ;;  %v3063_v63 = vrot.slane %v5601_v61, 5  ;;  %v5604_v47 = vld [vmem:[%s7420_s27 + $0xc4] sm:$0xf]  ;;  %v5607_v26 = vld [vmem:[%s7420_s27 + $0xd0] sm:$0xf] }
 0x143   : > { %v5685_v54 = vcombine.low %v3043_v32, %v3046_v6  ;;  %v3053_v20 = vsel %vm7691_vm7, %v3051_v45, %v3052_v35  ;;  %v3058_v62 = vrot.slane %v3056_v57, 4  ;;  %v5672_v11 = vrot.slane %v5656_v56, 9  ;;  %v7943_v17 = vld [vmem:[#allocation6 + $0x6] sm:$0x3]  ;;  %v5657_v34 = vld [vmem:[%s7420_s27 + $0xc0] sm:$0xe] }
 0x144   : > { %v5686_v0 = vcombine.low %v3050_v43, %v3053_v20  ;;  %v3066_v8 = vrot.slane %v5602_v46, 5  ;;  %v1633_v1 = vsel %vm914_vm0, %v7647_v50, 0  ;;  %v3065_v13 = vrot.slane %v3063_v63, 4  ;;  %v5605_v50 = vld [vmem:[%s7420_s27 + $0xc8] sm:$0x1] }
 0x145   : > { %v3057_v5 = vsel %vm7691_vm7, %v5671_v37, %v3056_v57  ;;  %v3060_v14 = vsel %vm7691_vm7, %v3058_v62, %v3059_v59  ;;  %v3070_v23 = vrot.slane %v5604_v47, 5  ;;  %v3064_v29 = vsel %vm7691_vm7, %v5672_v11, %v3063_v63  ;;  %v5608_v9 = vld [vmem:[%s7420_s27 + $0xd4] sm:$0x1]  ;;  %v5658_v61 = vld [vmem:[%s7420_s27 + $0xcc] sm:$0xe] }
 0x146   : > { %v3067_v32 = vsel %vm7691_vm7, %v3065_v13, %v3066_v8  ;;  %v3077_v35 = vrot.slane %v5607_v26, 5  ;;  %v6873_v39 = vld [vmem:[%s7420_s27 + $0x24] sm:$0xf]  ;;  %v5687_v45 = vcombine.low %v3057_v5, %v3060_v14  ;;  %v5673_v56 = vrot.slane %v5657_v34, 9  ;;  %v7969_v37 = vld [vmem:[%s7420_s27 + $0x34] sm:$0xf] }
 0x147   : > { %v5688_v46 = vcombine.low %v3064_v29, %v3067_v32  ;;  %v3072_v6 = vrot.slane %v3070_v23, 4  ;;  %v3073_v28 = vrot.slane %v5605_v50, 5  ;;  %v3080_v59 = vrot.slane %v5608_v9, 5  ;;  %v5610_v63 = vld [vmem:[%s7420_s27 + $0xdc] sm:$0xf] }
 0x148   : > { %6283 = vmatmul.mubr.msk.bf16.gmra.mrb[16].mxu0 %vm865_vm4, %v5685_v54  ;;  %v5674_v54 = vrot.slane %v5658_v61, 9  ;;  %v3079_v20 = vrot.slane %v3077_v35, 4  ;;  %v3071_v47 = vsel %vm7691_vm7, %v5673_v56, %v3070_v23  ;;  %v3084_v62 = vrot.slane %v5610_v63, 5  ;;  %v5611_v26 = vld [vmem:[%s7420_s27 + $0xe0] sm:$0x1] }
 0x149   : > { %6131 = vmatmul.mubr.msk.bf16.vlgmr.msra.gmra.mrb[0].mxu1 %vm865_vm4, %v5421_v19  ;;  %6286 = vmatprep.mubr.msk.bf16.mxu0 %vm865_vm4, %v5686_v0  ;;  %v7964_v19 = vld [vmem:[%s7420_s27 + $0x28] sm:$0xf]  ;;  %v3074_v0 = vsel %vm7691_vm7, %v3072_v6, %v3073_v28  ;;  %v6877_v13 = vld [vmem:[%s7420_s27 + $0x3c] sm:$0xf]  ;;  %v7989_v5 = vld [vmem:[%s7420_s27 + $0x40] sm:$0xf]  ;;  %v5426_v9 = vcombine.low %v7595_v12, %v7603_v36  ;;  %v5428_v6 = vcombine.low %v7664_v18, %v7667_v24 }
 0x14a   : > { %6163 = vmatpush3.bf16.msra.mxu1 %v1633_v1  ;;  %6134 = vmatprep.mubr.msk.bf16.mxu1 %vm865_vm4, %v5422_v58  ;;  %v5423_v43 = vcombine.low %v6873_v39, %v7964_v19  ;;  %v6875_v58 = vld [vmem:[%s7420_s27 + $0x30] sm:$0xf]  ;;  %v3078_v11 = vsel %vm7691_vm7, %v5674_v54, %v3077_v35  ;;  %v3081_v8 = vsel %vm7691_vm7, %v3079_v20, %v3080_v59  ;;  %v5659_v1 = vld [vmem:[%s7420_s27 + $0xd8] sm:$0xe]  ;;  %v3086_v32 = vrot.slane %v3084_v62, 4 }
 0x14b   : > { %6681 = vmatprep.subr.msk.bf16.mxu1 %vm914_vm0, %v7943_v17  ;;  %v5424_v57 = vcombine.low %v6875_v58, %v7969_v37  ;;  %v5425_v14 = vcombine.low %v6877_v13, %v7989_v5  ;;  %v5689_v50 = vcombine.low %v3071_v47, %v3074_v0  ;;  %v5690_v23 = vcombine.low %v3078_v11, %v3081_v8  ;;  %v1371_v58 = vld [vmem:[%s7420_s27] sm:$0xe]  ;;  %v1372_v20 = vld [vmem:[%s7420_s27 + $0xc] sm:$0xe]  ;;  %v6879_v18 = vld [vmem:[%s7420_s27 + $0x8] sm:$0x1] }
 0x14c   : > { %v5675_v29 = vrot.slane %v5659_v1, 9  ;;  %v3087_v34 = vrot.slane %v5611_v26, 5  ;;  %v2461_v35 = vshll.u32 %v7890_v52, 16  ;;  %v2465_v61 = vshrl.u32 %v7890_v52, 16  ;;  %v6830_v47 = vld [vmem:[%s7420_s27 + $0x24] sm:$0xff]  }
 0x14d   : > { %v2471_v56 = vshll.u32 %v7893_v44, 16  ;;  %v1424_v54 = vrot.slane %v7900_v2, 5  ;;  %v1427_v24 = vrot.slane %v6879_v18, 5  ;;  %v6880_v44 = vld [vmem:[%s7420_s27 + $0x14] sm:$0x1]  ;;  %v5429_v63 = vcombine.low %v7683_v3, %v7689_v10 }
 0x14e   : > { %v3085_v39 = vsel %vm7691_vm7, %v5675_v29, %v3084_v62  ;;  %v8004_v12 = vrot.slane %v2461_v35, 5  ;;  %v2467_v36 = vrot.slane %v2465_v61, 4  ;;  %v1434_v59 = vrot.slane %v6880_v44, 5  ;;  %v1374_v62 = vld [vmem:[%s7420_s27 + $0x24] sm:$0xe] }
 0x14f   : > { %v5452_v0 = vrot.slane %v1371_v58, 9  ;;  %v4273_v11 = vsel %vm914_vm0, %v7752_v42, 0  ;;  %v1426_v8 = vrot.slane %v1424_v54, 4  ;;  %v1375_v13 = vld [vmem:[%s7420_s27 + $0x30] sm:$0xe]  ;;  %v1445_v3 = vrot.slane %v7964_v19, 5 }
 0x150   : > { %6287 = vmatmul.mubr.msk.bf16.gmra.mrb[20].mxu0 %vm865_vm4, %v5687_v45  ;;  %9288 = vst [vmem:[#allocation26_spill] sm:$0xff] %v8004_v12  ;;  %v5427_v45 = vcombine.low %v7628_v21, %v7634_v30  ;;  %v2468_v28 = vor.u32 %v2467_v36, %v8004_v12  ;;  %v1373_v21 = vld [vmem:[%s7420_s27 + $0x18] sm:$0xe]  ;;  %v1438_v30 = vrot.slane %v7933_v51, 5  ;;  %v5453_v51 = vrot.slane %v1372_v20, 9  ;;  %v6834_v58 = vld [vmem:[%s7420_s27 + $0x3c] sm:$0xff]  }
 0x151   : > { %6135 = vmatmul.mubr.msk.bf16.gmra.mrb[4].mxu1 %vm865_vm4, %v5423_v43  ;;  %6290 = vmatprep.mubr.msk.bf16.mxu0 %vm865_vm4, %v5688_v46  ;;  %v3088_v43 = vsel %vm7691_vm7, %v3086_v32, %v3087_v34  ;;  %v6828_v46 = vld [vmem:[%s7420_s27 + $0x18] sm:$0xff]   ;;  %v5454_v1 = vrot.slane %v1373_v21, 9  ;;  %v6832_v32 = vld [vmem:[%s7420_s27 + $0x30] sm:$0xff]   ;;  %v5431_v34 = vcombine.low %v7741_v33, %v7747_v38  ;;  %v5432_v42 = vcombine.low %v7768_v7, %v7771_v27 }
 0x152   : > { %6138 = vmatprep.mubr.msk.bf16.mxu1 %vm865_vm4, %v5424_v57  ;;  %v5691_v52 = vcombine.low %v3085_v39, %v3088_v43  ;;  %v1431_v57 = vrot.slane %v7922_v40, 5  ;;  %v8024_v40 = vrot.slane %v2471_v56, 5  ;;  %v8027_v2 = vrot.slane %v2468_v28, 4  ;;  %v1376_v10 = vld [vmem:[%s7420_s27 + $0x3c] sm:$0xe]  ;;  %v6838_v33 = vld [vmem:[%s7420_s27 + $0x54] sm:$0xff]  }
 0x153   : > { %v1452_v35 = vrot.slane %v7969_v37, 5  ;;  %v8055_v19 = vsel %vm7691_vm7, %v5452_v0, %v1424_v54  ;;  %v1459_v39 = vrot.slane %v7989_v5, 5  ;;  %v8065_v37 = vsel %vm7691_vm7, %v1426_v8, %v1427_v24  ;;  %v6882_v56 = vld [vmem:[%s7420_s27 + $0x2c] sm:$0x1]  ;;  %v6883_v20 = vld [vmem:[%s7420_s27 + $0x38] sm:$0x1] }
 0x154   : > { %9289 = vst [vmem:[#allocation27_spill] sm:$0xff] %v8024_v40  ;;  %9290 = vst [vmem:[#allocation28_spill] sm:$0xff] %v8027_v2  ;;  %v1433_v26 = vrot.slane %v1431_v57, 4  ;;  %v8059_v61 = vsel %vm7691_vm7, %v5453_v51, %v1431_v57  ;;  %v8073_v36 = vsel %vm7691_vm7, %v5454_v1, %v1438_v30  ;;  %v5456_v28 = vrot.slane %v1375_v13, 9  ;;  %v5772_v18 = vld [vmem:[%s7420_s27 + $0x18] sm:$0xf] }
 0x155   : > { %v1454_v54 = vrot.slane %v1452_v35, 4  ;;  %v1455_v21 = vrot.slane %v6883_v20, 5  ;;  %v6836_v24 = vld [vmem:[%s7420_s27 + $0x48] sm:$0xff]   ;;  %v8094_v44 = vsel %vm914_vm0, %v7943_v17, 0  ;;  %v1378_v1 = vld [vmem:[%s7420_s27 + $0x54] sm:$0xe] }
 0x156   : > { %v8069_v43 = vsel %vm7691_vm7, %v1433_v26, %v1434_v59  ;;  %v1461_v59 = vrot.slane %v1459_v39, 4  ;;  %v6885_v0 = vld [vmem:[%s7420_s27 + $0x4c] sm:$0xf]  ;;  %v5775_v13 = vld [vmem:[%s7420_s27 + $0x24] sm:$0xf] }
 0x157   : > { %v1466_v51 = vrot.slane %v6885_v0, 5  ;;  %v3818_v20 = vshll.u32 %v5775_v13, 16  ;;  %v8167_v27 = vld [vmem:[%s7420_s27 + $0x7c] sm:$0xf]  ;;  %v5777_v17 = vld [vmem:[%s7420_s27 + $0x2c] sm:$0x1] }
 0x158   : > { %6291 = vmatmul.mubr.msk.bf16.gmra.mrb[24].mxu0 %vm865_vm4, %v5689_v50  ;;  %v1440_v50 = vrot.slane %v1438_v30, 4  ;;  %v5457_v30 = vrot.slane %v1376_v10, 9  ;;  %v6886_v10 = vld [vmem:[%s7420_s27 + $0x50] sm:$0x1]  ;;  %v6891_v8 = vld [vmem:[%s7420_s27 + $0x88] sm:$0xf] }
 0x159   : > { %6139 = vmatmul.mubr.msk.bf16.gmra.mrb[8].mxu1 %vm865_vm4, %v5425_v14  ;;  %6294 = vmatprep.mubr.msk.bf16.mxu0 %vm865_vm4, %v5690_v23  ;;  %v5430_v14 = vcombine.low %v7715_v49, %v7718_v53  ;;  %v6881_v23 = vld [vmem:[%s7420_s27 + $0x20] sm:$0x1]  ;;  %v5434_v53 = vcombine.low %v7816_v41, %v7823_v48  ;;  %v6901_v2 = vld [vmem:[%s7420_s27 + $0xbc] sm:$0x1] }
 0x15a   : > { %6142 = vmatprep.mubr.msk.bf16.mxu1 %vm865_vm4, %v5426_v9  ;;  %v1441_v29 = vrot.slane %v6881_v23, 5  ;;  %v5433_v9 = vcombine.low %v7790_v15, %v7801_v60  ;;  %v8049_v49 = vld [vmem:[#allocation6 + $0x10] sm:$0x3]  ;;  %v8120_v23 = vsel %vm7691_vm7, %v5456_v28, %v1452_v35  ;;  %v1468_v35 = vrot.slane %v1466_v51, 4 }
 0x15c   : > { %v8081_v5 = vsel %vm7691_vm7, %v1440_v50, %v1441_v29 }
 0x160   : > { %6295 = vmatmul.mubr.msk.bf16.gmra.mrb[28].mxu0 %vm865_vm4, %v5691_v52  ;;  %v5455_v52 = vrot.slane %v1374_v62, 9  ;;  %v5773_v62 = vld [vmem:[%s7420_s27 + $0x1c] sm:$0xf] }
 0x161   : > { %6143 = vmatmul.mubr.msk.bf16.gmra.mrb[12].mxu1 %vm865_vm4, %v5427_v45  ;;  %6300 = vmatprep.mubr.msk.bf16.mxu0 %vm865_vm4, %v6828_v46  ;;  %v8076_v45 = vld [vmem:[%s7420_s27 + $0x48] sm:$0xe]  ;;  %v1447_v46 = vrot.slane %v1445_v3, 4  ;;  %v3804_v28 = vshrl.u32 %v5773_v62, 16 }
 0x162   : > { %6146 = vmatprep.mubr.msk.bf16.mxu1 %vm865_vm4, %v5428_v6  ;;  %v1448_v6 = vrot.slane %v6882_v56, 5  ;;  %v8109_v26 = vsel %vm7691_vm7, %v5455_v52, %v1445_v3  ;;  %v5458_v29 = vrot.slane %v8076_v45, 9  ;;  %v8126_v56 = vsel %vm7691_vm7, %v1454_v54, %v1455_v21 }
 0x163   : > { %v8130_v3 = vsel %vm7691_vm7, %v5457_v30, %v1459_v39  ;;  %v3791_v52 = vshrl.u32 %v5772_v18, 16  ;;  %v3800_v45 = vshll.u32 %v5773_v62, 16  ;;  %v3815_v54 = vshrl.u32 %v5775_v13, 16  ;;  %v6840_v62 = vld [vmem:[%s7420_s27 + $0x60] sm:$0xff]  }
 0x164   : > { %v8116_v50 = vsel %vm7691_vm7, %v1447_v46, %v1448_v6  ;;  %v3794_v46 = vshll.u32 %v5772_v18, 16  ;;  %v5459_v18 = vrot.slane %v1378_v1, 9  ;;  %v5774_v1 = vld [vmem:[%s7420_s27 + $0x20] sm:$0x1] }
 0x165   : > { %v8171_v13 = vrot.slane %v3800_v45, 5 }
 0x166   : > { %v3796_v0 = vrot.slane %v3794_v46, 5  ;;  %v5778_v46 = vld [vmem:[%s7420_s27 + $0x30] sm:$0xf] }
 0x168   : > { %6301 = vmatmul.mubr.msk.bf16.vlgmr.msra.gmra.mrb[0].mxu0 %vm865_vm4, %v6830_v47 }
 0x169   : > { %6147 = vmatmul.mubr.msk.bf16.gmra.mrb[16].mxu1 %vm865_vm4, %v5429_v63  ;;  %6333 = vmatpush3.bf16.msra.mxu0 %v4273_v11  ;;  %v6884_v63 = vld [vmem:[%s7420_s27 + $0x44] sm:$0x1]  ;;  %v3839_v11 = vshrl.u32 %v5778_v46, 16 }
 0x16a   : > { %6150 = vmatprep.mubr.msk.bf16.mxu1 %vm865_vm4, %v5430_v14  ;;  %6304 = vmatprep.mubr.msk.bf16.mxu0 %vm865_vm4, %v6832_v32  ;;  %v1462_v47 = vrot.slane %v6884_v63, 5  ;;  %v5776_v14 = vld [vmem:[%s7420_s27 + $0x28] sm:$0xf]  ;;  %v1469_v32 = vrot.slane %v6886_v10, 5 }
 0x16b   : > { %6687 = vmatprep.subr.msk.bf16.mxu0 %vm914_vm0, %v8049_v49  ;;  %v3824_v21 = vshll.u32 %v5776_v14, 16  ;;  %v3828_v39 = vshrl.u32 %v5776_v14, 16  ;;  %v3817_v14 = vrot.slane %v3815_v54, 4 }
 0x16c   : > { %v8134_v6 = vsel %vm7691_vm7, %v1461_v59, %v1462_v47  ;;  %v6887_v59 = vld [vmem:[%s7420_s27 + $0x58] sm:$0xf]  ;;  %v3793_v47 = vrot.slane %v3791_v52, 4  ;;  %v8164_v7 = vsel %vm7691_vm7, %v1468_v35, %v1469_v32  ;;  %v6889_v35 = vld [vmem:[%s7420_s27 + $0x5c] sm:$0x1] }
 0x16d   : > { %v1473_v63 = vrot.slane %v6887_v59, 5  ;;  %v8173_v10 = vrot.slane %v3824_v21, 5  ;;  %v3830_v52 = vrot.slane %v3828_v39, 4  ;;  %v1476_v59 = vrot.slane %v6889_v35, 5  ;;  %v5779_v21 = vld [vmem:[%s7420_s27 + $0x34] sm:$0xf] }
 0x16e   : > { %v3797_v54 = vor.u32 %v3796_v0, %v3793_v47  ;;  %v1380_v35 = vld [vmem:[%s7420_s27 + $0x84] sm:$0xe]  ;;  %v3834_v47 = vshll.u32 %v5777_v17, 16  ;;  %v6892_v0 = vld [vmem:[%s7420_s27 + $0x94] sm:$0xf] }
 0x16f   : > { %v1475_v32 = vrot.slane %v1473_v63, 4  ;;  %v6893_v17 = vld [vmem:[%s7420_s27 + $0x8c] sm:$0x1] }
 0x170   : > { %6305 = vmatmul.mubr.msk.bf16.gmra.mrb[4].mxu0 %vm865_vm4, %v6834_v58  ;;  %v6890_v58 = vld [vmem:[%s7420_s27 + $0x80] sm:$0x1]  ;;  %v3798_v15 = vrot.slane %v3797_v54, 4 }
 0x171   : > { %6151 = vmatmul.mubr.msk.bf16.gmra.mrb[20].mxu1 %vm865_vm4, %v5431_v34  ;;  %6308 = vmatprep.mubr.msk.bf16.mxu0 %vm865_vm4, %v6836_v24  ;;  %v8156_v34 = vsel %vm7691_vm7, %v5458_v29, %v1466_v51  ;;  %v8159_v24 = vld [vmem:[%s7420_s27 + $0x78] sm:$0xe]  ;;  %v3806_v51 = vrot.slane %v3804_v28, 4  ;;  %v3820_v29 = vrot.slane %v3818_v20, 5  ;;  %v1483_v30 = vrot.slane %v6890_v58, 5 }
 0x172   : > { %6154 = vmatprep.mubr.msk.bf16.mxu1 %vm865_vm4, %v5432_v42  ;;  %v9256_v42 = vrot.slane %v8167_v27, 5  ;;  %v5460_v38 = vrot.slane %v8159_v24, 9  ;;  %v8184_v28 = vsel %vm7691_vm7, %v5459_v18, %v1473_v63  ;;  %v3810_v20 = vshll.u32 %v5774_v1, 16 }
 0x173   : > { %v3807_v39 = vor.u32 %v3806_v51, %v8171_v13  ;;  %v1487_v24 = vrot.slane %v6891_v8, 5  ;;  %v3842_v58 = vshll.u32 %v5778_v46, 16  ;;  %v3821_v18 = vor.u32 %v3820_v29, %v3817_v14 }
 0x174   : > { %v1482_v45 = vrot.slane %v9256_v42, 4  ;;  %v3831_v63 = vor.u32 %v3830_v52, %v8173_v10  ;;  %v8201_v8 = vsel %vm7691_vm7, %v1475_v32, %v1476_v59  ;;  %v1494_v1 = vrot.slane %v6892_v0, 5  ;;  %v6842_v59 = vld [vmem:[%s7420_s27 + $0x6c] sm:$0xff]  }
 0x175   : > { %v3848_v51 = vshll.u32 %v5779_v21, 16  ;;  %v3852_v14 = vshrl.u32 %v5779_v21, 16  ;;  %v3812_v60 = vrot.slane %v3810_v20, 5  ;;  %v3808_v29 = vrot.slane %v3807_v39, 4  ;;  %v6843_v0 = vld [vmem:[%s7420_s27 + $0x90] sm:$0xff]  }
 0x176   : > { %v1489_v52 = vrot.slane %v1487_v24, 4  ;;  %v3841_v46 = vrot.slane %v3839_v11, 4  ;;  %v3844_v32 = vrot.slane %v3842_v58, 5  ;;  %v3822_v21 = vrot.slane %v3821_v18, 4  ;;  %v8214_v20 = vld [vmem:[%s7420_s27 + $0x38] sm:$0x1] }
 0x177   : > { %v3832_v57 = vrot.slane %v3831_v63, 4  ;;  %v3836_v42 = vrot.slane %v3834_v47, 5  ;;  %v1496_v48 = vrot.slane %v1494_v1, 4  ;;  %9291 = vst [vmem:[#allocation29_spill] sm:$0xff] %v8214_v20  ;;  %v9292_v39 = vrot.slane %v8167_v27, 5 }
 0x178   : > { %6309 = vmatmul.mubr.msk.bf16.gmra.mrb[8].mxu0 %vm865_vm4, %v6838_v33  ;;  %v1381_v33 = vld [vmem:[%s7420_s27 + $0x90] sm:$0xe]  ;;  %v8228_v18 = vsel %vm7691_vm7, %v1482_v45, %v1483_v30  ;;  %v1382_v47 = vld [vmem:[%s7420_s27 + $0x9c] sm:$0xe]  ;;  %v3813_v30 = vsel %vm7467_vm3, %v3808_v29, %v3812_v60  ;;  %v3827_v45 = vsel %vm7467_vm3, %v3822_v21, %v8173_v10  ;;  %v9294_v29 = vcombine.low %v8055_v19, %v8065_v37 }
 0x179   : > { %6155 = vmatmul.mubr.msk.bf16.gmra.mrb[24].mxu1 %vm865_vm4, %v5433_v9  ;;  %6312 = vmatprep.mubr.msk.bf16.mxu0 %vm865_vm4, %v6840_v62  ;;  %v5461_v9 = vrot.slane %v1380_v35, 9  ;;  %v1490_v62 = vrot.slane %v6893_v17, 5  ;;  %v5462_v41 = vrot.slane %v1381_v33, 9  ;;  %v8216_v35 = vrot.slane %v3848_v51, 5 }
 0x17a   : > { %6158 = vmatprep.mubr.msk.bf16.mxu1 %vm865_vm4, %v5434_v53  ;;  %v6894_v53 = vld [vmem:[%s7420_s27 + $0x98] sm:$0x1]  ;;  %v3854_v17 = vrot.slane %v3852_v14, 4  ;;  %v8224_v58 = vsel %vm7691_vm7, %v5460_v38, %v9292_v39  ;;  %v3803_v33 = vsel %vm7467_vm3, %v3798_v15, %v8171_v13  ;;  %v3845_v51 = vor.u32 %v3844_v32, %v3841_v46  ;;  %v6895_v38 = vld [vmem:[%s7420_s27 + $0xa0] sm:$0xf] }
 0x17b   : > { %v1497_v54 = vrot.slane %v6894_v53, 5  ;;  %v8232_v63 = vsel %vm7691_vm7, %v5461_v9, %v1487_v24  ;;  %v8240_v27 = vsel %vm7691_vm7, %v1489_v52, %v1490_v62  ;;  %v1501_v14 = vrot.slane %v6895_v38, 5  ;;  %v5781_v15 = vld [vmem:[%s7420_s27 + $0x3c] sm:$0xf]  ;;  %v6896_v52 = vld [vmem:[%s7420_s27 + $0xa4] sm:$0x1] }
 0x17c   : > { %v8251_v13 = vsel %vm7691_vm7, %v5462_v41, %v1494_v1  ;;  %v3858_v24 = vshll.u32 %v8214_v20, 16  ;;  %v9293_v9 = vcombine.low %v7846_v16, %v7851_v25  ;;  %v3837_v60 = vsel %vm7467_vm3, %v3832_v57, %v3836_v42  ;;  %v8281_v32 = vld [vmem:[%s7420_s27 + $0x40] sm:$0xf]  ;;  %v8285_v41 = vld [vmem:[%s7420_s27 + $0x4c] sm:$0xf] }
 0x17d   : > { %v8264_v10 = vsel %vm7691_vm7, %v1496_v48, %v1497_v54  ;;  %v3855_v1 = vor.u32 %v3854_v17, %v8216_v35  ;;  %v5463_v62 = vrot.slane %v1382_v47, 9  ;;  %v8277_v42 = vsel %vm914_vm0, %v8049_v49, 0  ;;  %9295 = vst [vmem:[#allocation30_spill] sm:$0xff] %v8281_v32  ;;  %v6844_v48 = vld [vmem:[%s7420_s27 + $0x9c] sm:$0xff]   ;;  %v5787_v39 = vld [vmem:[%s7420_s27 + $0x54] sm:$0xf] }
 0x17e   : > { %v1504_v46 = vrot.slane %v6896_v52, 5  ;;  %v3846_v19 = vrot.slane %v3845_v51, 4  ;;  %v1503_v37 = vrot.slane %v1501_v14, 4  ;;  %v3866_v21 = vshll.u32 %v5781_v15, 16  ;;  %v6845_v47 = vld [vmem:[%s7420_s27 + $0xa8] sm:$0xff]  }
 0x17f   : > { %v8288_v53 = vcombine.low %v3803_v33, %v3813_v30  ;;  %v8290_v54 = vcombine.low %v3827_v45, %v3837_v60  ;;  %v3860_v17 = vrot.slane %v3858_v24, 5  ;;  %v3856_v51 = vrot.slane %v3855_v1, 4  ;;  %v8303_v33 = vld [vmem:[%s7420_s27 + $0x58] sm:$0xf]  ;;  %v8306_v30 = vld [vmem:[%s7420_s27 + $0x44] sm:$0x1] }
 0x180   : > { %6313 = vmatmul.mubr.msk.bf16.gmra.mrb[12].mxu0 %vm865_vm4, %v6842_v59  ;;  %v5784_v59 = vld [vmem:[%s7420_s27 + $0x48] sm:$0xf]  ;;  %v8298_v38 = vsel %vm7691_vm7, %v5463_v62, %v1501_v14  ;;  %9296 = vst [vmem:[#allocation31_spill] sm:$0xff] %v8306_v30  ;;  %v3896_v24 = vshll.u32 %v8285_v41, 16  ;;  %v3851_v1 = vsel %vm7467_vm3, %v3846_v19, %v8216_v35  ;;  %v8315_v14 = vsel %vm7691_vm7, %v1503_v37, %v1504_v46  ;;  %v6900_v20 = vld [vmem:[%s7420_s27 + $0xb8] sm:$0xf] }
 0x181   : > { %6159 = vmatmul.mubr.msk.bf16.gmra.mrb[28].mxu1 %vm865_vm4, %v9293_v9  ;;  %6316 = vmatprep.mubr.msk.bf16.mxu0 %vm865_vm4, %v6843_v0  ;;  %v3863_v0 = vshrl.u32 %v5781_v15, 16  ;;  %v3872_v15 = vshll.u32 %v8281_v32, 16  ;;  %v3876_v9 = vshrl.u32 %v8281_v32, 16  ;;  %v3887_v45 = vshrl.u32 %v5784_v59, 16  ;;  %v8319_v49 = vld [vmem:[%s7420_s27 + $0xa8] sm:$0xe] }
 0x182   : > { %6164 = vmatprep.mubr.msk.bf16.mxu1 %vm865_vm4, %v9294_v29  ;;  %v3890_v60 = vshll.u32 %v5784_v59, 16  ;;  %v3900_v29 = vshrl.u32 %v8285_v41, 16  ;;  %v3868_v52 = vrot.slane %v3866_v21, 5  ;;  %v3911_v59 = vshrl.u32 %v5787_v39, 16 }
 0x183   : > { %v3865_v62 = vrot.slane %v3863_v0, 4  ;;  %v3914_v57 = vshll.u32 %v5787_v39, 16  ;;  %v3920_v16 = vshll.u32 %v8303_v33, 16  ;;  %v3924_v11 = vshrl.u32 %v8303_v33, 16 }
 0x184   : > { %v9297_v35 = vcombine.low %v8059_v61, %v8069_v43  ;;  %v3861_v46 = vsel %vm7467_vm3, %v3856_v51, %v3860_v17  ;;  %v8330_v19 = vrot.slane %v3872_v15, 5  ;;  %v3878_v37 = vrot.slane %v3876_v9, 4  ;;  %v8339_v61 = vld [vmem:[%s7420_s27 + $0x50] sm:$0x1]  ;;  %v8349_v9 = vld [vmem:[%s7420_s27 + $0x5c] sm:$0x1] }
 0x185   : > { %v3882_v0 = vshll.u32 %v8306_v30, 16  ;;  %v9298_v21 = vcombine.low %v8073_v36, %v8081_v5  ;;  %v3889_v43 = vrot.slane %v3887_v45, 4  ;;  %v8341_v39 = vrot.slane %v3896_v24, 5  ;;  %v6897_v36 = vld [vmem:[%s7420_s27 + $0xac] sm:$0xf] }
 0x186   : > { %v3902_v17 = vrot.slane %v3900_v29, 4  ;;  %v3869_v15 = vor.u32 %v3868_v52, %v3865_v62  ;;  %v1508_v5 = vrot.slane %v6897_v36, 5  ;;  %v6898_v45 = vld [vmem:[#allocation6 + $0x8] sm:$0x3]  ;;  %v3916_v24 = vrot.slane %v3914_v57, 5  ;;  %v6847_v62 = vld [vmem:[%s7420_s27 + $0xc0] sm:$0xff]  }
 0x187   : > { %v8352_v29 = vrot.slane %v3920_v16, 5  ;;  %v8356_v52 = vcombine.low %v3851_v1, %v3861_v46  ;;  %v8359_v51 = vrot.slane %v3882_v0, 5  ;;  %v3906_v36 = vshll.u32 %v8339_v61, 16  ;;  %v8363_v30 = vld [vmem:[%s7420_s27 + $0x64] sm:$0xf] }
 0x188   : > { %6317 = vmatmul.mubr.msk.bf16.gmra.mrb[16].mxu0 %vm865_vm4, %v6844_v48  ;;  %v3892_v48 = vrot.slane %v3890_v60, 5  ;;  %v3913_v60 = vrot.slane %v3911_v59, 4  ;;  %9299 = vst [vmem:[#allocation32_spill] sm:$0xff] %v8363_v30  ;;  %v3903_v57 = vor.u32 %v3902_v17, %v8341_v39  ;;  %v1384_v16 = vld [vmem:[%s7420_s27 + $0xb4] sm:$0xe]  ;;  %v8369_v12 = vrot.slane %v3869_v15, 4 }
 0x189   : > { %6165 = vmatmul.mubr.msk.bf16.vlgmr.msra.gmra.mrb[0].mxu1 %vm865_vm4, %v9297_v35  ;;  %6320 = vmatprep.mubr.msk.bf16.mxu0 %vm865_vm4, %v6845_v47  ;;  %v6846_v47 = vld [vmem:[%s7420_s27 + $0xb4] sm:$0xff]   ;;  %v3926_v35 = vrot.slane %v3924_v11, 4  ;;  %v1515_v11 = vrot.slane %v6900_v20, 5  ;;  %v3930_v1 = vshll.u32 %v8349_v9, 16  ;;  %v9300_v20 = vcombine.low %v8109_v26, %v8116_v50 }
 0x18a   : > { %6197 = vmatpush3.bf16.msra.mxu1 %v8094_v44  ;;  %6168 = vmatprep.mubr.msk.bf16.mxu1 %vm865_vm4, %v9298_v21  ;;  %v5464_v44 = vrot.slane %v8319_v49, 9  ;;  %v5790_v21 = vld [vmem:[%s7420_s27 + $0x60] sm:$0xf]  ;;  %v3879_v49 = vor.u32 %v3878_v37, %v8330_v19  ;;  %v3893_v59 = vor.u32 %v3892_v48, %v3889_v43  ;;  %v3917_v0 = vor.u32 %v3916_v24, %v3913_v60 }
 0x18b   : > { %6683 = vmatprep.subr.msk.bf16.mxu1 %vm914_vm0, %v6898_v45  ;;  %v6899_v45 = vld [vmem:[%s7420_s27 + $0xb0] sm:$0x1]  ;;  %v3935_v46 = vshrl.u32 %v5790_v21, 16  ;;  %v3938_v37 = vshll.u32 %v5790_v21, 16  ;;  %v3927_v4 = vor.u32 %v3926_v35, %v8352_v29  ;;  %v3944_v43 = vshll.u32 %v8363_v30, 16 }
 0x18c   : > { %v1511_v32 = vrot.slane %v6899_v45, 5  ;;  %v3948_v48 = vshrl.u32 %v8363_v30, 16  ;;  %v3880_v17 = vrot.slane %v3879_v49, 4  ;;  %v1510_v15 = vrot.slane %v1508_v5, 4 }
 0x18d   : > { %v5465_v60 = vrot.slane %v1384_v16, 9  ;;  %v9301_v24 = vcombine.low %v8120_v23, %v8126_v56  ;;  %v3894_v35 = vrot.slane %v3893_v59, 4  ;;  %v3904_v21 = vrot.slane %v3903_v57, 4  ;;  %v6849_v57 = vld [vmem:[%s7420_s27 + $0xd8] sm:$0xff]  }
 0x18e   : > { %v1517_v45 = vrot.slane %v1515_v11, 4  ;;  %v1518_v26 = vrot.slane %v6901_v2, 5  ;;  %v3932_v50 = vrot.slane %v3930_v1, 5  ;;  %v3937_v40 = vrot.slane %v3935_v46, 4 }
 0x18f   : > { %v3940_v30 = vrot.slane %v3938_v37, 5  ;;  %v3918_v16 = vrot.slane %v3917_v0, 4  ;;  %v3928_v23 = vrot.slane %v3927_v4, 4  ;;  %v8389_v56 = vrot.slane %v3944_v43, 5  ;;  %v8408_v37 = vld [vmem:[%s7420_s27 + $0x68] sm:$0x1] }
 0x190   : > { %6321 = vmatmul.mubr.msk.bf16.gmra.mrb[20].mxu0 %vm865_vm4, %v6846_v47  ;;  %v3908_v47 = vrot.slane %v3906_v36, 5  ;;  %v6848_v36 = vld [vmem:[%s7420_s27 + $0xcc] sm:$0xff]   ;;  %v3950_v59 = vrot.slane %v3948_v48, 4  ;;  %v3875_v2 = vsel %vm7467_vm3, %v8369_v12, %v8330_v19  ;;  %v3885_v1 = vsel %vm7467_vm3, %v3880_v17, %v8359_v51  ;;  %9302 = vst [vmem:[#allocation33_spill] sm:$0xff] %v8408_v37  ;;  %v6903_v48 = vld [vmem:[%s7420_s27 + $0xc8] sm:$0x1] }
 0x191   : > { %6169 = vmatmul.mubr.msk.bf16.gmra.mrb[4].mxu1 %vm865_vm4, %v9300_v20  ;;  %6324 = vmatprep.mubr.msk.bf16.mxu0 %vm865_vm4, %v6847_v62  ;;  %v1385_v20 = vld [vmem:[%s7420_s27 + $0xc0] sm:$0xe]  ;;  %v6902_v62 = vld [vmem:[%s7420_s27 + $0xc4] sm:$0xf]  ;;  %v8401_v46 = vsel %vm7691_vm7, %v5464_v44, %v1508_v5  ;;  %v8405_v4 = vsel %vm7691_vm7, %v1510_v15, %v1511_v32  ;;  %v3899_v0 = vsel %vm7467_vm3, %v3894_v35, %v8341_v39  ;;  %v1386_v44 = vld [vmem:[%s7420_s27 + $0xcc] sm:$0xe] }
 0x192   : > { %6172 = vmatprep.mubr.msk.bf16.mxu1 %vm865_vm4, %v9301_v24  ;;  %v1522_v49 = vrot.slane %v6902_v62, 5  ;;  %v8415_v12 = vsel %vm7691_vm7, %v5465_v60, %v1515_v11  ;;  %v8419_v19 = vsel %vm7691_vm7, %v1517_v45, %v1518_v26  ;;  %v5466_v51 = vrot.slane %v1385_v20, 9  ;;  %v5793_v5 = vld [vmem:[%s7420_s27 + $0x6c] sm:$0xf]  ;;  %v8443_v35 = vld [vmem:[%s7420_s27 + $0x70] sm:$0xf] }
 0x193   : > { %9303 = vst [vmem:[#allocation34_spill] sm:$0xff] %v8419_v19  ;;  %v3909_v32 = vsel %vm7467_vm3, %v3904_v21, %v3908_v47  ;;  %v1525_v17 = vrot.slane %v6903_v48, 5  ;;  %v3941_v39 = vor.u32 %v3940_v30, %v3937_v40  ;;  %v3923_v11 = vsel %vm7467_vm3, %v3918_v16, %v8352_v29  ;;  %9305 = vst [vmem:[#allocation35_spill] sm:$0xff] %v8443_v35  ;;  %v5796_v20 = vld [vmem:[%s7420_s27 + $0x90] sm:$0xf] }
 0x194   : > { %v1524_v43 = vrot.slane %v1522_v49, 4  ;;  %v3933_v15 = vsel %vm7467_vm3, %v3928_v23, %v3932_v50  ;;  %v3951_v60 = vor.u32 %v3950_v59, %v8389_v56  ;;  %v3954_v47 = vshll.u32 %v8408_v37, 16  ;;  %v8462_v62 = vld [vmem:[%s7420_s27 + $0x94] sm:$0xf]  ;;  %v5799_v23 = vld [vmem:[%s7420_s27 + $0x9c] sm:$0xf] }
 0x195   : > { %v9304_v24 = vcombine.low %v8130_v3, %v8134_v6  ;;  %v5467_v30 = vrot.slane %v1386_v44, 9  ;;  %v1529_v29 = vrot.slane %v7851_v25, 5  ;;  %v3959_v21 = vshrl.u32 %v5793_v5, 16  ;;  %v6850_v3 = vld [vmem:[%s7420_s27 + $0xe4] sm:$0xff]   ;;  %9307 = vst [vmem:[#allocation36_spill] sm:$0xff] %v8462_v62 }
 0x196   : > { %v9306_v45 = vcombine.low %v8156_v34, %v8164_v7  ;;  %v8450_v6 = vcombine.low %v3875_v2, %v3885_v1  ;;  %v8452_v26 = vcombine.low %v3899_v0, %v3909_v32  ;;  %v8458_v25 = vsel %vm7691_vm7, %v5466_v51, %v1522_v49  ;;  %v8475_v59 = vld [vmem:[%s7420_s27 + $0xa0] sm:$0xf]  ;;  %v5802_v0 = vld [vmem:[%s7420_s27 + $0xa8] sm:$0xf]  ;;  %v8491_v48 = vld [vmem:[%s7420_s27 + $0xac] sm:$0xf] }
 0x197   : > { %v8464_v34 = vcombine.low %v3923_v11, %v3933_v15  ;;  %v8468_v7 = vsel %vm7691_vm7, %v1524_v43, %v1525_v17  ;;  %9308 = vst [vmem:[#allocation37_spill] sm:$0xff] %v8475_v59  ;;  %v8479_v49 = vrot.slane %v3954_v47, 5  ;;  %v3962_v2 = vshll.u32 %v5793_v5, 16  ;;  %9309 = vst [vmem:[#allocation38_spill] sm:$0xff] %v8491_v48  ;;  %v8516_v16 = vld [vmem:[%s7420_s27 + $0x98] sm:$0x1] }
 0x198   : > { %6325 = vmatmul.mubr.msk.bf16.gmra.mrb[24].mxu0 %vm865_vm4, %v6848_v36  ;;  %v8470_v36 = vrot.slane %v3941_v39, 4  ;;  %v3968_v1 = vshll.u32 %v8443_v35, 16  ;;  %v8485_v51 = vsel %vm7691_vm7, %v5467_v30, %v1529_v29  ;;  %v8487_v44 = vrot.slane %v1529_v29, 4  ;;  %v8499_v30 = vld [vmem:[%s7420_s27 + $0x74] sm:$0x1] }
 0x199   : > { %6173 = vmatmul.mubr.msk.bf16.gmra.mrb[8].mxu1 %vm865_vm4, %v9304_v24  ;;  %6328 = vmatprep.mubr.msk.bf16.mxu0 %vm865_vm4, %v6849_v57  ;;  %v8477_v57 = vrot.slane %v3951_v60, 4  ;;  %v3961_v32 = vrot.slane %v3959_v21, 4  ;;  %v3972_v43 = vshrl.u32 %v8443_v35, 16  ;;  %v3983_v17 = vshrl.u32 %v5796_v20, 16 }
 0x19a   : > { %6176 = vmatprep.mubr.msk.bf16.mxu1 %vm865_vm4, %v9306_v45  ;;  %v3986_v39 = vshll.u32 %v5796_v20, 16  ;;  %v3992_v11 = vshll.u32 %v8462_v62, 16  ;;  %v3996_v5 = vshrl.u32 %v8462_v62, 16  ;;  %v4007_v15 = vshrl.u32 %v5799_v23, 16 }
 0x19b   : > { %v4010_v60 = vshll.u32 %v5799_v23, 16  ;;  %v4016_v47 = vshll.u32 %v8475_v59, 16  ;;  %v4020_v24 = vshrl.u32 %v8475_v59, 16  ;;  %v4031_v29 = vshrl.u32 %v5802_v0, 16  ;;  %v5805_v59 = vld [vmem:[%s7420_s27 + $0xb4] sm:$0xf] }
 0x19c   : > { %v4034_v21 = vshll.u32 %v5802_v0, 16  ;;  %v4040_v45 = vshll.u32 %v8491_v48, 16  ;;  %v4044_v20 = vshrl.u32 %v8491_v48, 16  ;;  %v9310_v50 = vcombine.low %v8184_v28, %v8201_v8 }
 0x19d   : > { %v3964_v23 = vrot.slane %v3962_v2, 5  ;;  %v8513_v0 = vrot.slane %v3968_v1, 5  ;;  %v3974_v40 = vrot.slane %v3972_v43, 4  ;;  %v9311_v48 = vcombine.low %v8224_v58, %v8228_v18 }
 0x19e   : > { %v3985_v28 = vrot.slane %v3983_v17, 4  ;;  %v3988_v8 = vrot.slane %v3986_v39, 5  ;;  %v4009_v2 = vrot.slane %v4007_v15, 4  ;;  %v4012_v1 = vrot.slane %v4010_v60, 5 }
 0x19f   : > { %v8528_v43 = vrot.slane %v4016_v47, 5  ;;  %v4022_v62 = vrot.slane %v4020_v24, 4  ;;  %v4033_v35 = vrot.slane %v4031_v29, 4  ;;  %v4036_v37 = vrot.slane %v4034_v21, 5 }
 0x1a0   : > { %6329 = vmatmul.mubr.msk.bf16.gmra.mrb[28].mxu0 %vm865_vm4, %v6850_v3  ;;  %v8526_v3 = vld [vmem:[%s7420_s27 + $0xa4] sm:$0x1]  ;;  %v8530_v58 = vrot.slane %v4040_v45, 5  ;;  %v4046_v18 = vrot.slane %v4044_v20, 4  ;;  %v3965_v17 = vor.u32 %v3964_v23, %v3961_v32  ;;  %v3978_v39 = vshll.u32 %v8499_v30, 16 }
 0x1a1   : > { %6177 = vmatmul.mubr.msk.bf16.gmra.mrb[12].mxu1 %vm865_vm4, %v9310_v50  ;;  %6334 = vmatprep.mubr.msk.bf16.mxu0 %vm865_vm4, %v8288_v53  ;;  %v8522_v53 = vrot.slane %v3992_v11, 5  ;;  %v3998_v50 = vrot.slane %v3996_v5, 4  ;;  %v8537_v11 = vld [vmem:[%s7420_s27 + $0xb0] sm:$0x1]  ;;  %v4055_v5 = vshrl.u32 %v5805_v59, 16  ;;  %v4058_v19 = vshll.u32 %v5805_v59, 16 }
 0x1a2   : > { %6180 = vmatprep.mubr.msk.bf16.mxu1 %vm865_vm4, %v9311_v48  ;;  %v8533_v48 = vld [vmem:[%s7420_s27 + $0xb8] sm:$0xf]  ;;  %v3975_v15 = vor.u32 %v3974_v40, %v8513_v0  ;;  %v3989_v60 = vor.u32 %v3988_v8, %v3985_v28  ;;  %v4002_v24 = vshll.u32 %v8516_v16, 16  ;;  %v4013_v29 = vor.u32 %v4012_v1, %v4009_v2 }
 0x1a3   : > { %v3999_v47 = vor.u32 %v3998_v50, %v8522_v53  ;;  %v4026_v21 = vshll.u32 %v8526_v3, 16  ;;  %v4064_v45 = vshll.u32 %v8533_v48, 16  ;;  %v4068_v32 = vshrl.u32 %v8533_v48, 16 }
 0x1a4   : > { %v4023_v20 = vor.u32 %v4022_v62, %v8528_v43  ;;  %v4037_v59 = vor.u32 %v4036_v37, %v4033_v35  ;;  %v4047_v40 = vor.u32 %v4046_v18, %v8530_v58  ;;  %v4050_v23 = vshll.u32 %v8537_v11, 16  ;;  %v5808_v62 = vld [vmem:[%s7420_s27 + $0xc0] sm:$0xf] }
 0x1a5   : > { %v9312_v28 = vcombine.low %v8232_v63, %v8240_v27  ;;  %v3966_v8 = vrot.slane %v3965_v17, 4  ;;  %v3980_v50 = vrot.slane %v3978_v39, 5  ;;  %v4057_v2 = vrot.slane %v4055_v5, 4 }
 0x1a6   : > { %v4060_v1 = vrot.slane %v4058_v19, 5  ;;  %v3976_v37 = vrot.slane %v3975_v15, 4  ;;  %v3990_v63 = vrot.slane %v3989_v60, 4  ;;  %v4000_v27 = vrot.slane %v3999_v47, 4  ;;  %v8572_v60 = vld [vmem:[%s7420_s27 + $0xc4] sm:$0xf] }
 0x1a7   : > { %v4004_v35 = vrot.slane %v4002_v24, 5  ;;  %v4028_v18 = vrot.slane %v4026_v21, 5  ;;  %v8562_v17 = vrot.slane %v4064_v45, 5  ;;  %v4070_v19 = vrot.slane %v4068_v32, 4 }
 0x1a8   : > { %6335 = vmatmul.mubr.msk.bf16.vlgmr.msra.gmra.mrb[0].mxu0 %vm865_vm4, %v8290_v54  ;;  %v9313_v54 = vcombine.low %v8251_v13, %v8264_v10  ;;  %v4024_v39 = vrot.slane %v4023_v20, 4  ;;  %v4038_v5 = vrot.slane %v4037_v59, 4  ;;  %v4048_v13 = vrot.slane %v4047_v40, 4  ;;  %v8606_v40 = vld [vmem:[%s7420_s27 + $0xc8] sm:$0x1] }
 0x1a9   : > { %6181 = vmatmul.mubr.msk.bf16.gmra.mrb[16].mxu1 %vm865_vm4, %v9312_v28  ;;  %6367 = vmatpush3.bf16.msra.mxu0 %v8277_v42  ;;  %v4014_v42 = vrot.slane %v4013_v29, 4  ;;  %v4052_v10 = vrot.slane %v4050_v23, 5  ;;  %v8565_v28 = vld [vmem:[%s7420_s27 + $0xbc] sm:$0x1]  ;;  %v4061_v15 = vor.u32 %v4060_v1, %v4057_v2  ;;  %v4079_v47 = vshrl.u32 %v5808_v62, 16 }
 0x1aa   : > { %6184 = vmatprep.mubr.msk.bf16.mxu1 %vm865_vm4, %v9313_v54  ;;  %6338 = vmatprep.mubr.msk.bf16.mxu0 %vm865_vm4, %v8356_v52  ;;  %v3957_v52 = vsel %vm7467_vm3, %v8477_v57, %v8479_v49  ;;  %v4082_v24 = vshll.u32 %v5808_v62, 16  ;;  %v9314_v29 = vrot.slane %v7857_v55, 5  ;;  %v3971_v45 = vsel %vm7467_vm3, %v3966_v8, %v8513_v0  ;;  %v8617_v2 = vld [vmem:[%s7420_s27 + $0xcc] sm:$0xf] }
 0x1ab   : > { %v3981_v57 = vsel %vm7467_vm3, %v3976_v37, %v3980_v50  ;;  %v3995_v49 = vsel %vm7467_vm3, %v3990_v63, %v8522_v53  ;;  %v4005_v32 = vsel %vm7467_vm3, %v4000_v27, %v4004_v35  ;;  %v4019_v55 = vsel %vm7467_vm3, %v4014_v42, %v8528_v43  ;;  %v5856_v63 = vld [vmem:[%s7420_s27 + $0x48] sm:$0xe] }
 0x1ac   : > { %v8579_v21 = vsel %vm7691_vm7, %v8487_v44, %v9314_v29  ;;  %v4071_v44 = vor.u32 %v4070_v19, %v8562_v17  ;;  %v4074_v20 = vshll.u32 %v8565_v28, 16  ;;  %v4029_v0 = vsel %vm7467_vm3, %v4024_v39, %v4028_v18 }
 0x1ad   : > { %v4043_v53 = vsel %vm7467_vm3, %v4038_v5, %v8530_v58  ;;  %v4053_v59 = vsel %vm7467_vm3, %v4048_v13, %v4052_v10  ;;  %v4088_v43 = vshll.u32 %v8572_v60, 16  ;;  %v9315_v23 = vcombine.low %v8298_v38, %v8315_v14 }
 0x1ae   : > { %v4081_v8 = vrot.slane %v4079_v47, 4  ;;  %v4084_v58 = vrot.slane %v4082_v24, 5  ;;  %v4092_v50 = vshrl.u32 %v8572_v60, 16  ;;  %v9316_v1 = vcombine.low %v8401_v46, %v8405_v4  ;;  %v5858_v47 = vld [vmem:[%s7420_s27 + $0x60] sm:$0xe] }
 0x1af   : > { %v5482_v38 = vcombine.low %v8458_v25, %v8468_v7  ;;  %v9317_v14 = vsel %vm7467_vm3, %v8470_v36, %v8389_v56  ;;  %v5483_v54 = vcombine.low %v8485_v51, %v8579_v21  ;;  %v8632_v37 = vcombine.low %v3971_v45, %v3981_v57  ;;  %v5857_v25 = vld [vmem:[%s7420_s27 + $0x54] sm:$0xe]  ;;  %v8646_v36 = vld [vmem:[%s7420_s27 + $0xd0] sm:$0xf] }
 0x1b0   : > { %6339 = vmatmul.mubr.msk.bf16.gmra.mrb[4].mxu0 %vm865_vm4, %v8450_v6  ;;  %v4062_v6 = vrot.slane %v4061_v15, 4  ;;  %v8635_v27 = vcombine.low %v3995_v49, %v4005_v32  ;;  %v4072_v46 = vrot.slane %v4071_v44, 4  ;;  %v4076_v4 = vrot.slane %v4074_v20, 5  ;;  %v5859_v32 = vld [vmem:[%s7420_s27 + $0x6c] sm:$0xe] }
 0x1b1   : > { %6185 = vmatmul.mubr.msk.bf16.gmra.mrb[20].mxu1 %vm865_vm4, %v9315_v23  ;;  %6342 = vmatprep.mubr.msk.bf16.mxu0 %vm865_vm4, %v8452_v26  ;;  %v5826_v26 = vcombine.low %v9317_v14, %v3957_v52  ;;  %v4098_v35 = vshll.u32 %v8606_v40, 16  ;;  %v8639_v7 = vcombine.low %v4019_v55, %v4029_v0  ;;  %v8641_v62 = vcombine.low %v4043_v53, %v4053_v59  ;;  %v9318_v55 = vld [vmem:[#allocation34_spill] sm:$0xff]  ;;  %v9320_v53 = vld [vmem:[#allocation32_spill] sm:$0xff]  ;;  %v9324_v21 = vld [vmem:[#allocation27_spill] sm:$0xff] }
 0x1b2   : > { %6188 = vmatprep.mubr.msk.bf16.mxu1 %vm865_vm4, %v9316_v1  ;;  %v8643_v56 = vrot.slane %v4088_v43, 5  ;;  %v4103_v42 = vshrl.u32 %v8617_v2, 16  ;;  %v4067_v18 = vsel %vm7467_vm3, %v4062_v6, %v8562_v17  ;;  %v4085_v19 = vor.u32 %v4084_v58, %v4081_v8  ;;  %v9321_v43 = vld [vmem:[#allocation33_spill] sm:$0xff]  ;;  %v8692_v6 = vld [vmem:[%s7420_s27 + $0xd4] sm:$0x1] }
 0x1b3   : > { %v4094_v39 = vrot.slane %v4092_v50, 4  ;;  %v4106_v5 = vshll.u32 %v8617_v2, 16  ;;  %v5872_v13 = vrot.slane %v5856_v63, 9  ;;  %v4562_v10 = vrot.slane %v8285_v41, 5  ;;  %v9322_v2 = vld [vmem:[#allocation35_spill] sm:$0xff] }
 0x1b4   : > { %v4565_v52 = vrot.slane %v8339_v61, 5  ;;  %v5873_v15 = vrot.slane %v5857_v25, 9  ;;  %v4077_v24 = vsel %vm7467_vm3, %v4072_v46, %v4076_v4  ;;  %v8658_v29 = vrot.slane %v4098_v35, 5  ;;  %v8713_v25 = vld [vmem:[%s7420_s27 + $0xdc] sm:$0xf] }
 0x1b5   : > { %v4112_v45 = vshll.u32 %v8646_v36, 16  ;;  %v4569_v17 = vrot.slane %v8303_v33, 5  ;;  %v8664_v57 = vrot.slane %v4103_v42, 4  ;;  %v8668_v41 = vsel %vm7691_vm7, %v5872_v13, %v4562_v10 }
 0x1b6   : > { %v4564_v61 = vrot.slane %v4562_v10, 4  ;;  %v4572_v49 = vrot.slane %v8349_v9, 5  ;;  %v9319_v44 = vcombine.low %v8415_v12, %v9318_v55  ;;  %v8677_v33 = vrot.slane %v4085_v19, 4  ;;  %v5861_v55 = vld [vmem:[%s7420_s27 + $0x9c] sm:$0xe] }
 0x1b7   : > { %v4571_v20 = vrot.slane %v4569_v17, 4  ;;  %v5874_v0 = vrot.slane %v5858_v47, 9  ;;  %v4095_v9 = vor.u32 %v4094_v39, %v8643_v56  ;;  %v4576_v59 = vrot.slane %v9320_v53, 5  ;;  %v6851_v39 = vld [vmem:[%s7420_s27 + $0xc] sm:$0xff]  }
 0x1b8   : > { %6343 = vmatmul.mubr.msk.bf16.gmra.mrb[8].mxu0 %vm865_vm4, %v8464_v34  ;;  %v8681_v34 = vsel %vm7691_vm7, %v5873_v15, %v4569_v17  ;;  %v8687_v12 = vsel %vm7691_vm7, %v4564_v61, %v4565_v52  ;;  %v4579_v23 = vrot.slane %v9321_v43, 5  ;;  %v5875_v50 = vrot.slane %v5859_v32, 9  ;;  %v5860_v52 = vld [vmem:[%s7420_s27 + $0x90] sm:$0xe] }
 0x1b9   : > { %6189 = vmatmul.mubr.msk.bf16.gmra.mrb[24].mxu1 %vm865_vm4, %v9319_v44  ;;  %6346 = vmatprep.mubr.msk.bf16.mxu0 %vm865_vm4, %v5826_v26  ;;  %v5888_v8 = vcombine.low %v8668_v41, %v8687_v12  ;;  %v8698_v58 = vsel %vm7691_vm7, %v4571_v20, %v4572_v49  ;;  %v4583_v1 = vrot.slane %v9322_v2, 5  ;;  %v8706_v26 = vsel %vm7691_vm7, %v5874_v0, %v4576_v59 }
 0x1ba   : > { %6192 = vmatprep.mubr.msk.bf16.mxu1 %vm865_vm4, %v5482_v38  ;;  %v5814_v38 = vld [vmem:[%s7420_s27 + $0xd8] sm:$0xf]  ;;  %v5889_v14 = vcombine.low %v8681_v34, %v8698_v58  ;;  %v4578_v63 = vrot.slane %v4576_v59, 4  ;;  %v4586_v46 = vrot.slane %v8499_v30, 5  ;;  %v8709_v4 = vcombine.low %v4067_v18, %v4077_v24  ;;  %v6914_v58 = vld [vmem:[%s7420_s27 + $0xa4] sm:$0x1] }
 0x1bb   : > { %v4116_v35 = vshrl.u32 %v8646_v36, 16  ;;  %v8717_v42 = vsel %vm7691_vm7, %v5875_v50, %v4583_v1  ;;  %v4585_v19 = vrot.slane %v4583_v1, 4  ;;  %v8720_v13 = vrot.slane %v4106_v5, 5  ;;  %v5817_v1 = vld [vmem:[%s7420_s27 + $0xe4] sm:$0xf] }
 0x1bc   : > { %v8722_v10 = vrot.slane %v4112_v45, 5  ;;  %v4122_v30 = vshll.u32 %v8692_v6, 16  ;;  %v8727_v18 = vsel %vm7691_vm7, %v4578_v63, %v4579_v23  ;;  %v4091_v15 = vsel %vm7467_vm3, %v8677_v33, %v8643_v56  ;;  %v5591_v45 = vld [vmem:[%s7420_s27 + $0x90] sm:$0xf] }
 0x1bd   : > { %v4127_v47 = vshrl.u32 %v5814_v38, 16  ;;  %v5890_v24 = vcombine.low %v8706_v26, %v8727_v18  ;;  %v8738_v5 = vsel %vm7691_vm7, %v4585_v19, %v4586_v46  ;;  %v4096_v17 = vrot.slane %v4095_v9, 4  ;;  %v9326_v46 = vld [vmem:[#allocation37_spill] sm:$0xff] }
 0x1be   : > { %v4130_v61 = vshll.u32 %v5814_v38, 16  ;;  %v4136_v49 = vshll.u32 %v8713_v25, 16  ;;  %v5891_v32 = vcombine.low %v8717_v42, %v8738_v5  ;;  %v4118_v44 = vrot.slane %v4116_v35, 4  ;;  %v6852_v19 = vld [vmem:[%s7420_s27 + $0x18] sm:$0xff]   ;;  %v6917_v5 = vld [vmem:[%s7420_s27 + $0xc4] sm:$0xf] }
 0x1bf   : > { %v5876_v20 = vrot.slane %v5860_v52, 9  ;;  %v4593_v9 = vrot.slane %v8516_v16, 5  ;;  %v4140_v53 = vshrl.u32 %v8713_v25, 16  ;;  %v2452_v59 = vshrl.u32 %v5591_v45, 16 }
 0x1c0   : > { %6347 = vmatmul.mubr.msk.bf16.gmra.mrb[12].mxu0 %vm865_vm4, %v8632_v37  ;;  %v9323_v37 = vld [vmem:[#allocation36_spill] sm:$0xff]  ;;  %v2455_v51 = vshll.u32 %v5591_v45, 16  ;;  %v5877_v16 = vrot.slane %v5861_v55, 9  ;;  %v4132_v2 = vrot.slane %v4130_v61, 5  ;;  %v4597_v35 = vrot.slane %v9326_v46, 5 }
 0x1c1   : > { %6193 = vmatmul.mubr.msk.bf16.gmra.mrb[28].mxu1 %vm865_vm4, %v5483_v54  ;;  %6350 = vmatprep.mubr.msk.bf16.mxu0 %vm865_vm4, %v8635_v27  ;;  %v4590_v0 = vrot.slane %v9323_v37, 5  ;;  %v9325_v54 = vld [vmem:[#allocation28_spill] sm:$0xff]  ;;  %v4129_v27 = vrot.slane %v4127_v47, 4  ;;  %v2454_v38 = vrot.slane %v2452_v59, 4  ;;  %v8770_v52 = vrot.slane %v4136_v49, 5 }
 0x1c2   : > { %6198 = vmatprep.mubr.msk.bf16.mxu1 %vm865_vm4, %v6851_v39  ;;  %v2474_v43 = vsel %vm7467_vm3, %v9325_v54, %v9324_v21  ;;  %v2457_v63 = vrot.slane %v2455_v51, 5  ;;  %v4109_v39 = vor.u32 %v8720_v13, %v8664_v57  ;;  %v8773_v47 = vld [vmem:[%s7420_s27 + $0xe8] sm:$0xf]  ;;  %v4600_v61 = vrot.slane %v8526_v3, 5  ;;  %v8789_v59 = vld [vmem:[%s7420_s27 + $0xe0] sm:$0x1] }
 0x1c3   : > { %v8763_v23 = vsel %vm7691_vm7, %v5876_v20, %v4590_v0  ;;  %v4592_v50 = vrot.slane %v4590_v0, 4  ;;  %v6853_v55 = vld [vmem:[%s7420_s27 + $0x24] sm:$0xff]   ;;  %v4101_v20 = vsel %vm7467_vm3, %v4096_v17, %v8658_v29  ;;  %v4142_v37 = vrot.slane %v4140_v53, 4 }
 0x1c4   : > { %v2458_v57 = vor.u32 %v2457_v63, %v2454_v38  ;;  %v5862_v13 = vld [vmem:[%s7420_s27 + $0xa8] sm:$0xe]  ;;  %v4119_v49 = vor.u32 %v4118_v44, %v8722_v10  ;;  %v4151_v51 = vshrl.u32 %v5817_v1, 16  ;;  %v4599_v3 = vrot.slane %v4597_v35, 4 }
 0x1c5   : > { %v8777_v45 = vsel %vm7691_vm7, %v4592_v50, %v4593_v9  ;;  %v8793_v9 = vsel %vm7691_vm7, %v5877_v16, %v4597_v35  ;;  %v4133_v29 = vor.u32 %v4132_v2, %v4129_v27  ;;  %v4154_v17 = vshll.u32 %v5817_v1, 16  ;;  %v9328_v16 = vld [vmem:[#allocation25_spill] sm:$0xff]  ;;  %v9329_v38 = vld [vmem:[#allocation26_spill] sm:$0xff] }
 0x1c6   : > { %v5892_v0 = vcombine.low %v8763_v23, %v8777_v45  ;;  %v4160_v53 = vshll.u32 %v8773_v47, 16  ;;  %v2459_v21 = vrot.slane %v2458_v57, 4  ;;  %v4164_v44 = vshrl.u32 %v8773_v47, 16  ;;  %v8827_v57 = vld [vmem:[%s7420_s27 + $0xec] sm:$0x1] }
 0x1c7   : > { %v8804_v54 = vsel %vm7691_vm7, %v4599_v3, %v4600_v61  ;;  %v5878_v50 = vrot.slane %v5862_v13, 9  ;;  %v4143_v2 = vor.u32 %v4142_v37, %v8770_v52  ;;  %v4146_v1 = vshll.u32 %v8789_v59, 16  ;;  %v6918_v45 = vld [vmem:[%s7420_s27 + $0xd0] sm:$0xf] }
 0x1c8   : > { %6351 = vmatmul.mubr.msk.bf16.gmra.mrb[16].mxu0 %vm865_vm4, %v8639_v7  ;;  %v9327_v7 = vld [vmem:[#allocation38_spill] sm:$0xff]  ;;  %v5893_v63 = vcombine.low %v8793_v9, %v8804_v54  ;;  %v5832_v46 = vcombine.low %v4091_v15, %v4101_v20  ;;  %v4110_v35 = vrot.slane %v4109_v39, 4  ;;  %v4120_v37 = vrot.slane %v4119_v49, 4 }
 0x1c9   : > { %6199 = vmatmul.mubr.msk.bf16.vlgmr.msra.gmra.mrb[0].mxu1 %vm865_vm4, %v6852_v19  ;;  %6354 = vmatprep.mubr.msk.bf16.mxu0 %vm865_vm4, %v8641_v62  ;;  %v4604_v27 = vrot.slane %v9327_v7, 5  ;;  %v2464_v62 = vsel %vm7467_vm3, %v2459_v21, %v9329_v38  ;;  %v4124_v19 = vrot.slane %v4122_v30, 5  ;;  %v4607_v21 = vrot.slane %v8537_v11, 5  ;;  %v5863_v20 = vld [vmem:[%s7420_s27 + $0xb4] sm:$0xe]  ;;  %v6855_v30 = vld [vmem:[%s7420_s27 + $0x3c] sm:$0xff]  }
 0x1ca   : > { %6421 = vmatpush3.bf16.msra.mxu1 %v9328_v16  ;;  %6202 = vmatprep.mubr.msk.bf16.mxu1 %vm865_vm4, %v6853_v55  ;;  %v8823_v61 = vcombine.low %v2464_v62, %v2474_v43  ;;  %v6854_v55 = vld [vmem:[%s7420_s27 + $0x30] sm:$0xff]   ;;  %v4153_v56 = vrot.slane %v4151_v51, 4  ;;  %v4156_v33 = vrot.slane %v4154_v17, 5  ;;  %v8834_v15 = vrot.slane %v4160_v53, 5  ;;  %v6904_v38 = vld [vmem:[%s7420_s27 + $0x1c] sm:$0xf] }
 0x1cb   : > { %v8831_v13 = vsel %vm7691_vm7, %v5878_v50, %v4604_v27  ;;  %v4606_v3 = vrot.slane %v4604_v27, 4  ;;  %v4166_v39 = vrot.slane %v4164_v44, 4  ;;  %v4134_v43 = vrot.slane %v4133_v29, 4 }
 0x1cc   : > { %v4144_v7 = vrot.slane %v4143_v2, 4  ;;  %v4148_v49 = vrot.slane %v4146_v1, 5  ;;  %v4115_v11 = vsel %vm7467_vm3, %v4110_v35, %v8722_v10  ;;  %v4125_v51 = vsel %vm7467_vm3, %v4120_v37, %v4124_v19  ;;  %v5864_v35 = vld [vmem:[%s7420_s27 + $0xc0] sm:$0xe]  ;;  %v6856_v37 = vld [vmem:[%s7420_s27 + $0x48] sm:$0xff]  }
 0x1cd   : > { %v8840_v16 = vsel %vm7691_vm7, %v4606_v3, %v4607_v21  ;;  %v4170_v29 = vshll.u32 %v8827_v57, 16  ;;  %v5879_v17 = vrot.slane %v5863_v20, 9  ;;  %v4157_v53 = vor.u32 %v4156_v33, %v4153_v56  ;;  %v6857_v33 = vld [vmem:[%s7420_s27 + $0x54] sm:$0xff]   ;;  %v6905_v20 = vld [vmem:[%s7420_s27 + $0x20] sm:$0x1] }
 0x1ce   : > { %v5894_v50 = vcombine.low %v8831_v13, %v8840_v16  ;;  %v4167_v44 = vor.u32 %v4166_v39, %v8834_v15  ;;  %v4611_v27 = vrot.slane %v8533_v48, 5  ;;  %v4614_v10 = vrot.slane %v8565_v28, 5 }
 0x1cf   : > { %v4139_v2 = vsel %vm7467_vm3, %v4134_v43, %v8770_v52  ;;  %v4149_v1 = vsel %vm7467_vm3, %v4144_v7, %v4148_v49  ;;  %v4534_v62 = vrot.slane %v6904_v38, 5  ;;  %v5833_v28 = vcombine.low %v4115_v11, %v4125_v51  ;;  %v5853_v11 = vld [vmem:[%s7420_s27 + $0x24] sm:$0xe]  ;;  %v6906_v51 = vld [vmem:[%s7420_s27 + $0x28] sm:$0xf] }
 0x1d0   : > { %6355 = vmatmul.mubr.msk.bf16.gmra.mrb[20].mxu0 %vm865_vm4, %v8709_v4  ;;  %v5852_v4 = vld [vmem:[%s7420_s27 + $0x18] sm:$0xe]  ;;  %v4613_v48 = vrot.slane %v4611_v27, 4  ;;  %v4172_v19 = vrot.slane %v4170_v29, 5  ;;  %v5834_v3 = vcombine.low %v4139_v2, %v4149_v1  ;;  %v4158_v52 = vrot.slane %v4157_v53, 4 }
 0x1d1   : > { %6203 = vmatmul.mubr.msk.bf16.gmra.mrb[4].mxu1 %vm865_vm4, %v6854_v55  ;;  %6358 = vmatprep.mubr.msk.bf16.mxu0 %vm865_vm4, %v5832_v46  ;;  %v8867_v46 = vsel %vm7691_vm7, %v5879_v17, %v4611_v27  ;;  %v5868_v55 = vrot.slane %v5852_v4, 9  ;;  %v4168_v21 = vrot.slane %v4167_v44, 4  ;;  %v4536_v39 = vrot.slane %v4534_v62, 4  ;;  %v5865_v2 = vld [vmem:[%s7420_s27 + $0xcc] sm:$0xe] }
 0x1d2   : > { %6206 = vmatprep.mubr.msk.bf16.mxu1 %vm865_vm4, %v6855_v30  ;;  %v8873_v56 = vsel %vm7691_vm7, %v4613_v48, %v4614_v10  ;;  %v4537_v30 = vrot.slane %v6905_v20, 5  ;;  %v5880_v7 = vrot.slane %v5864_v35, 9  ;;  %v4618_v49 = vrot.slane %v8572_v60, 5  ;;  %v6907_v10 = vld [vmem:[%s7420_s27 + $0x34] sm:$0xf] }
 0x1d3   : > { %v5895_v43 = vcombine.low %v8867_v46, %v8873_v56  ;;  %v4541_v29 = vrot.slane %v6906_v51, 5  ;;  %v4621_v17 = vrot.slane %v8606_v40, 5  ;;  %v4163_v53 = vsel %vm7467_vm3, %v4158_v52, %v8834_v15  ;;  %v5854_v38 = vld [vmem:[%s7420_s27 + $0x30] sm:$0xe]  ;;  %v6922_v46 = vld [vmem:[%s7420_s27 + $0xe0] sm:$0x1] }
 0x1d4   : > { %v4173_v60 = vsel %vm7467_vm3, %v4168_v21, %v4172_v19  ;;  %v8893_v44 = vsel %vm7691_vm7, %v5880_v7, %v4618_v49  ;;  %v4620_v4 = vrot.slane %v4618_v49, 4  ;;  %v4535_v40 = vsel %vm7691_vm7, %v5868_v55, %v4534_v62  ;;  %v6908_v19 = vld [vmem:[%s7420_s27 + $0x2c] sm:$0x1]  ;;  %v6858_v55 = vld [vmem:[%s7420_s27 + $0x60] sm:$0xff]  }
 0x1d5   : > { %v4538_v27 = vsel %vm7691_vm7, %v4536_v39, %v4537_v30  ;;  %v4548_v15 = vrot.slane %v6907_v10, 5  ;;  %v5869_v1 = vrot.slane %v5853_v11, 9  ;;  %v5835_v35 = vcombine.low %v4163_v53, %v4173_v60  ;;  %v6859_v39 = vld [vmem:[%s7420_s27 + $0x84] sm:$0xff]   ;;  %v5866_v60 = vld [vmem:[%s7420_s27 + $0xd8] sm:$0xe] }
 0x1d6   : > { %v8905_v48 = vsel %vm7691_vm7, %v4620_v4, %v4621_v17  ;;  %v5881_v52 = vrot.slane %v5865_v2, 9  ;;  %v4625_v21 = vrot.slane %v8646_v36, 5  ;;  %v5870_v20 = vrot.slane %v5854_v38, 9  ;;  %v9330_v7 = vld [vmem:[#allocation29_spill] sm:$0xff]  ;;  %v9331_v11 = vld [vmem:[#allocation30_spill] sm:$0xff] }
 0x1d7   : > { %v5896_v62 = vcombine.low %v8893_v44, %v8905_v48  ;;  %v4550_v30 = vrot.slane %v4548_v15, 4  ;;  %v4551_v49 = vrot.slane %v9330_v7, 5  ;;  %v4555_v51 = vrot.slane %v9331_v11, 5  ;;  %v5855_v4 = vld [vmem:[%s7420_s27 + $0x3c] sm:$0xe] }
 0x1d8   : > { %6359 = vmatmul.mubr.msk.bf16.gmra.mrb[24].mxu0 %vm865_vm4, %v5833_v28  ;;  %v4543_v28 = vrot.slane %v4541_v29, 4  ;;  %v8918_v17 = vsel %vm7691_vm7, %v5881_v52, %v4625_v21  ;;  %v4627_v53 = vrot.slane %v4625_v21, 4  ;;  %v4542_v36 = vsel %vm7691_vm7, %v5869_v1, %v4541_v29  ;;  %v5588_v52 = vld [vmem:[%s7420_s27 + $0x84] sm:$0xf]  ;;  %v6909_v11 = vld [vmem:[%s7420_s27 + $0x88] sm:$0xf] }
 0x1d9   : > { %6207 = vmatmul.mubr.msk.bf16.gmra.mrb[8].mxu1 %vm865_vm4, %v6856_v37  ;;  %6362 = vmatprep.mubr.msk.bf16.mxu0 %vm865_vm4, %v5834_v3  ;;  %v4544_v37 = vrot.slane %v6908_v19, 5  ;;  %v5884_v3 = vcombine.low %v4535_v40, %v4538_v27  ;;  %v4549_v27 = vsel %vm7691_vm7, %v5870_v20, %v4548_v15  ;;  %v4552_v10 = vsel %vm7691_vm7, %v4550_v30, %v4551_v49  ;;  %v5867_v20 = vld [vmem:[%s7420_s27 + $0xe4] sm:$0xe] }
 0x1da   : > { %6210 = vmatprep.mubr.msk.bf16.mxu1 %vm865_vm4, %v6857_v33  ;;  %v4628_v33 = vrot.slane %v8692_v6, 5  ;;  %v5882_v2 = vrot.slane %v5866_v60, 9  ;;  %v5871_v1 = vrot.slane %v5855_v4, 9  ;;  %v4557_v38 = vrot.slane %v4555_v51, 4 }
 0x1db   : > { %v4545_v6 = vsel %vm7691_vm7, %v4543_v28, %v4544_v37  ;;  %v4632_v19 = vrot.slane %v8713_v25, 5  ;;  %v5886_v15 = vcombine.low %v4549_v27, %v4552_v10  ;;  %v2431_v49 = vshll.u32 %v5588_v52, 16 }
 0x1dc   : > { %v8931_v40 = vsel %vm7691_vm7, %v4627_v53, %v4628_v33  ;;  %v5885_v37 = vcombine.low %v4542_v36, %v4545_v6  ;;  %v4556_v30 = vsel %vm7691_vm7, %v5871_v1, %v4555_v51  ;;  %v2437_v53 = vshll.u32 %v6909_v11, 16 }
 0x1dd   : > { %v5897_v29 = vcombine.low %v8918_v17, %v8931_v40  ;;  %v8947_v21 = vsel %vm7691_vm7, %v5882_v2, %v4632_v19  ;;  %v4634_v33 = vrot.slane %v4632_v19, 4  ;;  %v2441_v51 = vshrl.u32 %v6909_v11, 16 }
 0x1de   : > { %v5883_v4 = vrot.slane %v5867_v20, 9  ;;  %v4639_v36 = vrot.slane %v8773_v47, 5  ;;  %v4642_v6 = vrot.slane %v8827_v57, 5  ;;  %v5594_v57 = vld [vmem:[%s7420_s27 + $0x9c] sm:$0xf]  ;;  %v2615_v56 = vshll.u32 %v6922_v46, 16 }
 0x1df   : > { %v2443_v19 = vrot.slane %v2441_v51, 4  ;;  %v6911_v20 = vld [vmem:[%s7420_s27 + $0xa0] sm:$0xf]  ;;  %v5600_v51 = vld [vmem:[%s7420_s27 + $0xb4] sm:$0xf] }
 0x1e0   : > { %6363 = vmatmul.mubr.msk.bf16.gmra.mrb[28].mxu0 %vm865_vm4, %v5835_v35  ;;  %v9332_v35 = vld [vmem:[#allocation31_spill] sm:$0xff]  ;;  %v8970_v27 = vsel %vm7691_vm7, %v5883_v4, %v4639_v36  ;;  %v4641_v10 = vrot.slane %v4639_v36, 4 }
 0x1e1   : > { %6211 = vmatmul.mubr.msk.bf16.gmra.mrb[12].mxu1 %vm865_vm4, %v6858_v55  ;;  %6368 = vmatprep.mubr.msk.bf16.mxu0 %vm865_vm4, %v5884_v3  ;;  %v4558_v28 = vrot.slane %v9332_v35, 5  ;;  %v4635_v55 = vrot.slane %v8789_v59, 5  ;;  %v6860_v3 = vld [vmem:[%s7420_s27 + $0x90] sm:$0xff]   ;;  %v2428_v59 = vshrl.u32 %v5588_v52, 16  ;;  %v2433_v35 = vrot.slane %v2431_v49, 5  ;;  %v6864_v49 = vld [vmem:[%s7420_s27 + $0xc0] sm:$0xff]  }
 0x1e2   : > { %6214 = vmatprep.mubr.msk.bf16.mxu1 %vm865_vm4, %v6859_v39  ;;  %v6861_v39 = vld [vmem:[%s7420_s27 + $0x9c] sm:$0xff]   ;;  %v8975_v47 = vsel %vm7691_vm7, %v4641_v10, %v4642_v6  ;;  %v6865_v4 = vld [vmem:[%s7420_s27 + $0xcc] sm:$0xff]  }
 0x1e3   : > { %v4559_v25 = vsel %vm7691_vm7, %v4557_v38, %v4558_v28  ;;  %v8957_v7 = vsel %vm7691_vm7, %v4634_v33, %v4635_v55  ;;  %v2430_v1 = vrot.slane %v2428_v59, 4  ;;  %v6862_v38 = vld [vmem:[%s7420_s27 + $0xa8] sm:$0xff]   ;;  %v2439_v28 = vrot.slane %v2437_v53, 5 }
 0x1e4   : > { %v5898_v60 = vcombine.low %v8947_v21, %v8957_v7  ;;  %v5887_v2 = vcombine.low %v4556_v30, %v4559_v25  ;;  %v5899_v55 = vcombine.low %v8970_v27, %v8975_v47  ;;  %v2476_v33 = vshrl.u32 %v5594_v57, 16  ;;  %v5597_v59 = vld [vmem:[%s7420_s27 + $0xa8] sm:$0xf] }
 0x1e5   : > { %v2434_v22 = vor.u32 %v2433_v35, %v2430_v1  ;;  %v2444_v52 = vor.u32 %v2443_v19, %v2439_v28  ;;  %v2485_v30 = vshll.u32 %v6911_v20, 16  ;;  %v2489_v25 = vshrl.u32 %v6911_v20, 16  ;;  %v6912_v1 = vld [vmem:[%s7420_s27 + $0xac] sm:$0xf] }
 0x1e6   : > { %v2478_v12 = vrot.slane %v2476_v33, 4  ;;  %v2500_v10 = vshrl.u32 %v5597_v59, 16  ;;  %v2513_v35 = vshrl.u32 %v6912_v1, 16  ;;  %v2524_v19 = vshrl.u32 %v5600_v51, 16 }
 0x1e7   : > { %v2435_v53 = vrot.slane %v2434_v22, 4  ;;  %v2445_v41 = vrot.slane %v2444_v52, 4  ;;  %v8994_v36 = vrot.slane %v2485_v30, 5  ;;  %v2491_v6 = vrot.slane %v2489_v25, 4 }
 0x1e8   : > { %6369 = vmatmul.mubr.msk.bf16.vlgmr.msra.gmra.mrb[0].mxu0 %vm865_vm4, %v5885_v37  ;;  %v6863_v37 = vld [vmem:[%s7420_s27 + $0xb4] sm:$0xff]   ;;  %v2526_v20 = vrot.slane %v2524_v19, 4 }
 0x1e9   : > { %6215 = vmatmul.mubr.msk.bf16.gmra.mrb[16].mxu1 %vm865_vm4, %v6860_v3  ;;  %6372 = vmatprep.mubr.msk.bf16.mxu0 %vm865_vm4, %v5886_v15  ;;  %v6910_v3 = vld [vmem:[%s7420_s27 + $0x8c] sm:$0x1]  ;;  %v2440_v22 = vsel %vm7467_vm3, %v2435_v53, %v2439_v28  ;;  %v2492_v33 = vor.u32 %v2491_v6, %v8994_v36 }
 0x1ea   : > { %6218 = vmatprep.mubr.msk.bf16.mxu1 %vm865_vm4, %v6861_v39  ;;  %v2447_v15 = vshll.u32 %v6910_v3, 16  ;;  %v2479_v39 = vshll.u32 %v5594_v57, 16  ;;  %v6913_v57 = vld [vmem:[%s7420_s27 + $0xb8] sm:$0xf] }
 0x1eb   : > { %v2533_v3 = vshll.u32 %v6913_v57, 16 }
 0x1ec   : > { %v2449_v11 = vrot.slane %v2447_v15, 5  ;;  %v2537_v15 = vshrl.u32 %v6913_v57, 16 }
 0x1ed   : > { %v9016_v28 = vrot.slane %v2533_v3, 5 }
 0x1ee   : > { %v2450_v34 = vsel %vm7467_vm3, %v2445_v41, %v2449_v11  ;;  %v2539_v25 = vrot.slane %v2537_v15, 4  ;;  %v2493_v41 = vrot.slane %v2492_v33, 4 }
 0x1f0   : > { %6373 = vmatmul.mubr.msk.bf16.gmra.mrb[4].mxu0 %vm865_vm4, %v5887_v2  ;;  %v2503_v2 = vshll.u32 %v5597_v59, 16  ;;  %v6866_v59 = vld [vmem:[%s7420_s27 + $0xd8] sm:$0xff]  }
 0x1f1   : > { %6219 = vmatmul.mubr.msk.bf16.gmra.mrb[20].mxu1 %vm865_vm4, %v6862_v38  ;;  %6376 = vmatprep.mubr.msk.bf16.mxu0 %vm865_vm4, %v5888_v8  ;;  %v2481_v8 = vrot.slane %v2479_v39, 5  ;;  %v2509_v38 = vshll.u32 %v6912_v1, 16  ;;  %v2502_v39 = vrot.slane %v2500_v10, 4  ;;  %v6916_v1 = vld [vmem:[%s7420_s27 + $0xbc] sm:$0x1] }
 0x1f2   : > { %6222 = vmatprep.mubr.msk.bf16.mxu1 %vm865_vm4, %v6863_v37  ;;  %v2527_v37 = vshll.u32 %v5600_v51, 16  ;;  %v2505_v26 = vrot.slane %v2503_v2, 5  ;;  %v2540_v2 = vor.u32 %v2539_v25, %v9016_v28 }
 0x1f3   : > { %v2482_v52 = vor.u32 %v2481_v8, %v2478_v12  ;;  %v9014_v18 = vrot.slane %v2509_v38, 5  ;;  %v6915_v8 = vld [vmem:[%s7420_s27 + $0xb0] sm:$0x1]  ;;  %v2543_v38 = vshll.u32 %v6916_v1, 16 }
 0x1f4   : > { %v2529_v30 = vrot.slane %v2527_v37, 5  ;;  %v2506_v12 = vor.u32 %v2505_v26, %v2502_v39  ;;  %v2519_v51 = vshll.u32 %v6915_v8, 16  ;;  %v2561_v37 = vshrl.u32 %v6917_v5, 16 }
 0x1f5   : > { %v2483_v53 = vrot.slane %v2482_v52, 4  ;;  %v2541_v33 = vrot.slane %v2540_v2, 4  ;;  %v2545_v39 = vrot.slane %v2543_v38, 5  ;;  %v6921_v38 = vld [vmem:[%s7420_s27 + $0xd4] sm:$0x1] }
 0x1f6   : > { %v2530_v10 = vor.u32 %v2529_v30, %v2526_v20  ;;  %v2507_v15 = vrot.slane %v2506_v12, 4  ;;  %v2563_v30 = vrot.slane %v2561_v37, 4  ;;  %v2591_v13 = vshll.u32 %v6921_v38, 16 }
 0x1f7   : > { %v2488_v57 = vsel %vm7467_vm3, %v2483_v53, %v8994_v36  ;;  %v5609_v53 = vld [vmem:[%s7420_s27 + $0xd8] sm:$0xf]  ;;  %v2546_v9 = vsel %vm7467_vm3, %v2541_v33, %v2545_v39 }
 0x1f8   : > { %6377 = vmatmul.mubr.msk.bf16.gmra.mrb[8].mxu0 %vm865_vm4, %v5889_v14  ;;  %v2495_v14 = vshll.u32 %v6914_v58, 16  ;;  %v2585_v58 = vshrl.u32 %v6918_v45, 16  ;;  %v2531_v52 = vrot.slane %v2530_v10, 4 }
 0x1f9   : > { %6223 = vmatmul.mubr.msk.bf16.gmra.mrb[24].mxu1 %vm865_vm4, %v6864_v49  ;;  %6380 = vmatprep.mubr.msk.bf16.mxu0 %vm865_vm4, %v5890_v24  ;;  %v2515_v24 = vrot.slane %v2513_v35, 4  ;;  %v5620_v49 = vcombine.low %v2440_v22, %v2450_v34  ;;  %v5606_v35 = vld [vmem:[%s7420_s27 + $0xcc] sm:$0xf]  ;;  %v2521_v22 = vrot.slane %v2519_v51, 5 }
 0x1fa   : > { %6226 = vmatprep.mubr.msk.bf16.mxu1 %vm865_vm4, %v6865_v4  ;;  %v2497_v11 = vrot.slane %v2495_v14, 5  ;;  %v5603_v4 = vld [vmem:[%s7420_s27 + $0xc0] sm:$0xf]  ;;  %v2572_v34 = vshrl.u32 %v5606_v35, 16  ;;  %v2575_v23 = vshll.u32 %v5606_v35, 16  ;;  %v2536_v8 = vsel %vm7467_vm3, %v2531_v52, %v9016_v28 }
 0x1fb   : > { %v2516_v6 = vor.u32 %v2515_v24, %v9014_v18  ;;  %v2548_v19 = vshrl.u32 %v5603_v4, 16  ;;  %v2551_v42 = vshll.u32 %v5603_v4, 16  ;;  %v2596_v4 = vshrl.u32 %v5609_v53, 16 }
 0x1fc   : > { %v2498_v3 = vsel %vm7467_vm3, %v2493_v41, %v2497_v11  ;;  %v2574_v25 = vrot.slane %v2572_v34, 4  ;;  %v2587_v11 = vrot.slane %v2585_v58, 4  ;;  %v2512_v41 = vsel %vm7467_vm3, %v2507_v15, %v9014_v18  ;;  %v6919_v18 = vld [vmem:[%s7420_s27 + $0xc8] sm:$0x1] }
 0x1fd   : > { %v2517_v14 = vrot.slane %v2516_v6, 4  ;;  %v2550_v26 = vrot.slane %v2548_v19, 4  ;;  %v2553_v24 = vrot.slane %v2551_v42, 5  ;;  %v5622_v36 = vcombine.low %v2488_v57, %v2498_v3  ;;  %v6920_v6 = vld [vmem:[%s7420_s27 + $0xdc] sm:$0xf] }
 0x1fe   : > { %v2567_v51 = vshll.u32 %v6919_v18, 16  ;;  %v2599_v28 = vshll.u32 %v5609_v53, 16  ;;  %v2605_v10 = vshll.u32 %v6920_v6, 16  ;;  %v2609_v2 = vshrl.u32 %v6920_v6, 16  ;;  %v9117_v53 = vld [vmem:[#allocation8] ss:$0 sm:$0xff] }
 0x1ff   : > { %v2522_v12 = vsel %vm7467_vm3, %v2517_v14, %v2521_v22  ;;  %v2554_v54 = vor.u32 %v2553_v24, %v2550_v26  ;;  %v2593_v22 = vrot.slane %v2591_v13, 5  ;;  %v2617_v52 = vrot.slane %v2615_v56, 5 }
 0x200   : > { %6381 = vmatmul.mubr.msk.bf16.gmra.mrb[12].mxu0 %vm865_vm4, %v5891_v32  ;;  %v2557_v32 = vshll.u32 %v6917_v5, 16  ;;  %v5623_v16 = vcombine.low %v2512_v41, %v2522_v12  ;;  %v2569_v42 = vrot.slane %v2567_v51, 5  ;;  %v2598_v5 = vrot.slane %v2596_v4, 4 }
 0x201   : > { %6227 = vmatmul.mubr.msk.bf16.gmra.mrb[28].mxu1 %vm865_vm4, %v6866_v59  ;;  %6384 = vmatprep.mubr.msk.bf16.mxu0 %vm865_vm4, %v5892_v0  ;;  %v2581_v0 = vshll.u32 %v6918_v45, 16  ;;  %v2577_v59 = vrot.slane %v2575_v23, 5  ;;  %v2555_v35 = vrot.slane %v2554_v54, 4  ;;  %v2607_v37 = vrot.slane %v2605_v10, 5 }
 0x202   : > { %6248 = vmatprep.mubr.msk.bf16.mxu1 %vm865_vm4, %v5620_v49  ;;  %v2559_v20 = vrot.slane %v2557_v32, 5  ;;  %v2601_v32 = vrot.slane %v2599_v28, 5  ;;  %v2611_v57 = vrot.slane %v2609_v2, 4 }
 0x203   : > { %v2583_v49 = vrot.slane %v2581_v0, 5 }
 0x204   : > { %v2560_v34 = vsel %vm7467_vm3, %v2555_v35, %v2559_v20  ;;  %v2602_v45 = vor.u32 %v2601_v32, %v2598_v5  ;;  %v2612_v0 = vor.u32 %v2611_v57, %v2607_v37 }
 0x205   : > { %v2588_v1 = vor.u32 %v2587_v11, %v2583_v49 }
 0x206   : > { %v2603_v58 = vrot.slane %v2602_v45, 4  ;;  %v2613_v14 = vrot.slane %v2612_v0, 4 }
 0x207   : > { %v2589_v15 = vrot.slane %v2588_v1, 4 }
 0x208   : > { %6385 = vmatmul.mubr.msk.bf16.gmra.mrb[16].mxu0 %vm865_vm4, %v5893_v63  ;;  %v2564_v63 = vor.u32 %v2563_v30, %v2559_v20  ;;  %v2608_v33 = vsel %vm7467_vm3, %v2603_v58, %v2607_v37  ;;  %v2618_v39 = vsel %vm7467_vm3, %v2613_v14, %v2617_v52 }
 0x209   : > { %6249 = vmatmul.mubr.msk.bf16.vlgmr.msra.gmra.mrb[16].mxu1 %vm865_vm4, %v8823_v61  ;;  %6388 = vmatprep.mubr.msk.bf16.mxu0 %vm865_vm4, %v5894_v50  ;;  %v2578_v61 = vor.u32 %v2577_v59, %v2574_v25  ;;  %v5624_v50 = vcombine.low %v2536_v8, %v2546_v9  ;;  %v2594_v44 = vsel %vm7467_vm3, %v2589_v15, %v2593_v22  ;;  %v9119_v9 = vld [vmem:[#allocation9] ss:$0 sm:$0xff] }
 0x20a   : > { %6252 = vmatprep.mubr.msk.bf16.mxu1 %vm865_vm4, %v5622_v36  ;;  %v2565_v19 = vrot.slane %v2564_v63, 4  ;;  %v5627_v26 = vcombine.low %v2608_v33, %v2618_v39 }
 0x20b   : > { %v2579_v3 = vrot.slane %v2578_v61, 4 }
 0x20c   : > { %v2570_v23 = vsel %vm7467_vm3, %v2565_v19, %v2569_v42 }
 0x20d   : > { %v5625_v48 = vcombine.low %v2560_v34, %v2570_v23 }
 0x210   : > { %6389 = vmatmul.mubr.msk.bf16.gmra.mrb[20].mxu0 %vm865_vm4, %v5895_v43  ;;  %v2584_v43 = vsel %vm7467_vm3, %v2579_v3, %v2583_v49 }
 0x211   : > { %6253 = vmatmul.mubr.msk.bf16.gmra.mrb[20].mxu1 %vm865_vm4, %v5623_v16  ;;  %6392 = vmatprep.mubr.msk.bf16.mxu0 %vm865_vm4, %v5896_v62  ;;  %v5626_v62 = vcombine.low %v2584_v43, %v2594_v44 }
 0x212   : > { %6256 = vmatprep.mubr.msk.bf16.mxu1 %vm865_vm4, %v5624_v50 }
 0x218   : > { %6393 = vmatmul.mubr.msk.bf16.gmra.mrb[24].mxu0 %vm865_vm4, %v5897_v29 }
 0x219   : > { %6257 = vmatmul.mubr.msk.bf16.gmra.mrb[24].mxu1 %vm865_vm4, %v5625_v48  ;;  %6396 = vmatprep.mubr.msk.bf16.mxu0 %vm865_vm4, %v5898_v60 }
 0x21a   : > { %6260 = vmatprep.mubr.msk.bf16.mxu1 %vm865_vm4, %v5626_v62 }
 0x220   : > { %6397 = vmatmul.mubr.msk.bf16.gmra.mrb[28].mxu0 %vm865_vm4, %v5899_v55 }
 0x221   : > { %6261 = vmatmul.mubr.msk.bf16.gmra.mrb[28].mxu1 %vm865_vm4, %v5627_v26 }
 0x29c   : > { %v6200_v17 = vpop.f32.mrb[0].mxu1 }
 0x29d   : > { %v2028_v40 = vpop.f32.mrb[1].mxu1 }
 0x29e   : > { %v6201_v29 = vpop.f32.mrb[2].mxu1 }
 0x29f   : > { %v2031_v21 = vpop.f32.mrb[3].mxu1 }
 0x2a4   : > { %v6204_v7 = vpop.f32.mrb[4].mxu1 }
 0x2a5   : > { %v2044_v60 = vpop.f32.mrb[5].mxu1 }
 0x2a6   : > { %v6205_v24 = vpop.f32.mrb[6].mxu1 }
 0x2a7   : > { %v2047_v20 = vpop.f32.mrb[7].mxu1 }
 0x2ac   : > { %v6208_v30 = vpop.f32.mrb[8].mxu1 }
 0x2ad   : > { %v2060_v36 = vpop.f32.mrb[9].mxu1 }
 0x2ae   : > { %v9105_v31 = vpop.f32.mrb[10].mxu1 }
 0x2af   : > { %v9107_v25 = vpop.f32.mrb[11].mxu1 }
 0x2b4   : > { %v9109_v59 = vpop.f32.mrb[12].mxu1 }
 0x2b5   : > { %v9111_v27 = vpop.f32.mrb[13].mxu1 }
 0x2b6   : > { %v9113_v47 = vpop.f32.mrb[14].mxu1 }
 0x2b7   : > { %v9115_v55 = vpop.f32.mrb[15].mxu1 }
 0x2bb   : > { %v6370_v49 = vpop.f32.mrb[0].mxu0 }
 0x2bc   : > { %v6422_v11 = vadd.f32 %v6370_v49, %v6200_v17  ;;  %v4779_v41 = vpop.f32.mrb[1].mxu0 }
 0x2bd   : > { %v6423_v12 = vadd.f32 %v4779_v41, %v2028_v40  ;;  %v6371_v8 = vpop.f32.mrb[2].mxu0 }
 0x2be   : > { %v6424_v54 = vadd.f32 %v6371_v8, %v6201_v29  ;;  %v4782_v63 = vpop.f32.mrb[3].mxu0  ;;  %v4947_v18 = vadd.f32 %v6422_v11, %v9117_v53 }
 0x2bf   : > { %v4945_v51 = vadd.f32 %v6423_v12, %v9117_v53  ;;  %v6425_v4 = vadd.f32 %v4782_v63, %v2031_v21 }
 0x2c0   : > { %v4948_v28 = vadd.f32 %v6424_v54, %v9117_v53  ;;  %v5018_v2 = vmul.f32 %v9119_v9, %v4947_v18  ;;  %vm4980_vm10 = vcmp.gt.f32.partialorder %v4947_v18, 0.0 }
 0x2c1   : > { %v5016_v6 = vmul.f32 %v9119_v9, %v4945_v51  ;;  %v4946_v10 = vadd.f32 %v6425_v4, %v9117_v53  ;;  %vm4978_vm8 = vcmp.gt.f32.partialorder %v4945_v51, 0.0 }
 0x2c2   : > { %v5019_v38 = vmul.f32 %v9119_v9, %v4948_v28  ;;  %vm4981_vm11 = vcmp.gt.f32.partialorder %v4948_v28, 0.0  ;;  %v5050_v57 = vsel %vm4980_vm10, %v4947_v18, %v5018_v2 }
 0x2c3   : > { %vm4979_vm9 = vcmp.gt.f32.partialorder %v4946_v10, 0.0  ;;  %v5017_v61 = vmul.f32 %v9119_v9, %v4946_v10  ;;  %v6374_v1 = vpop.f32.mrb[4].mxu0  ;;  %v5048_v50 = vsel %vm4978_vm8, %v4945_v51, %v5016_v6 }
 0x2c4   : > { %v6426_v13 = vadd.f32 %v6374_v1, %v6204_v7  ;;  %v4795_v16 = vpop.f32.mrb[5].mxu0  ;;  %v5051_v34 = vsel %vm4981_vm11, %v4948_v28, %v5019_v38 }
 0x2c5   : > { %v5049_v35 = vsel %vm4979_vm9, %v4946_v10, %v5017_v61  ;;  %v6427_v19 = vadd.f32 %v4795_v16, %v2044_v60  ;;  %v6375_v42 = vpop.f32.mrb[6].mxu0 }
 0x2c6   : > { %v5081_v5 = vadd.f32 %v5049_v35, %v5048_v50  ;;  %v6428_v32 = vadd.f32 %v6375_v42, %v6205_v24  ;;  %v4798_v37 = vpop.f32.mrb[7].mxu0  ;;  %v4951_v3 = vadd.f32 %v6426_v13, %v9117_v53 }
 0x2c7   : > { %v4949_v15 = vadd.f32 %v6427_v19, %v9117_v53  ;;  %v6429_v22 = vadd.f32 %v4798_v37, %v2047_v20 }
 0x2c8   : > { %v5082_v23 = vadd.f32 %v5081_v5, %v5050_v57  ;;  %v4952_v0 = vadd.f32 %v6428_v32, %v9117_v53  ;;  %v5022_v43 = vmul.f32 %v9119_v9, %v4951_v3  ;;  %vm4984_vm14 = vcmp.gt.f32.partialorder %v4951_v3, 0.0 }
 0x2c9   : > { %vm4982_vm12 = vcmp.gt.f32.partialorder %v4949_v15, 0.0  ;;  %v5020_v45 = vmul.f32 %v9119_v9, %v4949_v15  ;;  %v4950_v46 = vadd.f32 %v6429_v22, %v9117_v53 }
 0x2ca   : > { %v5083_v56 = vadd.f32 %v5082_v23, %v5051_v34  ;;  %v5023_v33 = vmul.f32 %v9119_v9, %v4952_v0  ;;  %vm4985_vm15 = vcmp.gt.f32.partialorder %v4952_v0, 0.0  ;;  %v5054_v7 = vsel %vm4984_vm14, %v4951_v3, %v5022_v43 }
 0x2cb   : > { %v5052_v44 = vsel %vm4982_vm12, %v4949_v15, %v5020_v45  ;;  %vm4983_vm13 = vcmp.gt.f32.partialorder %v4950_v46, 0.0  ;;  %v5021_v48 = vmul.f32 %v9119_v9, %v4950_v46  ;;  %v6378_v62 = vpop.f32.mrb[8].mxu0 }
 0x2cc   : > { %v5084_v58 = vadd.f32 %v5083_v56, %v5052_v44  ;;  %v6430_v14 = vadd.f32 %v6378_v62, %v6208_v30  ;;  %v4811_v52 = vpop.f32.mrb[9].mxu0  ;;  %v5055_v11 = vsel %vm4985_vm15, %v4952_v0, %v5023_v33 }
 0x2cd   : > { %v5053_v39 = vsel %vm4983_vm13, %v4950_v46, %v5021_v48  ;;  %v6431_v26 = vadd.f32 %v4811_v52, %v2060_v36  ;;  %v6379_v17 = vpop.f32.mrb[10].mxu0 }
 0x2ce   : > { %v5085_v40 = vadd.f32 %v5084_v58, %v5053_v39  ;;  %v6432_v29 = vadd.f32 %v6379_v17, %v9105_v31  ;;  %v4814_v21 = vpop.f32.mrb[11].mxu0  ;;  %v4955_v60 = vadd.f32 %v6430_v14, %v9117_v53 }
 0x2cf   : > { %v4953_v24 = vadd.f32 %v6431_v26, %v9117_v53  ;;  %v6433_v20 = vadd.f32 %v4814_v21, %v9107_v25 }
 0x2d0   : > { %v5086_v49 = vadd.f32 %v5085_v40, %v5054_v7  ;;  %v4956_v30 = vadd.f32 %v6432_v29, %v9117_v53  ;;  %v5026_v31 = vmul.f32 %v9119_v9, %v4955_v60  ;;  %vm4988_vm2 = vcmp.gt.f32.partialorder %v4955_v60, 0.0 }
 0x2d1   : > { %vm4986_vm0 = vcmp.gt.f32.partialorder %v4953_v24, 0.0  ;;  %v5024_v36 = vmul.f32 %v9119_v9, %v4953_v24  ;;  %v4954_v41 = vadd.f32 %v6433_v20, %v9117_v53 }
 0x2d2   : > { %v5087_v12 = vadd.f32 %v5086_v49, %v5055_v11  ;;  %v5027_v25 = vmul.f32 %v9119_v9, %v4956_v30  ;;  %vm4989_vm3 = vcmp.gt.f32.partialorder %v4956_v30, 0.0  ;;  %v5058_v38 = vsel %vm4988_vm2, %v4955_v60, %v5026_v31 }
 0x2d3   : > { %v5056_v8 = vsel %vm4986_vm0, %v4953_v24, %v5024_v36  ;;  %vm4987_vm1 = vcmp.gt.f32.partialorder %v4954_v41, 0.0  ;;  %v5025_v54 = vmul.f32 %v9119_v9, %v4954_v41  ;;  %v6382_v63 = vpop.f32.mrb[12].mxu0 }
 0x2d4   : > { %v5088_v18 = vadd.f32 %v5087_v12, %v5056_v8  ;;  %v6434_v51 = vadd.f32 %v6382_v63, %v9109_v59  ;;  %v4827_v4 = vpop.f32.mrb[13].mxu0  ;;  %v5059_v35 = vsel %vm4989_vm3, %v4956_v30, %v5027_v25 }
 0x2d5   : > { %v5057_v28 = vsel %vm4987_vm1, %v4954_v41, %v5025_v54  ;;  %v6435_v6 = vadd.f32 %v4827_v4, %v9111_v27  ;;  %v6383_v10 = vpop.f32.mrb[14].mxu0 }
 0x2d6   : > { %v5089_v2 = vadd.f32 %v5088_v18, %v5057_v28  ;;  %v6436_v61 = vadd.f32 %v6383_v10, %v9113_v47  ;;  %v4830_v1 = vpop.f32.mrb[15].mxu0  ;;  %v4959_v13 = vadd.f32 %v6434_v51, %v9117_v53 }
 0x2d7   : > { %v4957_v16 = vadd.f32 %v6435_v6, %v9117_v53  ;;  %v6437_v50 = vadd.f32 %v4830_v1, %v9115_v55 }
 0x2d8   : > { %v5090_v19 = vadd.f32 %v5089_v2, %v5058_v38  ;;  %v4960_v42 = vadd.f32 %v6436_v61, %v9117_v53  ;;  %v5030_v47 = vmul.f32 %v9119_v9, %v4959_v13  ;;  %vm4992_vm6 = vcmp.gt.f32.partialorder %v4959_v13, 0.0 }
 0x2d9   : > { %vm4990_vm4 = vcmp.gt.f32.partialorder %v4957_v16, 0.0  ;;  %v5028_v59 = vmul.f32 %v9119_v9, %v4957_v16  ;;  %v4958_v27 = vadd.f32 %v6437_v50, %v9117_v53 }
 0x2da   : > { %v5091_v5 = vadd.f32 %v5090_v19, %v5059_v35  ;;  %v5031_v22 = vmul.f32 %v9119_v9, %v4960_v42  ;;  %vm4993_vm7 = vcmp.gt.f32.partialorder %v4960_v42, 0.0  ;;  %v5062_v48 = vsel %vm4992_vm6, %v4959_v13, %v5030_v47 }
 0x2db   : > { %v5060_v32 = vsel %vm4990_vm4, %v4957_v16, %v5028_v59  ;;  %vm4991_vm5 = vcmp.gt.f32.partialorder %v4958_v27, 0.0  ;;  %v5029_v37 = vmul.f32 %v9119_v9, %v4958_v27  ;;  %v6386_v57 = vpop.f32.mrb[16].mxu0 }
 0x2dc   : > { %v5092_v3 = vadd.f32 %v5091_v5, %v5060_v32  ;;  %v6250_v55 = vpop.f32.mrb[16].mxu1  ;;  %v4843_v15 = vpop.f32.mrb[17].mxu0  ;;  %v5063_v26 = vsel %vm4993_vm7, %v4960_v42, %v5031_v22 }
 0x2dd   : > { %v5061_v34 = vsel %vm4991_vm5, %v4958_v27, %v5029_v37  ;;  %v6438_v23 = vadd.f32 %v6386_v57, %v6250_v55  ;;  %v2818_v45 = vpop.f32.mrb[17].mxu1  ;;  %v6387_v0 = vpop.f32.mrb[18].mxu0 }
 0x2de   : > { %v5093_v46 = vadd.f32 %v5092_v3, %v5061_v34  ;;  %v6439_v56 = vadd.f32 %v4843_v15, %v2818_v45  ;;  %v6251_v43 = vpop.f32.mrb[18].mxu1  ;;  %v4846_v44 = vpop.f32.mrb[19].mxu0 }
 0x2df   : > { %v6440_v62 = vadd.f32 %v6387_v0, %v6251_v43  ;;  %v2821_v58 = vpop.f32.mrb[19].mxu1  ;;  %v4963_v52 = vadd.f32 %v6438_v23, %v9117_v53 }
 0x2e0   : > { %v5094_v14 = vadd.f32 %v5093_v46, %v5062_v48  ;;  %v4961_v33 = vadd.f32 %v6439_v56, %v9117_v53  ;;  %v6441_v39 = vadd.f32 %v4846_v44, %v2821_v58 }
 0x2e1   : > { %v4964_v17 = vadd.f32 %v6440_v62, %v9117_v53  ;;  %v5034_v60 = vmul.f32 %v9119_v9, %v4963_v52  ;;  %vm4996_vm10 = vcmp.gt.f32.partialorder %v4963_v52, 0.0 }
 0x2e2   : > { %v9162_v40 = vadd.f32 %v5094_v14, %v5063_v26  ;;  %v5032_v29 = vmul.f32 %v9119_v9, %v4961_v33  ;;  %v4962_v21 = vadd.f32 %v6441_v39, %v9117_v53  ;;  %vm4994_vm8 = vcmp.gt.f32.partialorder %v4961_v33, 0.0 }
 0x2e3   : > { %v6390_v7 = vpop.f32.mrb[20].mxu0  ;;  %v5035_v30 = vmul.f32 %v9119_v9, %v4964_v17  ;;  %vm4997_vm11 = vcmp.gt.f32.partialorder %v4964_v17, 0.0  ;;  %v5066_v4 = vsel %vm4996_vm10, %v4963_v52, %v5034_v60 }
 0x2e4   : > { %vm4995_vm9 = vcmp.gt.f32.partialorder %v4962_v21, 0.0  ;;  %v5033_v24 = vmul.f32 %v9119_v9, %v4962_v21  ;;  %v6254_v20 = vpop.f32.mrb[20].mxu1  ;;  %v4859_v49 = vpop.f32.mrb[21].mxu0  ;;  %v5064_v12 = vsel %vm4994_vm8, %v4961_v33, %v5032_v29  ;;  %vm5125_vm8 = vcmask 1041409  }
 0x2e5   : > { %v6442_v11 = vadd.f32 %v6390_v7, %v6254_v20  ;;  %v2834_v36 = vpop.f32.mrb[21].mxu1  ;;  %v6391_v41 = vpop.f32.mrb[22].mxu0  ;;  %v5067_v2 = vsel %vm4997_vm11, %v4964_v17, %v5035_v30 }
 0x2e6   : > { %v5065_v31 = vsel %vm4995_vm9, %v4962_v21, %v5033_v24  ;;  %v6443_v8 = vadd.f32 %v4859_v49, %v2834_v36  ;;  %v6255_v54 = vpop.f32.mrb[22].mxu1  ;;  %v4862_v63 = vpop.f32.mrb[23].mxu0  ;;  %vm7182_vm9 = vmmov (!%p5918_p10), 0  }
 0x2e7   : > { %v5102_v18 = vadd.f32 %v5065_v31, %v5064_v12  ;;  %v6444_v25 = vadd.f32 %v6391_v41, %v6255_v54  ;;  %v2837_v51 = vpop.f32.mrb[23].mxu1  ;;  %v4967_v28 = vadd.f32 %v6442_v11, %v9117_v53 }
 0x2e8   : > { %v4965_v6 = vadd.f32 %v6443_v8, %v9117_v53  ;;  %v6445_v10 = vadd.f32 %v4862_v63, %v2837_v51 }
 0x2e9   : > { %v5103_v61 = vadd.f32 %v5102_v18, %v5066_v4  ;;  %v4968_v38 = vadd.f32 %v6444_v25, %v9117_v53  ;;  %v5038_v35 = vmul.f32 %v9119_v9, %v4967_v28  ;;  %vm5000_vm14 = vcmp.gt.f32.partialorder %v4967_v28, 0.0 }
 0x2ea   : > { %vm4998_vm12 = vcmp.gt.f32.partialorder %v4965_v6, 0.0  ;;  %v5036_v1 = vmul.f32 %v9119_v9, %v4965_v6  ;;  %v4966_v13 = vadd.f32 %v6445_v10, %v9117_v53 }
 0x2eb   : > { %v5104_v16 = vadd.f32 %v5103_v61, %v5067_v2  ;;  %v6394_v50 = vpop.f32.mrb[24].mxu0  ;;  %v5039_v57 = vmul.f32 %v9119_v9, %v4968_v38  ;;  %vm5001_vm15 = vcmp.gt.f32.partialorder %v4968_v38, 0.0  ;;  %v5070_v0 = vsel %vm5000_vm14, %v4967_v28, %v5038_v35 }
 0x2ec   : > { %v5068_v19 = vsel %vm4998_vm12, %v4965_v6, %v5036_v1  ;;  %vm4999_vm13 = vcmp.gt.f32.partialorder %v4966_v13, 0.0  ;;  %v5037_v59 = vmul.f32 %v9119_v9, %v4966_v13  ;;  %v6258_v42 = vpop.f32.mrb[24].mxu1  ;;  %v4875_v27 = vpop.f32.mrb[25].mxu0  ;;  %v5096_v2 = vrot.slane %v9162_v40, 4 }
 0x2ed   : > { %v5105_v5 = vadd.f32 %v5104_v16, %v5068_v19  ;;  %v6446_v47 = vadd.f32 %v6394_v50, %v6258_v42  ;;  %v2850_v32 = vpop.f32.mrb[25].mxu1  ;;  %v6395_v37 = vpop.f32.mrb[26].mxu0  ;;  %v5071_v62 = vsel %vm5001_vm15, %v4968_v38, %v5039_v57 }
 0x2ee   : > { %v5069_v3 = vsel %vm4999_vm13, %v4966_v13, %v5037_v59  ;;  %v6447_v55 = vadd.f32 %v4875_v27, %v2850_v32  ;;  %v6259_v15 = vpop.f32.mrb[26].mxu1  ;;  %v4878_v22 = vpop.f32.mrb[27].mxu0  ;;  %v5097_v19 = vadd.f32 %v5096_v2, %v9162_v40 }
 0x2ef   : > { %v5106_v34 = vadd.f32 %v5105_v5, %v5069_v3  ;;  %v6448_v23 = vadd.f32 %v6395_v37, %v6259_v15  ;;  %v2853_v45 = vpop.f32.mrb[27].mxu1  ;;  %v4971_v46 = vadd.f32 %v6446_v47, %v9117_v53 }
 0x2f0   : > { %v4969_v56 = vadd.f32 %v6447_v55, %v9117_v53  ;;  %v6449_v43 = vadd.f32 %v4878_v22, %v2853_v45  ;;  %v5098_v5 = vrot.slane %v5097_v19, 2 }
 0x2f1   : > { %v5107_v44 = vadd.f32 %v5106_v34, %v5070_v0  ;;  %v4972_v48 = vadd.f32 %v6448_v23, %v9117_v53  ;;  %v5042_v39 = vmul.f32 %v9119_v9, %v4971_v46  ;;  %vm5004_vm2 = vcmp.gt.f32.partialorder %v4971_v46, 0.0  ;;  %v6923_v0 = vld [vmem:[#allocation11] sm:$0xff] (!%p5918_p10)  }
 0x2f2   : > { %vm5002_vm0 = vcmp.gt.f32.partialorder %v4969_v56, 0.0  ;;  %v5040_v58 = vmul.f32 %v9119_v9, %v4969_v56  ;;  %v4970_v14 = vadd.f32 %v6449_v43, %v9117_v53  ;;  %v5099_v37 = vadd.f32 %v5098_v5, %v5097_v19  ;;  %v6925_v43 = vld [vmem:[#allocation11 + $0x10] sm:$0xff] (!%p5918_p10)  }
 0x2f3   : > { %v5108_v52 = vadd.f32 %v5107_v44, %v5071_v62  ;;  %v6398_v33 = vpop.f32.mrb[28].mxu0  ;;  %v5043_v60 = vmul.f32 %v9119_v9, %v4972_v48  ;;  %vm5005_vm3 = vcmp.gt.f32.partialorder %v4972_v48, 0.0  ;;  %v5074_v54 = vsel %vm5004_vm2, %v4971_v46, %v5042_v39  ;;  %v6926_v44 = vld [vmem:[#allocation11 + $0x18] sm:$0xff] (!%p5918_p10)   ;;  %v6928_v62 = vld [vmem:[#allocation11 + $0x28] sm:$0xff] (!%p5918_p10)  }
 0x2f4   : > { %v5072_v26 = vsel %vm5002_vm0, %v4969_v56, %v5040_v58  ;;  %vm5003_vm1 = vcmp.gt.f32.partialorder %v4970_v14, 0.0  ;;  %v5041_v17 = vmul.f32 %v9119_v9, %v4970_v14  ;;  %v6262_v29 = vpop.f32.mrb[28].mxu1  ;;  %v4891_v21 = vpop.f32.mrb[29].mxu0  ;;  %v5100_v55 = vrot.slane %v5099_v37, 1  ;;  %v6924_v56 = vld [vmem:[#allocation11 + $0x8] sm:$0xff] (!%p5918_p10)   ;;  %v6929_v58 = vld [vmem:[#allocation11 + $0x30] sm:$0xff] (!%p5918_p10)  }
 0x2f5   : > { %v5109_v7 = vadd.f32 %v5108_v52, %v5072_v26  ;;  %v6450_v24 = vadd.f32 %v6398_v33, %v6262_v29  ;;  %v2866_v20 = vpop.f32.mrb[29].mxu1  ;;  %v6399_v49 = vpop.f32.mrb[30].mxu0  ;;  %v5075_v51 = vsel %vm5005_vm3, %v4972_v48, %v5043_v60  ;;  %v7181_v46 = vmov (!%p5918_p10), 0.0   ;;  %v6927_v48 = vld [vmem:[#allocation11 + $0x20] sm:$0xff] (!%p5918_p10)   ;;  %v6930_v33 = vld [vmem:[#allocation11 + $0x38] sm:$0xff] (!%p5918_p10)  }
 0x2f6   : > { %v5073_v30 = vsel %vm5003_vm1, %v4970_v14, %v5041_v17  ;;  %v6451_v11 = vadd.f32 %v4891_v21, %v2866_v20  ;;  %v6263_v36 = vpop.f32.mrb[30].mxu1  ;;  %v4894_v41 = vpop.f32.mrb[31].mxu0  ;;  %v5101_v34 = vadd.f32 %v5100_v55, %v5099_v37  ;;  %6400 = vmatprep.subr.bf16.mxu0 (!%p5918_p10), %v7181_v46  ;;  %6416 = vmatprep.mubr.msk.bf16.mxu0 (!%p5918_p10), %vm7182_vm9, %v7181_v46  ;;  %v5919_v26 = vld [vmem:[#allocation12] ss:$0 sm:$0xff] (!%p5918_p10) }
 0x2f7   : > { %v5110_v12 = vadd.f32 %v5109_v7, %v5073_v30  ;;  %v6452_v31 = vadd.f32 %v6399_v49, %v6263_v36  ;;  %v2869_v8 = vpop.f32.mrb[31].mxu1  ;;  %v4975_v63 = vadd.f32 %v6450_v24, %v9117_v53  ;;  %6401 = vmatpush3.bf16.msra.mxu0 (!%p5918_p10), %v6923_v0 }
 0x2f8   : > { %v4973_v18 = vadd.f32 %v6451_v11, %v9117_v53  ;;  %v6453_v25 = vadd.f32 %v4894_v41, %v2869_v8  ;;  %6402 = vmatprep.subr.bf16.mxu0 (!%p5918_p10), %v7181_v46 }
 0x2f9   : > { %v5111_v4 = vadd.f32 %v5110_v12, %v5074_v54  ;;  %v4976_v6 = vadd.f32 %v6452_v31, %v9117_v53  ;;  %v5046_v1 = vmul.f32 %v9119_v9, %v4975_v63  ;;  %vm5008_vm6 = vcmp.gt.f32.partialorder %v4975_v63, 0.0 }
 0x2fa   : > { %vm5006_vm4 = vcmp.gt.f32.partialorder %v4973_v18, 0.0  ;;  %v5044_v28 = vmul.f32 %v9119_v9, %v4973_v18  ;;  %v4974_v10 = vadd.f32 %v6453_v25, %v9117_v53 }
 0x2fb   : > { %v5112_v61 = vadd.f32 %v5111_v4, %v5075_v51  ;;  %v5047_v50 = vmul.f32 %v9119_v9, %v4976_v6  ;;  %vm5009_vm7 = vcmp.gt.f32.partialorder %v4976_v6, 0.0  ;;  %v5078_v42 = vsel %vm5008_vm6, %v4975_v63, %v5046_v1  ;;  %6403 = vmatpush3.bf16.msra.mxu0 (!%p5918_p10), %v6924_v56 }
 0x2fc   : > { %v5076_v38 = vsel %vm5006_vm4, %v4973_v18, %v5044_v28  ;;  %vm5007_vm5 = vcmp.gt.f32.partialorder %v4974_v10, 0.0  ;;  %v5045_v13 = vmul.f32 %v9119_v9, %v4974_v10  ;;  %v5080_v9 = vld [vmem:[#allocation2] sm:$0x3]  ;;  %6404 = vmatprep.subr.bf16.mxu0 (!%p5918_p10), %v7181_v46 }
 0x2fd   : > { %v5113_v16 = vadd.f32 %v5112_v61, %v5076_v38  ;;  %v5079_v27 = vsel %vm5009_vm7, %v4976_v6, %v5047_v50 }
 0x2fe   : > { %v5077_v35 = vsel %vm5007_vm5, %v4974_v10, %v5045_v13 }
 0x2ff   : > { %v5114_v59 = vadd.f32 %v5113_v16, %v5077_v35  ;;  %6405 = vmatpush3.bf16.msra.mxu0 (!%p5918_p10), %v6925_v43 }
 0x300   : > { %6406 = vmatprep.subr.bf16.mxu0 (!%p5918_p10), %v7181_v46 }
 0x301   : > { %v5115_v53 = vadd.f32 %v5114_v59, %v5078_v42 }
 0x303   : > { %v5116_v47 = vadd.f32 %v5115_v53, %v5079_v27  ;;  %6407 = vmatpush3.bf16.msra.mxu0 (!%p5918_p10), %v6926_v44 }
 0x304   : > { %6408 = vmatprep.subr.bf16.mxu0 (!%p5918_p10), %v7181_v46 }
 0x305   : > { %v5117_v32 = vrot.slane %v5116_v47, 4 }
 0x307   : > { %v5118_v57 = vadd.f32 %v5117_v32, %v5116_v47  ;;  %6409 = vmatpush3.bf16.msra.mxu0 (!%p5918_p10), %v6927_v48 }
 0x308   : > { %6410 = vmatprep.subr.bf16.mxu0 (!%p5918_p10), %v7181_v46 }
 0x309   : > { %v5119_v3 = vrot.slane %v5118_v57, 2 }
 0x30b   : > { %v5120_v15 = vadd.f32 %v5119_v3, %v5118_v57  ;;  %6411 = vmatpush3.bf16.msra.mxu0 (!%p5918_p10), %v6928_v62 }
 0x30c   : > { %6412 = vmatprep.subr.bf16.mxu0 (!%p5918_p10), %v7181_v46 }
 0x30d   : > { %v5121_v22 = vrot.slane %v5120_v15, 1 }
 0x30e   : > { %5133 = sbr.rel (%p5918_p10) target bundleno = 1015 (0x3f7), region = 76 }
 0x30f   : > { %v5122_v23 = vadd.f32 %v5121_v22, %v5120_v15  ;;  %6413 = vmatpush3.bf16.msra.mxu0 (!%p5918_p10), %v6929_v58 }
 0x310   : > { %6414 = vmatprep.subr.bf16.mxu0 (!%p5918_p10), %v7181_v46 }
 0x311   : > { %v5126_v45 = vsel %vm5125_vm8, %v5122_v23, %v5101_v34 }
 0x312   : > { %v5128_v40 = vadd.f32 %v5126_v45, %v5080_v9 }
 0x313   : > { %6415 = vmatpush3.bf16.msra.mxu0 (!%p5918_p10), %v6930_v33 }
 0x314   : > { %5129 = vst [vmem:[#allocation2] sm:$0x3] %v5128_v40 }
 0x31b   : > { %v5134_v14 = vld [vmem:[#allocation2] sm:$0x3] }
 0x31c   : > { %v5135_v52 = vmul.f32 0.00390625, %v5134_v14 }
 0x31e   : > { %v5136_v39 = vpack.c.bf16 %v5135_v52, %v5135_v52 }
 0x320   : > { %6417 = vmatmul.mubr.bf16.vlgmr.msra.gmra.mrb[0].mxu0 %v5136_v39 }
 0x3f3   : > { %v5242_v17 = vpop.f32.mrb[0].mxu0 }
 0x3f4   : > { %v5243_v29 = vadd.f32 %v5919_v26, %v5242_v17  ;;  %v6418_v21 = vpop.f32.mrb[1].mxu0 }
 0x3f5   : > { %v5245_v7 = vpop.f32.mrb[2].mxu0 }
 0x3f6   : > { %5248 = vst [vmem:[#allocation14] sm:$0x3] %v5243_v29  ;;  %v6419_v60 = vpop.f32.mrb[3].mxu0 }
 0x3f7 PF: > { %s9333_s24 = sadd.s32 4294967295, %s7163_s26   ;;  %s7183_s8 = smov [#allocation14]  }
 0x3f8   : > { %p9198_p1 = scmp.eq.s32.totalorder %s9333_s24, 1  ;;  %s5258_s9 = sshll.u32 %s7183_s8, 4  ;;  %s5259_s9 = int_to_ptr.vmem [resolvable:$true] %s5258_s9 }
 0x3f9   : > { %s7071_s11 = scalar_lea.vmem %s5259_s9, 32  ;;  %p7078_p7 = scmp.lt.s32.totalorder %s5259_s9, %s5259_s9 }
 0x3fa   : > { %p7072_p2 = scmp.ne.s32.totalorder %s5259_s9, %s7071_s11  ;;  %p7079_p9 = scmp.lt.s32.totalorder %s7071_s11, %s7071_s11 }
 0x3fc   : > { %p7073_p4 = pnand %p7072_p2, %p9198_p1  ;;  %p7080_p11 = por %p7079_p9, %p7078_p7 }
 0x3fe   : > { %p7074_p6 = pneg %p7073_p4 }
 0x400   : > { %p7081_p13 = pnand %p7080_p11, %p7074_p6 }
 0x402   : > { %7084 = shalt.err (!%p7081_p13)
}
 0x403   : > { %s7085_s13 = scalar_lea.hbm %s9248_s6, 32 }
 0x404   : > { %p7086_p0 = scmp.ne.s32.totalorder %s9248_s6, %s7085_s13  ;;  %p7091_p3 = scmp.lt.u32.totalorder %s7085_s13, %s9248_s6 }
 0x406   : > { %p7087_p12 = pnand %p7086_p0, %p9198_p1 }
 0x408   : > { %p7088_p5 = pneg %p7087_p12 }
 0x40a   : > { %p7093_p8 = pnand %p7091_p3, %p7088_p5 }
 0x40c   : > { %7096 = shalt.err (!%p7093_p8)
}
 0x40d   : > { %6721 = dma.vmem_to_hbm [thread:$0]  (%p9198_p1), %s5259_s9, 32, %s9248_s6, [#allocation5]  }
 0x40e   : > { %7138 = dma.done.wait (%p9198_p1), [#allocation5], 32  }
 0x40f   : > { %7140 = vsyncadd (%p9198_p1), [#allocation5], 4294967264 }
 0x410 PF: > { %s23_s26 = sadd.s32 1, %s7163_s26   ;;  %s9335_s29 = sld [smem:[#allocation24_spill]] }
 0x411   : > { %p20_p10 = scmp.ge.s32.totalorder %s23_s26, 4   ;;  %s9336_s20 = sld [smem:[#allocation23_spill]] }
 0x412   : > { %s9337_s21 = smov %s7147_s22  ;;  %s9338_s22 = smov %s7151_s23 }
 0x413   : > { %s9340_s24 = smov %s7159_s25  ;;  %22 = sbr.rel (!%p20_p10) target bundleno = 10 (0xa), region = 125 }
 0x416   : > { %s9339_s23 = smov %s9335_s29 }
 0x417   : > { %s9341_s25 = smov %s9336_s20 }
 0x41a   :  { %5271 = vsyncpa [#allocation4], 1 }
 0x41b   :  { %5273 = vsyncpa [#allocation4 + $0x1], 1 }
 0x41c   :  { %5274 = vsyncpa [#allocation7], 1 }
 0x41d   :  { %5275 = vsyncpa [#allocation10], 1 }
 0x41e   :  { %5276 = vsyncpa [#allocation13], 1 }
 0x41f   :  { %5277 = vsyncpa [#allocation5], 1 }
 0x420   :  { %5279 = vsyncpa [#allocation5 + $0x1], 1 }

</bundles_post_ra>
